<compile_context>
chip_gen: v7x
topology: tpu7x:2x2x1
jax: 0.10.0
libtpu: 0.0.40
codegen_flags: <defaults>
</compile_context>

<pallas_src>
import functools

import jax
import jax.numpy as jnp
from jax.experimental import pallas as pl
from jax.experimental.pallas import tpu as pltpu

EPS = 1e-5
LANE = 128

_PARALLEL = pltpu.CompilerParams(dimension_semantics=("parallel",))


def _round_up(x, m):
    return (x + m - 1) // m * m


# ----------------------------- Pallas kernels ------------------------------ #

def _conv9(xpad, w_ref, H, W):
    """Sum of 9 shifted MXU dots: xpad (H+2, W+2, Ci), w_ref (9, Ci, Co)."""
    co = w_ref.shape[-1]
    acc = jnp.zeros((H * W, co), jnp.float32)
    for k in range(9):                                # unrolled -> 9 MXU dots
        dy, dx = divmod(k, 3)
        patch = xpad[dy:dy + H, dx:dx + W, :].reshape(H * W, -1)
        acc += jnp.dot(patch, w_ref[k], preferred_element_type=jnp.float32)
    return acc


def _write_stats(st_ref, acc):
    """Row 0 = per-channel sum, row 1 = per-channel sum of squares."""
    co = acc.shape[-1]
    zsum = jnp.sum(acc, axis=0, keepdims=True)
    zsq = jnp.sum(acc * acc, axis=0, keepdims=True)
    st_ref[...] = jnp.concatenate(
        [zsum, zsq, jnp.zeros((6, co), jnp.float32)], axis=0)[None]


def _conv3x3_stats_kernel(xp_ref, w_ref, z_ref, st_ref):
    """3x3 conv (pad=1, stride=1) on one image + BN partial sums.

    xp_ref: (1, H+2, W+2, Ci) bf16  spatially pre-padded input tile
    w_ref : (9, Ci, Co)       bf16  taps in (dy, dx) row-major order
    z_ref : (1, H, W, Co)     bf16  raw conv output (pre-BN)
    st_ref: (1, 8, Co)        f32   row 0 = sum, row 1 = sum of squares
    """
    _, H, W, Co = z_ref.shape
    acc = _conv9(xp_ref[0], w_ref, H, W)
    z_ref[...] = acc.reshape(1, H, W, Co).astype(z_ref.dtype)
    _write_stats(st_ref, acc)


def _bn_relu_conv3x3_stats_kernel(z1_ref, sc_ref, sh_ref, w_ref,
                                  z2_ref, st_ref, ybuf):
    """Apply bn1 (precomputed scale/shift) + ReLU, then 3x3 conv2 + partials.

    z1_ref : (1, H, W, C) bf16  raw conv1 output
    sc_ref, sh_ref: (1, C) f32  bn1 scale / shift
    w_ref  : (9, C, C)    bf16
    z2_ref : (1, H, W, C) bf16  raw conv2 output (pre-BN)
    st_ref : (1, 8, C)    f32
    ybuf   : VMEM (H+2, W+2, C) bf16 scratch (zero halo = conv2 padding)
    """
    _, H, W, C = z2_ref.shape
    y = jnp.maximum(
        z1_ref[0].astype(jnp.float32) * sc_ref[...] + sh_ref[...], 0.0)
    # Zero the whole scratch each step: cheap vs. the 9 matmuls and safe when
    # the grid axis is sharded across TensorCores (no cross-step assumptions).
    ybuf[...] = jnp.zeros(ybuf.shape, ybuf.dtype)
    ybuf[1:H + 1, 1:W + 1, :] = y.astype(ybuf.dtype)
    acc = _conv9(ybuf[...], w_ref, H, W)
    z2_ref[...] = acc.reshape(1, H, W, C).astype(z2_ref.dtype)
    _write_stats(st_ref, acc)


def _bn_add_relu_identity_kernel(z2_ref, sc_ref, sh_ref, x_ref, o_ref):
    """bn2 apply + identity skip + ReLU (no eye() matmul)."""
    y = z2_ref[0].astype(jnp.float32) * sc_ref[...] + sh_ref[...]
    o_ref[...] = jnp.maximum(y + x_ref[0], 0.0)[None].astype(o_ref.dtype)


def _bn_conv1x1_add_relu_kernel(z2_ref, sc_ref, sh_ref, x_ref, w3_ref, b3_ref,
                                o_ref):
    """bn2 apply + 1x1-conv skip (matmul + bias) + ReLU."""
    _, H, W, Co = o_ref.shape
    y = z2_ref[0].astype(jnp.float32) * sc_ref[...] + sh_ref[...]
    xf = x_ref[0].reshape(H * W, -1)                  # (H*W, Ci) bf16
    skip = jnp.dot(xf, w3_ref[...],
                   preferred_element_type=jnp.float32) + b3_ref[...]
    o_ref[...] = jnp.maximum(y + skip.reshape(H, W, Co),
                             0.0)[None].astype(o_ref.dtype)


# ------------------------------- glue (JAX) -------------------------------- #

def _batch_spec(shape):
    """One-image block along the leading (batch) axis, full otherwise."""
    nd = len(shape)
    return pl.BlockSpec((1,) + tuple(shape[1:]),
                        lambda n, _nd=nd: (n,) + (0,) * (_nd - 1))


def _full_spec(shape):
    """Whole array as one block (weights / per-channel scale & shift).

    The block index is constant across the grid, so the pipeline fetches the
    weights into VMEM once and keeps them resident.
    """
    nd = len(shape)
    return pl.BlockSpec(tuple(shape), lambda n, _nd=nd: (0,) * _nd)


def _prep_w3x3(w, ci_p, co_p):
    """(Co, Ci, 3, 3) OIHW -> (9, Ci_p, Co_p) bf16, taps in (dy, dx) order."""
    co, ci = w.shape[0], w.shape[1]
    wm = jnp.transpose(w, (2, 3, 1, 0)).reshape(9, ci, co)
    wm = jnp.pad(wm, ((0, 0), (0, ci_p - ci), (0, co_p - co)))
    return wm.astype(jnp.bfloat16)


def _bn_scale_shift(stats, gamma, beta, count, c_p):
    """Per-channel partial sums -> BN scale/shift (biased var, training mode)."""
    s = jnp.sum(stats[:, 0, :], axis=0)
    sq = jnp.sum(stats[:, 1, :], axis=0)
    mu = s / count
    var = jnp.maximum(sq / count - mu * mu, 0.0)
    c = gamma.shape[0]
    g = jnp.pad(gamma.astype(jnp.float32), (0, c_p - c))   # padded lanes -> 0
    b = jnp.pad(beta.astype(jnp.float32), (0, c_p - c))
    scale = g * jax.lax.rsqrt(var + EPS)
    shift = b - mu * scale
    return scale.reshape(1, c_p), shift.reshape(1, c_p)


@functools.partial(jax.jit, static_argnames=("use_1_1conv",))
def residual_forward(x_nchw, params, use_1_1conv=False):
    N, Cin, H, W = x_nchw.shape
    Cout = params["w1"].shape[0]
    if not use_1_1conv and Cin != Cout:
        raise ValueError("identity skip requires input_channels == out_channels")
    Ci_p = _round_up(Cin, LANE)
    Co_p = _round_up(Cout, LANE)
    count = float(N * H * W)

    x_nhwc = jnp.transpose(x_nchw, (0, 2, 3, 1)).astype(jnp.float32)
    x_cp = jnp.pad(x_nhwc, ((0, 0), (0, 0), (0, 0), (0, Ci_p - Cin)))
    xp = jnp.pad(x_cp, ((0, 0), (1, 1), (1, 1), (0, 0))).astype(jnp.bfloat16)

    w1m = _prep_w3x3(params["w1"], Ci_p, Co_p)
    w2m = _prep_w3x3(params["w2"], Co_p, Co_p)

    # ---- stage 1: conv1 (+ bn1 partial sums); b1 dropped (cancelled by BN) --
    z1, st1 = pl.pallas_call(
        _conv3x3_stats_kernel,
        grid=(N,),
        in_specs=[_batch_spec(xp.shape), _full_spec(w1m.shape)],
        out_specs=[_batch_spec((N, H, W, Co_p)), _batch_spec((N, 8, Co_p))],
        out_shape=[jax.ShapeDtypeStruct((N, H, W, Co_p), jnp.bfloat16),
                   jax.ShapeDtypeStruct((N, 8, Co_p), jnp.float32)],
        compiler_params=_PARALLEL,
    )(xp, w1m)
    sc1, sh1 = _bn_scale_shift(st1, params["gamma1"], params["beta1"],
                               count, Co_p)

    # ---- stage 2: bn1+relu fused into conv2 (+ bn2 partial sums) ----
    z2, st2 = pl.pallas_call(
        _bn_relu_conv3x3_stats_kernel,
        grid=(N,),
        in_specs=[_batch_spec(z1.shape), _full_spec(sc1.shape),
                  _full_spec(sh1.shape), _full_spec(w2m.shape)],
        out_specs=[_batch_spec((N, H, W, Co_p)), _batch_spec((N, 8, Co_p))],
        out_shape=[jax.ShapeDtypeStruct((N, H, W, Co_p), jnp.bfloat16),
                   jax.ShapeDtypeStruct((N, 8, Co_p), jnp.float32)],
        scratch_shapes=[pltpu.VMEM((H + 2, W + 2, Co_p), jnp.bfloat16)],
        compiler_params=_PARALLEL,
    )(z1, sc1, sh1, w2m)
    sc2, sh2 = _bn_scale_shift(st2, params["gamma2"], params["beta2"],
                               count, Co_p)

    # ---- stage 3: bn2 apply + skip path + residual add + relu ----
    if use_1_1conv:
        w3m = jnp.pad(params["w3"].reshape(Cout, Cin).T,
                      ((0, Ci_p - Cin), (0, Co_p - Cout))).astype(jnp.bfloat16)
        b3p = jnp.pad(params["b3"].astype(jnp.float32),
                      (0, Co_p - Cout)).reshape(1, Co_p)
        x_bf = x_cp.astype(jnp.bfloat16)
        out_p = pl.pallas_call(
            _bn_conv1x1_add_relu_kernel,
            grid=(N,),
            in_specs=[_batch_spec(z2.shape), _full_spec(sc2.shape),
                      _full_spec(sh2.shape), _batch_spec(x_bf.shape),
                      _full_spec(w3m.shape), _full_spec(b3p.shape)],
            out_specs=_batch_spec((N, H, W, Co_p)),
            out_shape=jax.ShapeDtypeStruct((N, H, W, Co_p), jnp.float32),
            compiler_params=_PARALLEL,
        )(z2, sc2, sh2, x_bf, w3m, b3p)
    else:
        out_p = pl.pallas_call(
            _bn_add_relu_identity_kernel,
            grid=(N,),
            in_specs=[_batch_spec(z2.shape), _full_spec(sc2.shape),
                      _full_spec(sh2.shape), _batch_spec(x_cp.shape)],
            out_specs=_batch_spec((N, H, W, Co_p)),
            out_shape=jax.ShapeDtypeStruct((N, H, W, Co_p), jnp.float32),
            compiler_params=_PARALLEL,
        )(z2, sc2, sh2, x_cp)

    out = out_p[:, :, :, :Cout]                       # drop lane padding
    return jnp.transpose(out, (0, 3, 1, 2))           # NCHW


# --------------------------- pure-JAX reference ----------------------------- #

def residual_reference(x, params, use_1_1conv=False):
    def conv(x, w, b, pad):
        y = jax.lax.conv_general_dilated(
            x, w, window_strides=(1, 1), padding=pad,
            dimension_numbers=("NCHW", "OIHW", "NCHW"))
        return y + b.reshape(1, -1, 1, 1)

    def bn(x, g, be):
        mu = jnp.mean(x, axis=(0, 2, 3), keepdims=True)
        var = jnp.mean(jnp.square(x - mu), axis=(0, 2, 3), keepdims=True)
        return (x - mu) * jax.lax.rsqrt(var + EPS) * g.reshape(1, -1, 1, 1) \
            + be.reshape(1, -1, 1, 1)

    y = jax.nn.relu(bn(conv(x, params["w1"], params["b1"], [(1, 1), (1, 1)]),
                       params["gamma1"], params["beta1"]))
    y = bn(conv(y, params["w2"], params["b2"], [(1, 1), (1, 1)]),
           params["gamma2"], params["beta2"])
    skip = x
    if use_1_1conv:
        skip = conv(x, params["w3"], params["b3"], [(0, 0), (0, 0)])
    return jax.nn.relu(y + skip)


# ----------------------------------- main ----------------------------------- #

if __name__ == "__main__":
    key = jax.random.PRNGKey(0)
    ks = jax.random.split(key, 8)
    N, Cin, Cout, H, W = 2, 4, 4, 16, 16

    x = jax.random.normal(ks[0], (N, Cin, H, W), jnp.float32)
    params = {
        "w1": 0.1 * jax.random.normal(ks[1], (Cout, Cin, 3, 3), jnp.float32),
        "b1": 0.1 * jax.random.normal(ks[2], (Cout,), jnp.float32),
        "w2": 0.1 * jax.random.normal(ks[3], (Cout, Cout, 3, 3), jnp.float32),
        "b2": 0.1 * jax.random.normal(ks[4], (Cout,), jnp.float32),
        "w3": 0.1 * jax.random.normal(ks[5], (Cout, Cin, 1, 1), jnp.float32),
        "b3": 0.1 * jax.random.normal(ks[6], (Cout,), jnp.float32),
        "gamma1": jnp.ones((Cout,), jnp.float32),
        "beta1": jnp.zeros((Cout,), jnp.float32),
        "gamma2": jnp.ones((Cout,), jnp.float32),
        "beta2": jnp.zeros((Cout,), jnp.float32),
    }

    for use_1x1 in (False, True):
        out = jax.block_until_ready(
            residual_forward(x, params, use_1_1conv=use_1x1))
        ref = residual_reference(x, params, use_1_1conv=use_1x1)
        assert out.shape == (N, Cout, H, W), out.shape
        # Tolerance accounts for bf16 MXU operands / bf16 HBM intermediates
        # compared against a pure-f32 reference.
        assert jnp.allclose(out, ref, atol=5e-2, rtol=5e-2), \
            float(jnp.max(jnp.abs(out - ref)))

    print("KERNEL_OK")
</pallas_src>

<mosaic_0001>
module attributes {stable_mosaic.version = 11 : i64} {
  func.func @_conv3x3_stats_kernel(%arg0: i32, %arg1: memref<1x18x18x128xbf16, #tpu.memory_space<vmem>>, %arg2: memref<9x128x128xbf16, #tpu.memory_space<vmem>>, %arg3: memref<1x16x16x128xbf16, #tpu.memory_space<vmem>>, %arg4: memref<1x8x128xf32, #tpu.memory_space<vmem>>) attributes {dimension_semantics = [#tpu.dimension_semantics<parallel>], iteration_bounds = array<i64: 2>, scalar_prefetch = 0 : i64, scratch_operands = 0 : i64, tpu.core_type = #tpu.core_type<tc>, window_params = [{transform_indices = @transform_0, window_bounds = array<i64: 1, 18, 18, 128>}, {pipeline_mode = #tpu.pipeline_mode<synchronous>, transform_indices = @transform_1, window_bounds = array<i64: 9, 128, 128>}, {transform_indices = @transform_2, window_bounds = array<i64: 1, 16, 16, 128>}, {transform_indices = @transform_3, window_bounds = array<i64: 1, 8, 128>}]} {
    %c0 = arith.constant 0 : index
    %c0_0 = arith.constant 0 : index
    %c0_1 = arith.constant 0 : index
    %c0_2 = arith.constant 0 : index
    %0 = vector.load %arg1[%c0, %c0_0, %c0_1, %c0_2] : memref<1x18x18x128xbf16, #tpu.memory_space<vmem>>, vector<1x18x18x128xbf16>
    %1 = vector.shape_cast %0 : vector<1x18x18x128xbf16> to vector<18x18x128xbf16>
    %cst = arith.constant 0.000000e+00 : f32
    %2 = vector.broadcast %cst : f32 to vector<256x128xf32>
    %3 = vector.extract_strided_slice %1 {offsets = [0, 0, 0], sizes = [16, 16, 128], strides = [1, 1, 1]} : vector<18x18x128xbf16> to vector<16x16x128xbf16>
    %4 = vector.shape_cast %3 : vector<16x16x128xbf16> to vector<256x128xbf16>
    %c0_3 = arith.constant 0 : index
    %c0_4 = arith.constant 0 : index
    %c0_5 = arith.constant 0 : index
    %5 = vector.load %arg2[%c0_3, %c0_4, %c0_5] : memref<9x128x128xbf16, #tpu.memory_space<vmem>>, vector<1x128x128xbf16>
    %6 = vector.shape_cast %5 : vector<1x128x128xbf16> to vector<128x128xbf16>
    %cst_6 = arith.constant dense<0.000000e+00> : vector<256x128xf32>
    %7 = tpu.matmul %4, %6, %cst_6 {dimension_numbers = #tpu.dot_dimension_numbers<[1], [0], [0], [1], [0, 0, 1, 1], [], []>} : vector<256x128xbf16>, vector<128x128xbf16>, vector<256x128xf32> -> vector<256x128xf32>
    %8 = arith.addf %2, %7 : vector<256x128xf32>
    %9 = vector.extract_strided_slice %1 {offsets = [0, 1, 0], sizes = [16, 16, 128], strides = [1, 1, 1]} : vector<18x18x128xbf16> to vector<16x16x128xbf16>
    %10 = vector.shape_cast %9 : vector<16x16x128xbf16> to vector<256x128xbf16>
    %c1 = arith.constant 1 : index
    %c0_7 = arith.constant 0 : index
    %c0_8 = arith.constant 0 : index
    %11 = vector.load %arg2[%c1, %c0_7, %c0_8] : memref<9x128x128xbf16, #tpu.memory_space<vmem>>, vector<1x128x128xbf16>
    %12 = vector.shape_cast %11 : vector<1x128x128xbf16> to vector<128x128xbf16>
    %cst_9 = arith.constant dense<0.000000e+00> : vector<256x128xf32>
    %13 = tpu.matmul %10, %12, %cst_9 {dimension_numbers = #tpu.dot_dimension_numbers<[1], [0], [0], [1], [0, 0, 1, 1], [], []>} : vector<256x128xbf16>, vector<128x128xbf16>, vector<256x128xf32> -> vector<256x128xf32>
    %14 = arith.addf %8, %13 : vector<256x128xf32>
    %15 = vector.extract_strided_slice %1 {offsets = [0, 2, 0], sizes = [16, 16, 128], strides = [1, 1, 1]} : vector<18x18x128xbf16> to vector<16x16x128xbf16>
    %16 = vector.shape_cast %15 : vector<16x16x128xbf16> to vector<256x128xbf16>
    %c2 = arith.constant 2 : index
    %c0_10 = arith.constant 0 : index
    %c0_11 = arith.constant 0 : index
    %17 = vector.load %arg2[%c2, %c0_10, %c0_11] : memref<9x128x128xbf16, #tpu.memory_space<vmem>>, vector<1x128x128xbf16>
    %18 = vector.shape_cast %17 : vector<1x128x128xbf16> to vector<128x128xbf16>
    %cst_12 = arith.constant dense<0.000000e+00> : vector<256x128xf32>
    %19 = tpu.matmul %16, %18, %cst_12 {dimension_numbers = #tpu.dot_dimension_numbers<[1], [0], [0], [1], [0, 0, 1, 1], [], []>} : vector<256x128xbf16>, vector<128x128xbf16>, vector<256x128xf32> -> vector<256x128xf32>
    %20 = arith.addf %14, %19 : vector<256x128xf32>
    %21 = vector.extract_strided_slice %1 {offsets = [1, 0, 0], sizes = [16, 16, 128], strides = [1, 1, 1]} : vector<18x18x128xbf16> to vector<16x16x128xbf16>
    %22 = vector.shape_cast %21 : vector<16x16x128xbf16> to vector<256x128xbf16>
    %c3 = arith.constant 3 : index
    %c0_13 = arith.constant 0 : index
    %c0_14 = arith.constant 0 : index
    %23 = vector.load %arg2[%c3, %c0_13, %c0_14] : memref<9x128x128xbf16, #tpu.memory_space<vmem>>, vector<1x128x128xbf16>
    %24 = vector.shape_cast %23 : vector<1x128x128xbf16> to vector<128x128xbf16>
    %cst_15 = arith.constant dense<0.000000e+00> : vector<256x128xf32>
    %25 = tpu.matmul %22, %24, %cst_15 {dimension_numbers = #tpu.dot_dimension_numbers<[1], [0], [0], [1], [0, 0, 1, 1], [], []>} : vector<256x128xbf16>, vector<128x128xbf16>, vector<256x128xf32> -> vector<256x128xf32>
    %26 = arith.addf %20, %25 : vector<256x128xf32>
    %27 = vector.extract_strided_slice %1 {offsets = [1, 1, 0], sizes = [16, 16, 128], strides = [1, 1, 1]} : vector<18x18x128xbf16> to vector<16x16x128xbf16>
    %28 = vector.shape_cast %27 : vector<16x16x128xbf16> to vector<256x128xbf16>
    %c4 = arith.constant 4 : index
    %c0_16 = arith.constant 0 : index
    %c0_17 = arith.constant 0 : index
    %29 = vector.load %arg2[%c4, %c0_16, %c0_17] : memref<9x128x128xbf16, #tpu.memory_space<vmem>>, vector<1x128x128xbf16>
    %30 = vector.shape_cast %29 : vector<1x128x128xbf16> to vector<128x128xbf16>
    %cst_18 = arith.constant dense<0.000000e+00> : vector<256x128xf32>
    %31 = tpu.matmul %28, %30, %cst_18 {dimension_numbers = #tpu.dot_dimension_numbers<[1], [0], [0], [1], [0, 0, 1, 1], [], []>} : vector<256x128xbf16>, vector<128x128xbf16>, vector<256x128xf32> -> vector<256x128xf32>
    %32 = arith.addf %26, %31 : vector<256x128xf32>
    %33 = vector.extract_strided_slice %1 {offsets = [1, 2, 0], sizes = [16, 16, 128], strides = [1, 1, 1]} : vector<18x18x128xbf16> to vector<16x16x128xbf16>
    %34 = vector.shape_cast %33 : vector<16x16x128xbf16> to vector<256x128xbf16>
    %c5 = arith.constant 5 : index
    %c0_19 = arith.constant 0 : index
    %c0_20 = arith.constant 0 : index
    %35 = vector.load %arg2[%c5, %c0_19, %c0_20] : memref<9x128x128xbf16, #tpu.memory_space<vmem>>, vector<1x128x128xbf16>
    %36 = vector.shape_cast %35 : vector<1x128x128xbf16> to vector<128x128xbf16>
    %cst_21 = arith.constant dense<0.000000e+00> : vector<256x128xf32>
    %37 = tpu.matmul %34, %36, %cst_21 {dimension_numbers = #tpu.dot_dimension_numbers<[1], [0], [0], [1], [0, 0, 1, 1], [], []>} : vector<256x128xbf16>, vector<128x128xbf16>, vector<256x128xf32> -> vector<256x128xf32>
    %38 = arith.addf %32, %37 : vector<256x128xf32>
    %39 = vector.extract_strided_slice %1 {offsets = [2, 0, 0], sizes = [16, 16, 128], strides = [1, 1, 1]} : vector<18x18x128xbf16> to vector<16x16x128xbf16>
    %40 = vector.shape_cast %39 : vector<16x16x128xbf16> to vector<256x128xbf16>
    %c6 = arith.constant 6 : index
    %c0_22 = arith.constant 0 : index
    %c0_23 = arith.constant 0 : index
    %41 = vector.load %arg2[%c6, %c0_22, %c0_23] : memref<9x128x128xbf16, #tpu.memory_space<vmem>>, vector<1x128x128xbf16>
    %42 = vector.shape_cast %41 : vector<1x128x128xbf16> to vector<128x128xbf16>
    %cst_24 = arith.constant dense<0.000000e+00> : vector<256x128xf32>
    %43 = tpu.matmul %40, %42, %cst_24 {dimension_numbers = #tpu.dot_dimension_numbers<[1], [0], [0], [1], [0, 0, 1, 1], [], []>} : vector<256x128xbf16>, vector<128x128xbf16>, vector<256x128xf32> -> vector<256x128xf32>
    %44 = arith.addf %38, %43 : vector<256x128xf32>
    %45 = vector.extract_strided_slice %1 {offsets = [2, 1, 0], sizes = [16, 16, 128], strides = [1, 1, 1]} : vector<18x18x128xbf16> to vector<16x16x128xbf16>
    %46 = vector.shape_cast %45 : vector<16x16x128xbf16> to vector<256x128xbf16>
    %c7 = arith.constant 7 : index
    %c0_25 = arith.constant 0 : index
    %c0_26 = arith.constant 0 : index
    %47 = vector.load %arg2[%c7, %c0_25, %c0_26] : memref<9x128x128xbf16, #tpu.memory_space<vmem>>, vector<1x128x128xbf16>
    %48 = vector.shape_cast %47 : vector<1x128x128xbf16> to vector<128x128xbf16>
    %cst_27 = arith.constant dense<0.000000e+00> : vector<256x128xf32>
    %49 = tpu.matmul %46, %48, %cst_27 {dimension_numbers = #tpu.dot_dimension_numbers<[1], [0], [0], [1], [0, 0, 1, 1], [], []>} : vector<256x128xbf16>, vector<128x128xbf16>, vector<256x128xf32> -> vector<256x128xf32>
    %50 = arith.addf %44, %49 : vector<256x128xf32>
    %51 = vector.extract_strided_slice %1 {offsets = [2, 2, 0], sizes = [16, 16, 128], strides = [1, 1, 1]} : vector<18x18x128xbf16> to vector<16x16x128xbf16>
    %52 = vector.shape_cast %51 : vector<16x16x128xbf16> to vector<256x128xbf16>
    %c8 = arith.constant 8 : index
    %c0_28 = arith.constant 0 : index
    %c0_29 = arith.constant 0 : index
    %53 = vector.load %arg2[%c8, %c0_28, %c0_29] : memref<9x128x128xbf16, #tpu.memory_space<vmem>>, vector<1x128x128xbf16>
    %54 = vector.shape_cast %53 : vector<1x128x128xbf16> to vector<128x128xbf16>
    %cst_30 = arith.constant dense<0.000000e+00> : vector<256x128xf32>
    %55 = tpu.matmul %52, %54, %cst_30 {dimension_numbers = #tpu.dot_dimension_numbers<[1], [0], [0], [1], [0, 0, 1, 1], [], []>} : vector<256x128xbf16>, vector<128x128xbf16>, vector<256x128xf32> -> vector<256x128xf32>
    %56 = arith.addf %50, %55 : vector<256x128xf32>
    %57 = vector.shape_cast %56 : vector<256x128xf32> to vector<1x16x16x128xf32>
    %58 = arith.truncf %57 : vector<1x16x16x128xf32> to vector<1x16x16x128xbf16>
    %c0_31 = arith.constant 0 : index
    %c0_32 = arith.constant 0 : index
    %c0_33 = arith.constant 0 : index
    %c0_34 = arith.constant 0 : index
    %59 = vector.load %arg3[%c0_31, %c0_32, %c0_33, %c0_34] : memref<1x16x16x128xbf16, #tpu.memory_space<vmem>>, vector<1x16x16x128xbf16>
    tpu.vector_store %arg3[%c0_31, %c0_32, %c0_33, %c0_34], %58 {strides = array<i32>} : memref<1x16x16x128xbf16, #tpu.memory_space<vmem>>, vector<1x16x16x128xbf16>,
    %cst_35 = arith.constant dense<0.000000e+00> : vector<128xf32>
    %60 = vector.multi_reduction <add>, %56, %cst_35 [0] : vector<256x128xf32> to vector<128xf32>
    %61 = vector.shape_cast %60 : vector<128xf32> to vector<1x128xf32>
    %62 = arith.mulf %56, %56 : vector<256x128xf32>
    %cst_36 = arith.constant dense<0.000000e+00> : vector<128xf32>
    %63 = vector.multi_reduction <add>, %62, %cst_36 [0] : vector<256x128xf32> to vector<128xf32>
    %64 = vector.shape_cast %63 : vector<128xf32> to vector<1x128xf32>
    %cst_37 = arith.constant 0.000000e+00 : f32
    %65 = vector.broadcast %cst_37 : f32 to vector<6x128xf32>
    %66 = tpu.concatenate %61, %64, %65 in 0 : vector<1x128xf32>, vector<1x128xf32>, vector<6x128xf32> -> vector<8x128xf32>
    %67 = vector.shape_cast %66 : vector<8x128xf32> to vector<1x8x128xf32>
    %c0_38 = arith.constant 0 : index
    %c0_39 = arith.constant 0 : index
    %c0_40 = arith.constant 0 : index
    %68 = vector.load %arg4[%c0_38, %c0_39, %c0_40] : memref<1x8x128xf32, #tpu.memory_space<vmem>>, vector<1x8x128xf32>
    tpu.vector_store %arg4[%c0_38, %c0_39, %c0_40], %67 {strides = array<i32>} : memref<1x8x128xf32, #tpu.memory_space<vmem>>, vector<1x8x128xf32>,
    return
  }
  func.func @transform_0(%arg0: i32) -> (i32, i32, i32, i32) {
    %c0_i32 = arith.constant 0 : i32
    %c0_i32_0 = arith.constant 0 : i32
    %c0_i32_1 = arith.constant 0 : i32
    %c0_i32_2 = arith.constant 0 : i32
    return %arg0, %c0_i32, %c0_i32_0, %c0_i32_1 : i32, i32, i32, i32
  }
  func.func @transform_1(%arg0: i32) -> (i32, i32, i32) {
    %c0_i32 = arith.constant 0 : i32
    %c0_i32_0 = arith.constant 0 : i32
    %c0_i32_1 = arith.constant 0 : i32
    %c0_i32_2 = arith.constant 0 : i32
    return %c0_i32, %c0_i32_0, %c0_i32_1 : i32, i32, i32
  }
  func.func @transform_2(%arg0: i32) -> (i32, i32, i32, i32) {
    %c0_i32 = arith.constant 0 : i32
    %c0_i32_0 = arith.constant 0 : i32
    %c0_i32_1 = arith.constant 0 : i32
    %c0_i32_2 = arith.constant 0 : i32
    return %arg0, %c0_i32, %c0_i32_0, %c0_i32_1 : i32, i32, i32, i32
  }
  func.func @transform_3(%arg0: i32) -> (i32, i32, i32) {
    %c0_i32 = arith.constant 0 : i32
    %c0_i32_0 = arith.constant 0 : i32
    %c0_i32_1 = arith.constant 0 : i32
    return %arg0, %c0_i32, %c0_i32_0 : i32, i32, i32
  }
}

module attributes {stable_mosaic.version = 11 : i64} {
  func.func @_bn_relu_conv3x3_stats_kernel(%arg0: i32, %arg1: memref<1x16x16x128xbf16, #tpu.memory_space<vmem>>, %arg2: memref<1x128xf32, #tpu.memory_space<vmem>>, %arg3: memref<1x128xf32, #tpu.memory_space<vmem>>, %arg4: memref<9x128x128xbf16, #tpu.memory_space<vmem>>, %arg5: memref<1x16x16x128xbf16, #tpu.memory_space<vmem>>, %arg6: memref<1x8x128xf32, #tpu.memory_space<vmem>>, %arg7: memref<18x18x128xbf16, #tpu.memory_space<vmem>>) attributes {dimension_semantics = [#tpu.dimension_semantics<parallel>], iteration_bounds = array<i64: 2>, scalar_prefetch = 0 : i64, scratch_operands = 1 : i64, tpu.core_type = #tpu.core_type<tc>, window_params = [{transform_indices = @transform_0, window_bounds = array<i64: 1, 16, 16, 128>}, {pipeline_mode = #tpu.pipeline_mode<synchronous>, transform_indices = @transform_1, window_bounds = array<i64: 1, 128>}, {pipeline_mode = #tpu.pipeline_mode<synchronous>, transform_indices = @transform_2, window_bounds = array<i64: 1, 128>}, {pipeline_mode = #tpu.pipeline_mode<synchronous>, transform_indices = @transform_3, window_bounds = array<i64: 9, 128, 128>}, {transform_indices = @transform_4, window_bounds = array<i64: 1, 16, 16, 128>}, {transform_indices = @transform_5, window_bounds = array<i64: 1, 8, 128>}]} {
    %c0 = arith.constant 0 : index
    %c0_0 = arith.constant 0 : index
    %c0_1 = arith.constant 0 : index
    %c0_2 = arith.constant 0 : index
    %0 = vector.load %arg1[%c0, %c0_0, %c0_1, %c0_2] : memref<1x16x16x128xbf16, #tpu.memory_space<vmem>>, vector<1x16x16x128xbf16>
    %1 = vector.shape_cast %0 : vector<1x16x16x128xbf16> to vector<16x16x128xbf16>
    %2 = arith.extf %1 : vector<16x16x128xbf16> to vector<16x16x128xf32>
    %c0_3 = arith.constant 0 : index
    %c0_4 = arith.constant 0 : index
    %3 = vector.load %arg2[%c0_3, %c0_4] : memref<1x128xf32, #tpu.memory_space<vmem>>, vector<1x128xf32>
    %4 = vector.shape_cast %3 : vector<1x128xf32> to vector<1x1x128xf32>
    %5 = vector.broadcast %4 : vector<1x1x128xf32> to vector<16x16x128xf32>
    %6 = arith.mulf %2, %5 : vector<16x16x128xf32>
    %c0_5 = arith.constant 0 : index
    %c0_6 = arith.constant 0 : index
    %7 = vector.load %arg3[%c0_5, %c0_6] : memref<1x128xf32, #tpu.memory_space<vmem>>, vector<1x128xf32>
    %8 = vector.shape_cast %7 : vector<1x128xf32> to vector<1x1x128xf32>
    %9 = vector.broadcast %8 : vector<1x1x128xf32> to vector<16x16x128xf32>
    %10 = arith.addf %6, %9 : vector<16x16x128xf32>
    %cst = arith.constant 0.000000e+00 : f32
    %11 = vector.broadcast %cst : f32 to vector<16x16x128xf32>
    %12 = arith.maximumf %10, %11 : vector<16x16x128xf32>
    %cst_7 = arith.constant 0.000000e+00 : bf16
    %13 = vector.broadcast %cst_7 : bf16 to vector<18x18x128xbf16>
    %c0_8 = arith.constant 0 : index
    %c0_9 = arith.constant 0 : index
    %c0_10 = arith.constant 0 : index
    %14 = vector.load %arg7[%c0_8, %c0_9, %c0_10] : memref<18x18x128xbf16, #tpu.memory_space<vmem>>, vector<18x18x128xbf16>
    tpu.vector_store %arg7[%c0_8, %c0_9, %c0_10], %13 {strides = array<i32>} : memref<18x18x128xbf16, #tpu.memory_space<vmem>>, vector<18x18x128xbf16>,
    %15 = arith.truncf %12 : vector<16x16x128xf32> to vector<16x16x128xbf16>
    %c1 = arith.constant 1 : index
    %c1_11 = arith.constant 1 : index
    %c0_12 = arith.constant 0 : index
    %16 = vector.load %arg7[%c1, %c1_11, %c0_12] : memref<18x18x128xbf16, #tpu.memory_space<vmem>>, vector<16x16x128xbf16>
    tpu.vector_store %arg7[%c1, %c1_11, %c0_12], %15 {strides = array<i32>} : memref<18x18x128xbf16, #tpu.memory_space<vmem>>, vector<16x16x128xbf16>,
    %c0_13 = arith.constant 0 : index
    %c0_14 = arith.constant 0 : index
    %c0_15 = arith.constant 0 : index
    %17 = vector.load %arg7[%c0_13, %c0_14, %c0_15] : memref<18x18x128xbf16, #tpu.memory_space<vmem>>, vector<18x18x128xbf16>
    %cst_16 = arith.constant 0.000000e+00 : f32
    %18 = vector.broadcast %cst_16 : f32 to vector<256x128xf32>
    %19 = vector.extract_strided_slice %17 {offsets = [0, 0, 0], sizes = [16, 16, 128], strides = [1, 1, 1]} : vector<18x18x128xbf16> to vector<16x16x128xbf16>
    %20 = vector.shape_cast %19 : vector<16x16x128xbf16> to vector<256x128xbf16>
    %c0_17 = arith.constant 0 : index
    %c0_18 = arith.constant 0 : index
    %c0_19 = arith.constant 0 : index
    %21 = vector.load %arg4[%c0_17, %c0_18, %c0_19] : memref<9x128x128xbf16, #tpu.memory_space<vmem>>, vector<1x128x128xbf16>
    %22 = vector.shape_cast %21 : vector<1x128x128xbf16> to vector<128x128xbf16>
    %cst_20 = arith.constant dense<0.000000e+00> : vector<256x128xf32>
    %23 = tpu.matmul %20, %22, %cst_20 {dimension_numbers = #tpu.dot_dimension_numbers<[1], [0], [0], [1], [0, 0, 1, 1], [], []>} : vector<256x128xbf16>, vector<128x128xbf16>, vector<256x128xf32> -> vector<256x128xf32>
    %24 = arith.addf %18, %23 : vector<256x128xf32>
    %25 = vector.extract_strided_slice %17 {offsets = [0, 1, 0], sizes = [16, 16, 128], strides = [1, 1, 1]} : vector<18x18x128xbf16> to vector<16x16x128xbf16>
    %26 = vector.shape_cast %25 : vector<16x16x128xbf16> to vector<256x128xbf16>
    %c1_21 = arith.constant 1 : index
    %c0_22 = arith.constant 0 : index
    %c0_23 = arith.constant 0 : index
    %27 = vector.load %arg4[%c1_21, %c0_22, %c0_23] : memref<9x128x128xbf16, #tpu.memory_space<vmem>>, vector<1x128x128xbf16>
    %28 = vector.shape_cast %27 : vector<1x128x128xbf16> to vector<128x128xbf16>
    %cst_24 = arith.constant dense<0.000000e+00> : vector<256x128xf32>
    %29 = tpu.matmul %26, %28, %cst_24 {dimension_numbers = #tpu.dot_dimension_numbers<[1], [0], [0], [1], [0, 0, 1, 1], [], []>} : vector<256x128xbf16>, vector<128x128xbf16>, vector<256x128xf32> -> vector<256x128xf32>
    %30 = arith.addf %24, %29 : vector<256x128xf32>
    %31 = vector.extract_strided_slice %17 {offsets = [0, 2, 0], sizes = [16, 16, 128], strides = [1, 1, 1]} : vector<18x18x128xbf16> to vector<16x16x128xbf16>
    %32 = vector.shape_cast %31 : vector<16x16x128xbf16> to vector<256x128xbf16>
    %c2 = arith.constant 2 : index
    %c0_25 = arith.constant 0 : index
    %c0_26 = arith.constant 0 : index
    %33 = vector.load %arg4[%c2, %c0_25, %c0_26] : memref<9x128x128xbf16, #tpu.memory_space<vmem>>, vector<1x128x128xbf16>
    %34 = vector.shape_cast %33 : vector<1x128x128xbf16> to vector<128x128xbf16>
    %cst_27 = arith.constant dense<0.000000e+00> : vector<256x128xf32>
    %35 = tpu.matmul %32, %34, %cst_27 {dimension_numbers = #tpu.dot_dimension_numbers<[1], [0], [0], [1], [0, 0, 1, 1], [], []>} : vector<256x128xbf16>, vector<128x128xbf16>, vector<256x128xf32> -> vector<256x128xf32>
    %36 = arith.addf %30, %35 : vector<256x128xf32>
    %37 = vector.extract_strided_slice %17 {offsets = [1, 0, 0], sizes = [16, 16, 128], strides = [1, 1, 1]} : vector<18x18x128xbf16> to vector<16x16x128xbf16>
    %38 = vector.shape_cast %37 : vector<16x16x128xbf16> to vector<256x128xbf16>
    %c3 = arith.constant 3 : index
    %c0_28 = arith.constant 0 : index
    %c0_29 = arith.constant 0 : index
    %39 = vector.load %arg4[%c3, %c0_28, %c0_29] : memref<9x128x128xbf16, #tpu.memory_space<vmem>>, vector<1x128x128xbf16>
    %40 = vector.shape_cast %39 : vector<1x128x128xbf16> to vector<128x128xbf16>
    %cst_30 = arith.constant dense<0.000000e+00> : vector<256x128xf32>
    %41 = tpu.matmul %38, %40, %cst_30 {dimension_numbers = #tpu.dot_dimension_numbers<[1], [0], [0], [1], [0, 0, 1, 1], [], []>} : vector<256x128xbf16>, vector<128x128xbf16>, vector<256x128xf32> -> vector<256x128xf32>
    %42 = arith.addf %36, %41 : vector<256x128xf32>
    %43 = vector.extract_strided_slice %17 {offsets = [1, 1, 0], sizes = [16, 16, 128], strides = [1, 1, 1]} : vector<18x18x128xbf16> to vector<16x16x128xbf16>
    %44 = vector.shape_cast %43 : vector<16x16x128xbf16> to vector<256x128xbf16>
    %c4 = arith.constant 4 : index
    %c0_31 = arith.constant 0 : index
    %c0_32 = arith.constant 0 : index
    %45 = vector.load %arg4[%c4, %c0_31, %c0_32] : memref<9x128x128xbf16, #tpu.memory_space<vmem>>, vector<1x128x128xbf16>
    %46 = vector.shape_cast %45 : vector<1x128x128xbf16> to vector<128x128xbf16>
    %cst_33 = arith.constant dense<0.000000e+00> : vector<256x128xf32>
    %47 = tpu.matmul %44, %46, %cst_33 {dimension_numbers = #tpu.dot_dimension_numbers<[1], [0], [0], [1], [0, 0, 1, 1], [], []>} : vector<256x128xbf16>, vector<128x128xbf16>, vector<256x128xf32> -> vector<256x128xf32>
    %48 = arith.addf %42, %47 : vector<256x128xf32>
    %49 = vector.extract_strided_slice %17 {offsets = [1, 2, 0], sizes = [16, 16, 128], strides = [1, 1, 1]} : vector<18x18x128xbf16> to vector<16x16x128xbf16>
    %50 = vector.shape_cast %49 : vector<16x16x128xbf16> to vector<256x128xbf16>
    %c5 = arith.constant 5 : index
    %c0_34 = arith.constant 0 : index
    %c0_35 = arith.constant 0 : index
    %51 = vector.load %arg4[%c5, %c0_34, %c0_35] : memref<9x128x128xbf16, #tpu.memory_space<vmem>>, vector<1x128x128xbf16>
    %52 = vector.shape_cast %51 : vector<1x128x128xbf16> to vector<128x128xbf16>
    %cst_36 = arith.constant dense<0.000000e+00> : vector<256x128xf32>
    %53 = tpu.matmul %50, %52, %cst_36 {dimension_numbers = #tpu.dot_dimension_numbers<[1], [0], [0], [1], [0, 0, 1, 1], [], []>} : vector<256x128xbf16>, vector<128x128xbf16>, vector<256x128xf32> -> vector<256x128xf32>
    %54 = arith.addf %48, %53 : vector<256x128xf32>
    %55 = vector.extract_strided_slice %17 {offsets = [2, 0, 0], sizes = [16, 16, 128], strides = [1, 1, 1]} : vector<18x18x128xbf16> to vector<16x16x128xbf16>
    %56 = vector.shape_cast %55 : vector<16x16x128xbf16> to vector<256x128xbf16>
    %c6 = arith.constant 6 : index
    %c0_37 = arith.constant 0 : index
    %c0_38 = arith.constant 0 : index
    %57 = vector.load %arg4[%c6, %c0_37, %c0_38] : memref<9x128x128xbf16, #tpu.memory_space<vmem>>, vector<1x128x128xbf16>
    %58 = vector.shape_cast %57 : vector<1x128x128xbf16> to vector<128x128xbf16>
    %cst_39 = arith.constant dense<0.000000e+00> : vector<256x128xf32>
    %59 = tpu.matmul %56, %58, %cst_39 {dimension_numbers = #tpu.dot_dimension_numbers<[1], [0], [0], [1], [0, 0, 1, 1], [], []>} : vector<256x128xbf16>, vector<128x128xbf16>, vector<256x128xf32> -> vector<256x128xf32>
    %60 = arith.addf %54, %59 : vector<256x128xf32>
    %61 = vector.extract_strided_slice %17 {offsets = [2, 1, 0], sizes = [16, 16, 128], strides = [1, 1, 1]} : vector<18x18x128xbf16> to vector<16x16x128xbf16>
    %62 = vector.shape_cast %61 : vector<16x16x128xbf16> to vector<256x128xbf16>
    %c7 = arith.constant 7 : index
    %c0_40 = arith.constant 0 : index
    %c0_41 = arith.constant 0 : index
    %63 = vector.load %arg4[%c7, %c0_40, %c0_41] : memref<9x128x128xbf16, #tpu.memory_space<vmem>>, vector<1x128x128xbf16>
    %64 = vector.shape_cast %63 : vector<1x128x128xbf16> to vector<128x128xbf16>
    %cst_42 = arith.constant dense<0.000000e+00> : vector<256x128xf32>
    %65 = tpu.matmul %62, %64, %cst_42 {dimension_numbers = #tpu.dot_dimension_numbers<[1], [0], [0], [1], [0, 0, 1, 1], [], []>} : vector<256x128xbf16>, vector<128x128xbf16>, vector<256x128xf32> -> vector<256x128xf32>
    %66 = arith.addf %60, %65 : vector<256x128xf32>
    %67 = vector.extract_strided_slice %17 {offsets = [2, 2, 0], sizes = [16, 16, 128], strides = [1, 1, 1]} : vector<18x18x128xbf16> to vector<16x16x128xbf16>
    %68 = vector.shape_cast %67 : vector<16x16x128xbf16> to vector<256x128xbf16>
    %c8 = arith.constant 8 : index
    %c0_43 = arith.constant 0 : index
    %c0_44 = arith.constant 0 : index
    %69 = vector.load %arg4[%c8, %c0_43, %c0_44] : memref<9x128x128xbf16, #tpu.memory_space<vmem>>, vector<1x128x128xbf16>
    %70 = vector.shape_cast %69 : vector<1x128x128xbf16> to vector<128x128xbf16>
    %cst_45 = arith.constant dense<0.000000e+00> : vector<256x128xf32>
    %71 = tpu.matmul %68, %70, %cst_45 {dimension_numbers = #tpu.dot_dimension_numbers<[1], [0], [0], [1], [0, 0, 1, 1], [], []>} : vector<256x128xbf16>, vector<128x128xbf16>, vector<256x128xf32> -> vector<256x128xf32>
    %72 = arith.addf %66, %71 : vector<256x128xf32>
    %73 = vector.shape_cast %72 : vector<256x128xf32> to vector<1x16x16x128xf32>
    %74 = arith.truncf %73 : vector<1x16x16x128xf32> to vector<1x16x16x128xbf16>
    %c0_46 = arith.constant 0 : index
    %c0_47 = arith.constant 0 : index
    %c0_48 = arith.constant 0 : index
    %c0_49 = arith.constant 0 : index
    %75 = vector.load %arg5[%c0_46, %c0_47, %c0_48, %c0_49] : memref<1x16x16x128xbf16, #tpu.memory_space<vmem>>, vector<1x16x16x128xbf16>
    tpu.vector_store %arg5[%c0_46, %c0_47, %c0_48, %c0_49], %74 {strides = array<i32>} : memref<1x16x16x128xbf16, #tpu.memory_space<vmem>>, vector<1x16x16x128xbf16>,
    %cst_50 = arith.constant dense<0.000000e+00> : vector<128xf32>
    %76 = vector.multi_reduction <add>, %72, %cst_50 [0] : vector<256x128xf32> to vector<128xf32>
    %77 = vector.shape_cast %76 : vector<128xf32> to vector<1x128xf32>
    %78 = arith.mulf %72, %72 : vector<256x128xf32>
    %cst_51 = arith.constant dense<0.000000e+00> : vector<128xf32>
    %79 = vector.multi_reduction <add>, %78, %cst_51 [0] : vector<256x128xf32> to vector<128xf32>
    %80 = vector.shape_cast %79 : vector<128xf32> to vector<1x128xf32>
    %cst_52 = arith.constant 0.000000e+00 : f32
    %81 = vector.broadcast %cst_52 : f32 to vector<6x128xf32>
    %82 = tpu.concatenate %77, %80, %81 in 0 : vector<1x128xf32>, vector<1x128xf32>, vector<6x128xf32> -> vector<8x128xf32>
    %83 = vector.shape_cast %82 : vector<8x128xf32> to vector<1x8x128xf32>
    %c0_53 = arith.constant 0 : index
    %c0_54 = arith.constant 0 : index
    %c0_55 = arith.constant 0 : index
    %84 = vector.load %arg6[%c0_53, %c0_54, %c0_55] : memref<1x8x128xf32, #tpu.memory_space<vmem>>, vector<1x8x128xf32>
    tpu.vector_store %arg6[%c0_53, %c0_54, %c0_55], %83 {strides = array<i32>} : memref<1x8x128xf32, #tpu.memory_space<vmem>>, vector<1x8x128xf32>,
    return
  }
  func.func @transform_0(%arg0: i32) -> (i32, i32, i32, i32) {
    %c0_i32 = arith.constant 0 : i32
    %c0_i32_0 = arith.constant 0 : i32
    %c0_i32_1 = arith.constant 0 : i32
    %c0_i32_2 = arith.constant 0 : i32
    return %arg0, %c0_i32, %c0_i32_0, %c0_i32_1 : i32, i32, i32, i32
  }
  func.func @transform_1(%arg0: i32) -> (i32, i32) {
    %c0_i32 = arith.constant 0 : i32
    %c0_i32_0 = arith.constant 0 : i32
    %c0_i32_1 = arith.constant 0 : i32
    return %c0_i32, %c0_i32_0 : i32, i32
  }
  func.func @transform_2(%arg0: i32) -> (i32, i32) {
    %c0_i32 = arith.constant 0 : i32
    %c0_i32_0 = arith.constant 0 : i32
    %c0_i32_1 = arith.constant 0 : i32
    return %c0_i32, %c0_i32_0 : i32, i32
  }
  func.func @transform_3(%arg0: i32) -> (i32, i32, i32) {
    %c0_i32 = arith.constant 0 : i32
    %c0_i32_0 = arith.constant 0 : i32
    %c0_i32_1 = arith.constant 0 : i32
    %c0_i32_2 = arith.constant 0 : i32
    return %c0_i32, %c0_i32_0, %c0_i32_1 : i32, i32, i32
  }
  func.func @transform_4(%arg0: i32) -> (i32, i32, i32, i32) {
    %c0_i32 = arith.constant 0 : i32
    %c0_i32_0 = arith.constant 0 : i32
    %c0_i32_1 = arith.constant 0 : i32
    %c0_i32_2 = arith.constant 0 : i32
    return %arg0, %c0_i32, %c0_i32_0, %c0_i32_1 : i32, i32, i32, i32
  }
  func.func @transform_5(%arg0: i32) -> (i32, i32, i32) {
    %c0_i32 = arith.constant 0 : i32
    %c0_i32_0 = arith.constant 0 : i32
    %c0_i32_1 = arith.constant 0 : i32
    return %arg0, %c0_i32, %c0_i32_0 : i32, i32, i32
  }
}

module attributes {stable_mosaic.version = 11 : i64} {
  func.func @_bn_add_relu_identity_kernel(%arg0: i32, %arg1: memref<1x16x16x128xbf16, #tpu.memory_space<vmem>>, %arg2: memref<1x128xf32, #tpu.memory_space<vmem>>, %arg3: memref<1x128xf32, #tpu.memory_space<vmem>>, %arg4: memref<1x16x16x128xf32, #tpu.memory_space<vmem>>, %arg5: memref<1x16x16x128xf32, #tpu.memory_space<vmem>>) attributes {dimension_semantics = [#tpu.dimension_semantics<parallel>], iteration_bounds = array<i64: 2>, scalar_prefetch = 0 : i64, scratch_operands = 0 : i64, tpu.core_type = #tpu.core_type<tc>, window_params = [{transform_indices = @transform_0, window_bounds = array<i64: 1, 16, 16, 128>}, {pipeline_mode = #tpu.pipeline_mode<synchronous>, transform_indices = @transform_1, window_bounds = array<i64: 1, 128>}, {pipeline_mode = #tpu.pipeline_mode<synchronous>, transform_indices = @transform_2, window_bounds = array<i64: 1, 128>}, {transform_indices = @transform_3, window_bounds = array<i64: 1, 16, 16, 128>}, {transform_indices = @transform_4, window_bounds = array<i64: 1, 16, 16, 128>}]} {
    %c0 = arith.constant 0 : index
    %c0_0 = arith.constant 0 : index
    %c0_1 = arith.constant 0 : index
    %c0_2 = arith.constant 0 : index
    %0 = vector.load %arg1[%c0, %c0_0, %c0_1, %c0_2] : memref<1x16x16x128xbf16, #tpu.memory_space<vmem>>, vector<1x16x16x128xbf16>
    %1 = vector.shape_cast %0 : vector<1x16x16x128xbf16> to vector<16x16x128xbf16>
    %2 = arith.extf %1 : vector<16x16x128xbf16> to vector<16x16x128xf32>
    %c0_3 = arith.constant 0 : index
    %c0_4 = arith.constant 0 : index
    %3 = vector.load %arg2[%c0_3, %c0_4] : memref<1x128xf32, #tpu.memory_space<vmem>>, vector<1x128xf32>
    %4 = vector.shape_cast %3 : vector<1x128xf32> to vector<1x1x128xf32>
    %5 = vector.broadcast %4 : vector<1x1x128xf32> to vector<16x16x128xf32>
    %6 = arith.mulf %2, %5 : vector<16x16x128xf32>
    %c0_5 = arith.constant 0 : index
    %c0_6 = arith.constant 0 : index
    %7 = vector.load %arg3[%c0_5, %c0_6] : memref<1x128xf32, #tpu.memory_space<vmem>>, vector<1x128xf32>
    %8 = vector.shape_cast %7 : vector<1x128xf32> to vector<1x1x128xf32>
    %9 = vector.broadcast %8 : vector<1x1x128xf32> to vector<16x16x128xf32>
    %10 = arith.addf %6, %9 : vector<16x16x128xf32>
    %c0_7 = arith.constant 0 : index
    %c0_8 = arith.constant 0 : index
    %c0_9 = arith.constant 0 : index
    %c0_10 = arith.constant 0 : index
    %11 = vector.load %arg4[%c0_7, %c0_8, %c0_9, %c0_10] : memref<1x16x16x128xf32, #tpu.memory_space<vmem>>, vector<1x16x16x128xf32>
    %12 = vector.shape_cast %11 : vector<1x16x16x128xf32> to vector<16x16x128xf32>
    %13 = arith.addf %10, %12 : vector<16x16x128xf32>
    %cst = arith.constant 0.000000e+00 : f32
    %14 = vector.broadcast %cst : f32 to vector<16x16x128xf32>
    %15 = arith.maximumf %13, %14 : vector<16x16x128xf32>
    %16 = vector.shape_cast %15 : vector<16x16x128xf32> to vector<1x16x16x128xf32>
    %c0_11 = arith.constant 0 : index
    %c0_12 = arith.constant 0 : index
    %c0_13 = arith.constant 0 : index
    %c0_14 = arith.constant 0 : index
    %17 = vector.load %arg5[%c0_11, %c0_12, %c0_13, %c0_14] : memref<1x16x16x128xf32, #tpu.memory_space<vmem>>, vector<1x16x16x128xf32>
    tpu.vector_store %arg5[%c0_11, %c0_12, %c0_13, %c0_14], %16 {strides = array<i32>} : memref<1x16x16x128xf32, #tpu.memory_space<vmem>>, vector<1x16x16x128xf32>,
    return
  }
  func.func @transform_0(%arg0: i32) -> (i32, i32, i32, i32) {
    %c0_i32 = arith.constant 0 : i32
    %c0_i32_0 = arith.constant 0 : i32
    %c0_i32_1 = arith.constant 0 : i32
    %c0_i32_2 = arith.constant 0 : i32
    return %arg0, %c0_i32, %c0_i32_0, %c0_i32_1 : i32, i32, i32, i32
  }
  func.func @transform_1(%arg0: i32) -> (i32, i32) {
    %c0_i32 = arith.constant 0 : i32
    %c0_i32_0 = arith.constant 0 : i32
    %c0_i32_1 = arith.constant 0 : i32
    return %c0_i32, %c0_i32_0 : i32, i32
  }
  func.func @transform_2(%arg0: i32) -> (i32, i32) {
    %c0_i32 = arith.constant 0 : i32
    %c0_i32_0 = arith.constant 0 : i32
    %c0_i32_1 = arith.constant 0 : i32
    return %c0_i32, %c0_i32_0 : i32, i32
  }
  func.func @transform_3(%arg0: i32) -> (i32, i32, i32, i32) {
    %c0_i32 = arith.constant 0 : i32
    %c0_i32_0 = arith.constant 0 : i32
    %c0_i32_1 = arith.constant 0 : i32
    %c0_i32_2 = arith.constant 0 : i32
    return %arg0, %c0_i32, %c0_i32_0, %c0_i32_1 : i32, i32, i32, i32
  }
  func.func @transform_4(%arg0: i32) -> (i32, i32, i32, i32) {
    %c0_i32 = arith.constant 0 : i32
    %c0_i32_0 = arith.constant 0 : i32
    %c0_i32_1 = arith.constant 0 : i32
    %c0_i32_2 = arith.constant 0 : i32
    return %arg0, %c0_i32, %c0_i32_0, %c0_i32_1 : i32, i32, i32, i32
  }
}

</mosaic_0001>

<bundles_post_ra>
// kernel: residual_forward.5
= control target key start
LH: loop header
LB: loop body
LE: loop exit
PB: predicated region body
PF: predicated region fallthrough
CT: control target
= control target key end

     0   :  { %s693_s15 = smov 0   ;;  %s881_s0 = inlined_call_operand.vmem [shape: bf16[2,16,16,128], index: 0, kind: input, shape index: {}]   ;;  %s882_s1 = inlined_call_operand.vmem [shape: f32[1,128], index: 1, kind: input, shape index: {}]   ;;  %s883_s2 = inlined_call_operand.vmem [shape: f32[1,128], index: 2, kind: input, shape index: {}]   ;;  %s884_s3 = inlined_call_operand.vmem [shape: f32[2,16,16,128], index: 3, kind: input, shape index: {}]   ;;  %s885_s4 = inlined_call_operand.vmem [shape: f32[2,16,16,128], index: 4, kind: output, shape index: {}]  }
   0x1 LB: > { %s555_s16 = sadd.s32 4294967295, %s666_s15   ;;  %p559_p0 = scmp.ge.s32.totalorder %s666_s15, 1  ;;  %s666_s15 = sphi %s693_s15, %s14_s15  }
   0x2   : > { %p172_p1 = scmp.lt.s32.totalorder %s666_s15, 3 }
   0x4   : > { %p173_p2 = pnand %p559_p0, %p172_p1 }
   0x5   : > { %p203_p3 = scmp.lt.s32.totalorder (!%p173_p2), %s555_s16, 1  ;;  %v714_v1 = vld [vmem:[%s882_s1] ss:$0 sm:$0xff] (!%p173_p2) }
   0x6   : > { %176 = sbr.rel (%p173_p2) target bundleno = 60 (0x3c), region = 36  ;;  %v727_v5 = vld [vmem:[%s883_s2] ss:$0 sm:$0xff] (!%p173_p2) }
   0xd   : > { %s887_s16 = smov (!%p203_p3, %s555_s16), 1 }
   0xe   : > { %s570_s17 = sshll.u32 %s887_s16, 7  ;;  %s571_s18 = sshll.u32 %s887_s16, 8 }
   0xf   : > { %s708_s21 = scalar_lea.vmem %s881_s0, %s570_s17  ;;  %s721_s26 = scalar_lea.vmem %s884_s3, %s571_s18 }
  0x10   : > { %v574_v0 = vld [vmem:[%s708_s21] sm:$0xff]   ;;  %v637_v4 = vld [vmem:[%s708_s21 + $0x8] sm:$0xff]   ;;  %v638_v8 = vld [vmem:[%s708_s21 + $0x10] sm:$0xff]   ;;  %s758_s5 = scalar_lea.vmem %s885_s4, %s571_s18 }
  0x11   : > { %v575_v2 = vunpack.c.l.bf16 %v574_v0  ;;  %v576_v3 = vunpack.c.h.bf16 %v574_v0  ;;  %v579_v6 = vunpack.c.l.bf16 %v637_v4  ;;  %v580_v7 = vunpack.c.h.bf16 %v637_v4  ;;  %v639_v13 = vld [vmem:[%s708_s21 + $0x18] sm:$0xff]   ;;  %v360_v14 = vld [vmem:[%s721_s26] sm:$0xff]  ;;  %v361_v15 = vld [vmem:[%s721_s26 + $0x8] sm:$0xff] }
  0x12   : > { %v583_v11 = vunpack.c.l.bf16 %v638_v8  ;;  %v584_v12 = vunpack.c.h.bf16 %v638_v8  ;;  %v587_v18 = vunpack.c.l.bf16 %v639_v13  ;;  %v588_v19 = vunpack.c.h.bf16 %v639_v13  ;;  %v362_v22 = vld [vmem:[%s721_s26 + $0x10] sm:$0xff]  ;;  %v363_v23 = vld [vmem:[%s721_s26 + $0x18] sm:$0xff]  ;;  %v364_v28 = vld [vmem:[%s721_s26 + $0x20] sm:$0xff] }
  0x13   : > { %v289_v9 = vmul.f32 %v575_v2, %v714_v1  ;;  %v290_v10 = vmul.f32 %v576_v3, %v714_v1  ;;  %v291_v16 = vmul.f32 %v579_v6, %v714_v1  ;;  %v292_v17 = vmul.f32 %v580_v7, %v714_v1  ;;  %v365_v29 = vld [vmem:[%s721_s26 + $0x28] sm:$0xff]  ;;  %v366_v36 = vld [vmem:[%s721_s26 + $0x30] sm:$0xff]  ;;  %v367_v37 = vld [vmem:[%s721_s26 + $0x38] sm:$0xff] }
  0x14   : > { %v293_v24 = vmul.f32 %v583_v11, %v714_v1  ;;  %v294_v25 = vmul.f32 %v584_v12, %v714_v1  ;;  %v295_v30 = vmul.f32 %v587_v18, %v714_v1  ;;  %v296_v31 = vmul.f32 %v588_v19, %v714_v1  ;;  %v640_v42 = vld [vmem:[%s708_s21 + $0x20] sm:$0xff]   ;;  %v641_v47 = vld [vmem:[%s708_s21 + $0x28] sm:$0xff]   ;;  %v642_v52 = vld [vmem:[%s708_s21 + $0x30] sm:$0xff]  }
  0x15   : > { %v328_v20 = vadd.f32 %v727_v5, %v289_v9  ;;  %v329_v21 = vadd.f32 %v727_v5, %v290_v10  ;;  %v330_v26 = vadd.f32 %v727_v5, %v291_v16  ;;  %v331_v27 = vadd.f32 %v727_v5, %v292_v17  ;;  %v643_v57 = vld [vmem:[%s708_s21 + $0x38] sm:$0xff]   ;;  %v368_v3 = vld [vmem:[%s721_s26 + $0x40] sm:$0xff]  ;;  %v369_v4 = vld [vmem:[%s721_s26 + $0x48] sm:$0xff] }
  0x16   : > { %v332_v34 = vadd.f32 %v727_v5, %v293_v24  ;;  %v333_v35 = vadd.f32 %v727_v5, %v294_v25  ;;  %v334_v40 = vadd.f32 %v727_v5, %v295_v30  ;;  %v335_v41 = vadd.f32 %v727_v5, %v296_v31  ;;  %v370_v12 = vld [vmem:[%s721_s26 + $0x50] sm:$0xff]  ;;  %v371_v13 = vld [vmem:[%s721_s26 + $0x58] sm:$0xff]  ;;  %v372_v18 = vld [vmem:[%s721_s26 + $0x60] sm:$0xff] }
  0x17   : > { %v392_v32 = vadd.f32 %v360_v14, %v328_v20  ;;  %v393_v33 = vadd.f32 %v361_v15, %v329_v21  ;;  %v394_v38 = vadd.f32 %v362_v22, %v330_v26  ;;  %v395_v39 = vadd.f32 %v363_v23, %v331_v27  ;;  %v373_v19 = vld [vmem:[%s721_s26 + $0x68] sm:$0xff]  ;;  %v374_v26 = vld [vmem:[%s721_s26 + $0x70] sm:$0xff]  ;;  %v375_v27 = vld [vmem:[%s721_s26 + $0x78] sm:$0xff] }
  0x18   : > { %v396_v45 = vadd.f32 %v364_v28, %v332_v34  ;;  %v397_v46 = vadd.f32 %v365_v29, %v333_v35  ;;  %v398_v50 = vadd.f32 %v366_v36, %v334_v40  ;;  %v399_v51 = vadd.f32 %v367_v37, %v335_v41  ;;  %v645_v37 = vld [vmem:[%s708_s21 + $0x48] sm:$0xff]  }
  0x19   : > { %v424_v43 = vmax.f32 %v392_v32, 0.0  ;;  %v425_v44 = vmax.f32 %v393_v33, 0.0  ;;  %v426_v48 = vmax.f32 %v394_v38, 0.0  ;;  %v427_v49 = vmax.f32 %v395_v39, 0.0  ;;  %v644_v32 = vld [vmem:[%s708_s21 + $0x40] sm:$0xff]  }
  0x1a   : > { %v428_v53 = vmax.f32 %v396_v45, 0.0  ;;  %v429_v54 = vmax.f32 %v397_v46, 0.0  ;;  %v591_v55 = vunpack.c.l.bf16 %v640_v42  ;;  %v592_v56 = vunpack.c.h.bf16 %v640_v42  ;;  %v646_v42 = vld [vmem:[%s708_s21 + $0x50] sm:$0xff]  }
  0x1b   : > { %456 = vst [vmem:[%s758_s5] sm:$0xff] %v424_v43  ;;  %457 = vst [vmem:[%s758_s5 + $0x8] sm:$0xff] %v425_v44  ;;  %v430_v58 = vmax.f32 %v398_v50, 0.0  ;;  %v431_v59 = vmax.f32 %v399_v51, 0.0  ;;  %v595_v60 = vunpack.c.l.bf16 %v641_v47  ;;  %v596_v61 = vunpack.c.h.bf16 %v641_v47  ;;  %v647_v47 = vld [vmem:[%s708_s21 + $0x58] sm:$0xff]  }
  0x1c   : > { %458 = vst [vmem:[%s758_s5 + $0x10] sm:$0xff] %v426_v48  ;;  %459 = vst [vmem:[%s758_s5 + $0x18] sm:$0xff] %v427_v49  ;;  %v297_v62 = vmul.f32 %v591_v55, %v714_v1  ;;  %v298_v63 = vmul.f32 %v592_v56, %v714_v1  ;;  %v599_v0 = vunpack.c.l.bf16 %v642_v52  ;;  %v600_v2 = vunpack.c.h.bf16 %v642_v52  ;;  %v376_v56 = vld [vmem:[%s721_s26 + $0x80] sm:$0xff] }
  0x1d   : > { %460 = vst [vmem:[%s758_s5 + $0x20] sm:$0xff] %v428_v53  ;;  %461 = vst [vmem:[%s758_s5 + $0x28] sm:$0xff] %v429_v54  ;;  %v299_v6 = vmul.f32 %v595_v60, %v714_v1  ;;  %v300_v7 = vmul.f32 %v596_v61, %v714_v1  ;;  %v603_v8 = vunpack.c.l.bf16 %v643_v57  ;;  %v604_v9 = vunpack.c.h.bf16 %v643_v57  ;;  %v377_v57 = vld [vmem:[%s721_s26 + $0x88] sm:$0xff] }
  0x1e   : > { %462 = vst [vmem:[%s758_s5 + $0x30] sm:$0xff] %v430_v58  ;;  %463 = vst [vmem:[%s758_s5 + $0x38] sm:$0xff] %v431_v59  ;;  %v336_v10 = vadd.f32 %v727_v5, %v297_v62  ;;  %v337_v11 = vadd.f32 %v727_v5, %v298_v63  ;;  %v301_v14 = vmul.f32 %v599_v0, %v714_v1  ;;  %v607_v45 = vunpack.c.l.bf16 %v644_v32  ;;  %v378_v0 = vld [vmem:[%s721_s26 + $0x90] sm:$0xff] }
  0x1f   : > { %v302_v15 = vmul.f32 %v600_v2, %v714_v1  ;;  %v338_v16 = vadd.f32 %v727_v5, %v299_v6  ;;  %v339_v17 = vadd.f32 %v727_v5, %v300_v7  ;;  %v303_v20 = vmul.f32 %v603_v8, %v714_v1  ;;  %v379_v2 = vld [vmem:[%s721_s26 + $0x98] sm:$0xff]  ;;  %v380_v8 = vld [vmem:[%s721_s26 + $0xa0] sm:$0xff] }
  0x20   : > { %v304_v21 = vmul.f32 %v604_v9, %v714_v1  ;;  %v400_v22 = vadd.f32 %v368_v3, %v336_v10  ;;  %v401_v23 = vadd.f32 %v369_v4, %v337_v11  ;;  %v340_v24 = vadd.f32 %v727_v5, %v301_v14  ;;  %v381_v9 = vld [vmem:[%s721_s26 + $0xa8] sm:$0xff] }
  0x21   : > { %v341_v25 = vadd.f32 %v727_v5, %v302_v15  ;;  %v402_v28 = vadd.f32 %v370_v12, %v338_v16  ;;  %v403_v29 = vadd.f32 %v371_v13, %v339_v17  ;;  %v342_v30 = vadd.f32 %v727_v5, %v303_v20  ;;  %v382_v16 = vld [vmem:[%s721_s26 + $0xb0] sm:$0xff]  ;;  %v383_v17 = vld [vmem:[%s721_s26 + $0xb8] sm:$0xff] }
  0x22   : > { %v343_v31 = vadd.f32 %v727_v5, %v304_v21  ;;  %v432_v33 = vmax.f32 %v400_v22, 0.0  ;;  %v433_v34 = vmax.f32 %v401_v23, 0.0  ;;  %v404_v35 = vadd.f32 %v372_v18, %v340_v24  ;;  %v648_v22 = vld [vmem:[%s708_s21 + $0x60] sm:$0xff]  }
  0x23   : > { %v405_v36 = vadd.f32 %v373_v19, %v341_v25  ;;  %v434_v38 = vmax.f32 %v402_v28, 0.0  ;;  %v435_v39 = vmax.f32 %v403_v29, 0.0  ;;  %v406_v40 = vadd.f32 %v374_v26, %v342_v30 }
  0x24   : > { %v407_v41 = vadd.f32 %v375_v27, %v343_v31  ;;  %464 = vst [vmem:[%s758_s5 + $0x40] sm:$0xff] %v432_v33  ;;  %465 = vst [vmem:[%s758_s5 + $0x48] sm:$0xff] %v433_v34  ;;  %v436_v43 = vmax.f32 %v404_v35, 0.0  ;;  %v608_v46 = vunpack.c.h.bf16 %v644_v32  ;;  %v611_v50 = vunpack.c.l.bf16 %v645_v37  ;;  %v649_v27 = vld [vmem:[%s708_s21 + $0x68] sm:$0xff]   ;;  %v650_v32 = vld [vmem:[%s708_s21 + $0x70] sm:$0xff]  }
  0x25   : > { %v437_v44 = vmax.f32 %v405_v36, 0.0  ;;  %466 = vst [vmem:[%s758_s5 + $0x50] sm:$0xff] %v434_v38  ;;  %467 = vst [vmem:[%s758_s5 + $0x58] sm:$0xff] %v435_v39  ;;  %v438_v48 = vmax.f32 %v406_v40, 0.0  ;;  %v612_v51 = vunpack.c.h.bf16 %v645_v37  ;;  %v305_v52 = vmul.f32 %v607_v45, %v714_v1  ;;  %v651_v37 = vld [vmem:[%s708_s21 + $0x78] sm:$0xff]  }
  0x26   : > { %v439_v49 = vmax.f32 %v407_v41, 0.0  ;;  %468 = vst [vmem:[%s758_s5 + $0x60] sm:$0xff] %v436_v43  ;;  %v306_v53 = vmul.f32 %v608_v46, %v714_v1  ;;  %v615_v54 = vunpack.c.l.bf16 %v646_v42  ;;  %v616_v55 = vunpack.c.h.bf16 %v646_v42  ;;  %v384_v46 = vld [vmem:[%s721_s26 + $0xc0] sm:$0xff] }
  0x27   : > { %469 = vst [vmem:[%s758_s5 + $0x68] sm:$0xff] %v437_v44  ;;  %470 = vst [vmem:[%s758_s5 + $0x70] sm:$0xff] %v438_v48  ;;  %v307_v58 = vmul.f32 %v611_v50, %v714_v1  ;;  %v308_v59 = vmul.f32 %v612_v51, %v714_v1  ;;  %v619_v60 = vunpack.c.l.bf16 %v647_v47  ;;  %v620_v61 = vunpack.c.h.bf16 %v647_v47  ;;  %v385_v47 = vld [vmem:[%s721_s26 + $0xc8] sm:$0xff] }
  0x28   : > { %471 = vst [vmem:[%s758_s5 + $0x78] sm:$0xff] %v439_v49  ;;  %v344_v62 = vadd.f32 %v727_v5, %v305_v52  ;;  %v345_v63 = vadd.f32 %v727_v5, %v306_v53  ;;  %v309_v3 = vmul.f32 %v615_v54, %v714_v1  ;;  %v310_v4 = vmul.f32 %v616_v55, %v714_v1  ;;  %v386_v54 = vld [vmem:[%s721_s26 + $0xd0] sm:$0xff]  ;;  %v387_v55 = vld [vmem:[%s721_s26 + $0xd8] sm:$0xff] }
  0x29   : > { %v346_v6 = vadd.f32 %v727_v5, %v307_v58  ;;  %v347_v7 = vadd.f32 %v727_v5, %v308_v59  ;;  %v311_v10 = vmul.f32 %v619_v60, %v714_v1  ;;  %v312_v11 = vmul.f32 %v620_v61, %v714_v1  ;;  %v388_v60 = vld [vmem:[%s721_s26 + $0xe0] sm:$0xff]  ;;  %v389_v61 = vld [vmem:[%s721_s26 + $0xe8] sm:$0xff] }
  0x2a   : > { %v408_v12 = vadd.f32 %v376_v56, %v344_v62  ;;  %v409_v13 = vadd.f32 %v377_v57, %v345_v63  ;;  %v348_v14 = vadd.f32 %v727_v5, %v309_v3  ;;  %v349_v15 = vadd.f32 %v727_v5, %v310_v4 }
  0x2b   : > { %v410_v18 = vadd.f32 %v378_v0, %v346_v6  ;;  %v411_v19 = vadd.f32 %v379_v2, %v347_v7  ;;  %v350_v20 = vadd.f32 %v727_v5, %v311_v10  ;;  %v351_v21 = vadd.f32 %v727_v5, %v312_v11  ;;  %v390_v6 = vld [vmem:[%s721_s26 + $0xf0] sm:$0xff]  ;;  %v391_v7 = vld [vmem:[%s721_s26 + $0xf8] sm:$0xff] }
  0x2c   : > { %v440_v23 = vmax.f32 %v408_v12, 0.0  ;;  %v441_v24 = vmax.f32 %v409_v13, 0.0  ;;  %v412_v25 = vadd.f32 %v380_v8, %v348_v14  ;;  %v413_v26 = vadd.f32 %v381_v9, %v349_v15 }
  0x2d   : > { %v442_v28 = vmax.f32 %v410_v18, 0.0  ;;  %v443_v29 = vmax.f32 %v411_v19, 0.0  ;;  %v414_v30 = vadd.f32 %v382_v16, %v350_v20  ;;  %v415_v31 = vadd.f32 %v383_v17, %v351_v21 }
  0x2e   : > { %472 = vst [vmem:[%s758_s5 + $0x80] sm:$0xff] %v440_v23  ;;  %473 = vst [vmem:[%s758_s5 + $0x88] sm:$0xff] %v441_v24  ;;  %v444_v33 = vmax.f32 %v412_v25, 0.0  ;;  %v445_v34 = vmax.f32 %v413_v26, 0.0  ;;  %v623_v35 = vunpack.c.l.bf16 %v648_v22  ;;  %v624_v36 = vunpack.c.h.bf16 %v648_v22 }
  0x2f   : > { %474 = vst [vmem:[%s758_s5 + $0x90] sm:$0xff] %v442_v28  ;;  %475 = vst [vmem:[%s758_s5 + $0x98] sm:$0xff] %v443_v29  ;;  %v446_v38 = vmax.f32 %v414_v30, 0.0  ;;  %v447_v39 = vmax.f32 %v415_v31, 0.0  ;;  %v627_v40 = vunpack.c.l.bf16 %v649_v27  ;;  %v628_v41 = vunpack.c.h.bf16 %v649_v27 }
  0x30   : > { %476 = vst [vmem:[%s758_s5 + $0xa0] sm:$0xff] %v444_v33  ;;  %477 = vst [vmem:[%s758_s5 + $0xa8] sm:$0xff] %v445_v34  ;;  %v313_v42 = vmul.f32 %v623_v35, %v714_v1  ;;  %v314_v43 = vmul.f32 %v624_v36, %v714_v1  ;;  %v631_v44 = vunpack.c.l.bf16 %v650_v32  ;;  %v632_v45 = vunpack.c.h.bf16 %v650_v32 }
  0x31   : > { %478 = vst [vmem:[%s758_s5 + $0xb0] sm:$0xff] %v446_v38  ;;  %479 = vst [vmem:[%s758_s5 + $0xb8] sm:$0xff] %v447_v39  ;;  %v315_v48 = vmul.f32 %v627_v40, %v714_v1  ;;  %v316_v49 = vmul.f32 %v628_v41, %v714_v1  ;;  %v635_v50 = vunpack.c.l.bf16 %v651_v37  ;;  %v636_v51 = vunpack.c.h.bf16 %v651_v37 }
  0x32   : > { %v352_v52 = vadd.f32 %v727_v5, %v313_v42  ;;  %v353_v53 = vadd.f32 %v727_v5, %v314_v43  ;;  %v317_v56 = vmul.f32 %v631_v44, %v714_v1  ;;  %v318_v57 = vmul.f32 %v632_v45, %v714_v1 }
  0x33   : > { %v354_v58 = vadd.f32 %v727_v5, %v315_v48  ;;  %v355_v59 = vadd.f32 %v727_v5, %v316_v49  ;;  %v319_v62 = vmul.f32 %v635_v50, %v714_v1  ;;  %v320_v63 = vmul.f32 %v636_v51, %v714_v1 }
  0x34   : > { %v416_v0 = vadd.f32 %v384_v46, %v352_v52  ;;  %v417_v2 = vadd.f32 %v385_v47, %v353_v53  ;;  %v356_v3 = vadd.f32 %v727_v5, %v317_v56  ;;  %v357_v4 = vadd.f32 %v727_v5, %v318_v57 }
  0x35   : > { %v418_v8 = vadd.f32 %v386_v54, %v354_v58  ;;  %v419_v9 = vadd.f32 %v387_v55, %v355_v59  ;;  %v358_v10 = vadd.f32 %v727_v5, %v319_v62  ;;  %v359_v11 = vadd.f32 %v727_v5, %v320_v63 }
  0x36   : > { %v448_v12 = vmax.f32 %v416_v0, 0.0  ;;  %v449_v1 = vmax.f32 %v417_v2, 0.0  ;;  %v420_v13 = vadd.f32 %v388_v60, %v356_v3  ;;  %v421_v14 = vadd.f32 %v389_v61, %v357_v4 }
  0x37   : > { %v450_v15 = vmax.f32 %v418_v8, 0.0  ;;  %v451_v16 = vmax.f32 %v419_v9, 0.0  ;;  %v422_v17 = vadd.f32 %v390_v6, %v358_v10  ;;  %v423_v18 = vadd.f32 %v391_v7, %v359_v11 }
  0x38   : > { %480 = vst [vmem:[%s758_s5 + $0xc0] sm:$0xff] %v448_v12  ;;  %481 = vst [vmem:[%s758_s5 + $0xc8] sm:$0xff] %v449_v1  ;;  %v452_v19 = vmax.f32 %v420_v13, 0.0  ;;  %v453_v20 = vmax.f32 %v421_v14, 0.0 }
  0x39   : > { %482 = vst [vmem:[%s758_s5 + $0xd0] sm:$0xff] %v450_v15  ;;  %483 = vst [vmem:[%s758_s5 + $0xd8] sm:$0xff] %v451_v16  ;;  %v454_v21 = vmax.f32 %v422_v17, 0.0  ;;  %v455_v5 = vmax.f32 %v423_v18, 0.0 }
  0x3a   : > { %484 = vst [vmem:[%s758_s5 + $0xe0] sm:$0xff] %v452_v19  ;;  %485 = vst [vmem:[%s758_s5 + $0xe8] sm:$0xff] %v453_v20 }
  0x3b   : > { %486 = vst [vmem:[%s758_s5 + $0xf0] sm:$0xff] %v454_v21  ;;  %487 = vst [vmem:[%s758_s5 + $0xf8] sm:$0xff] %v455_v5 }
  0x3c PF: > { %s14_s15 = sadd.s32 1, %s666_s15  }
  0x3d   : > { %p11_p4 = scmp.ge.s32.totalorder %s14_s15, 4  }
  0x3f   :  { %13 = sbr.rel (!%p11_p4) target bundleno = 1 (0x1), region = 69 }

// kernel: residual_forward.3
= control target key start
LH: loop header
LB: loop body
LE: loop exit
PB: predicated region body
PF: predicated region fallthrough
CT: control target
= control target key end

     0   :  { %s5192_s12 = smov 0   ;;  %s6223_s0 = inlined_call_operand.vmem [shape: bf16[2,18,18,128], index: 0, kind: input, shape index: {}]   ;;  %s6224_s1 = inlined_call_operand.vmem [shape: bf16[9,128,128], index: 1, kind: input, shape index: {}]   ;;  %s6225_s2 = inlined_call_operand.vmem [shape: bf16[2,16,16,128], index: 2, kind: output, shape index: {0}]   ;;  %s6226_s3 = inlined_call_operand.vmem [shape: f32[2,8,128], index: 3, kind: output, shape index: {1}]  }
   0x1 LB: > { %s3685_s13 = sadd.s32 4294967295, %s5170_s12   ;;  %p3689_p0 = scmp.ge.s32.totalorder %s5170_s12, 1  ;;  %s5170_s12 = sphi %s5192_s12, %s14_s12  }
   0x2   : > { %p140_p1 = scmp.lt.s32.totalorder %s5170_s12, 3 }
   0x4   : > { %p141_p2 = pnand %p3689_p0, %p140_p1 }
   0x6   : > { %144 = sbr.rel (%p141_p2) target bundleno = 577 (0x241), region = 28 }
   0xd   : > { %v5057_v0 = vld [vmem:[%s6224_s1 + $0x40] sm:$0xff]   ;;  %p168_p3 = scmp.lt.s32.totalorder %s3685_s13, 1  ;;  %v5059_v2 = vld [vmem:[%s6224_s1 + $0x48] sm:$0xff]   ;;  %v5061_v4 = vld [vmem:[%s6224_s1 + $0x50] sm:$0xff]   ;;  %vm253_vm0 = vsmask.f32 3328 }
   0xe   : > { %v5058_v1 = vld [vmem:[%s6224_s1 + $0x100] sm:$0xff]   ;;  %4344 = vmatprep.subr.bf16.mxu1 %v5057_v0  ;;  %v5060_v3 = vld [vmem:[%s6224_s1 + $0x108] sm:$0xff]   ;;  %v5062_v5 = vld [vmem:[%s6224_s1 + $0x110] sm:$0xff]   ;;  %vm254_vm1 = vsmask.f32 7440  ;;  %vm1251_vm3 = vcmask 1042432  }
   0xf   : > { %4536 = vmatprep.subr.bf16.mxu0 %v5058_v1  ;;  %4345 = vmatpush3.bf16.msra.mxu1 %v5057_v0  ;;  %s6271_s13 = smov (!%p168_p3, %s3685_s13), 1  ;;  %v5063_v6 = vld [vmem:[%s6224_s1 + $0x58] sm:$0xff]   ;;  %v5065_v8 = vld [vmem:[%s6224_s1 + $0x60] sm:$0xff]   ;;  %v5067_v10 = vld [vmem:[%s6224_s1 + $0x68] sm:$0xff]   ;;  %vm1252_vm4 = vcmask 1046532   ;;  %vm3594_vm6 = vcmask 1040384  }
  0x10   : > { %4537 = vmatpush3.bf16.msra.mxu0 %v5058_v1  ;;  %4346 = vmatprep.subr.bf16.mxu1 %v5059_v2  ;;  %v5064_v7 = vld [vmem:[%s6224_s1 + $0x118] sm:$0xff]   ;;  %s5048_s30 = smul.u32 216, %s6271_s13  ;;  %v5066_v9 = vld [vmem:[%s6224_s1 + $0x120] sm:$0xff]   ;;  %v5068_v11 = vld [vmem:[%s6224_s1 + $0x128] sm:$0xff]   ;;  %s4000_s5 = sshll.u32 %s6271_s13, 7  ;;  %vm3596_vm7 = vcmask 1041408  }
  0x11   : > { %4538 = vmatprep.subr.bf16.mxu0 %v5060_v3  ;;  %v5069_v17 = vld [vmem:[%s6224_s1 + $0x70] sm:$0xff]   ;;  %v5071_v36 = vld [vmem:[%s6224_s1 + $0x78] sm:$0xff]   ;;  %vm5281_vm2 = vmor %vm253_vm0, %vm254_vm1  ;;  %s6194_s8 = scalar_lea.vmem %s6225_s2, %s4000_s5  ;;  %s3693_s9 = sshll.u32 %s6271_s13, 3 }
  0x12   : > { %s5236_s10 = scalar_lea.vmem %s6223_s0, %s5048_s30  ;;  %v5070_v31 = vld [vmem:[%s6224_s1 + $0x130] sm:$0xff]   ;;  %v5072_v53 = vld [vmem:[%s6224_s1 + $0x138] sm:$0xff]   ;;  %v5073_v1 = vld [vmem:[%s6224_s1] sm:$0xff]   ;;  %s181_s15 = scalar_lea.vmem %s6226_s3, %s3693_s9 }
  0x13   : > { %4347 = vmatpush3.bf16.msra.mxu1 %v5059_v2  ;;  %v5245_v12 = vld [vmem:[%s5236_s10] sm:$0xf]  ;;  %v5248_v13 = vld [vmem:[%s5236_s10 + $0x4] sm:$0xf]  ;;  %v185_v14 = vld [vmem:[%s5236_s10 + $0x8] sm:$0x1] }
  0x14   : > { %4539 = vmatpush3.bf16.msra.mxu0 %v5060_v3  ;;  %4348 = vmatprep.subr.bf16.mxu1 %v5061_v4  ;;  %v257_v15 = vshrl.u32 %v5245_v12, 16  ;;  %v260_v16 = vshll.u32 %v5245_v12, 16  ;;  %v266_v18 = vshll.u32 %v5248_v13, 16  ;;  %v270_v19 = vshrl.u32 %v5248_v13, 16  ;;  %v5259_v21 = vld [vmem:[%s5236_s10 + $0xc] sm:$0xf]  ;;  %vm5488_vm5 = vmor %vm1251_vm3, %vm1252_vm4 }
  0x15   : > { %4540 = vmatprep.subr.bf16.mxu0 %v5062_v5  ;;  %v276_v20 = vshll.u32 %v185_v14, 16  ;;  %v5262_v24 = vld [vmem:[%s5236_s10 + $0x10] sm:$0xf]  ;;  %v5265_v25 = vld [vmem:[%s5236_s10 + $0x14] sm:$0x1]  ;;  %v281_v30 = vshrl.u32 %v5259_v21, 16 }
  0x16   : > { %v259_v22 = vrot.slane %v257_v15, 4  ;;  %v262_v23 = vrot.slane %v260_v16, 5  ;;  %v268_v27 = vrot.slane %v266_v18, 5  ;;  %v272_v28 = vrot.slane %v270_v19, 4  ;;  %v5287_v41 = vld [vmem:[%s5236_s10 + $0x18] sm:$0xf] }
  0x17   : > { %4349 = vmatpush3.bf16.msra.mxu1 %v5061_v4  ;;  %v278_v29 = vrot.slane %v276_v20, 5  ;;  %v284_v33 = vshll.u32 %v5259_v21, 16  ;;  %v290_v34 = vshll.u32 %v5262_v24, 16  ;;  %v294_v35 = vshrl.u32 %v5262_v24, 16  ;;  %v5290_v42 = vld [vmem:[%s5236_s10 + $0x1c] sm:$0xf] }
  0x18   : > { %4541 = vmatpush3.bf16.msra.mxu0 %v5062_v5  ;;  %4350 = vmatprep.subr.bf16.mxu1 %v5063_v6  ;;  %v263_v32 = vor.u32 %v262_v23, %v259_v22  ;;  %v273_v38 = vor.u32 %v272_v28, %v268_v27  ;;  %v283_v39 = vrot.slane %v281_v30, 4  ;;  %v300_v40 = vshll.u32 %v5265_v25, 16  ;;  %v5297_v48 = vld [vmem:[%s5236_s10 + $0x20] sm:$0x1]  ;;  %v5314_v3 = vld [vmem:[%s5236_s10 + $0x24] sm:$0xf] }
  0x19   : > { %4542 = vmatprep.subr.bf16.mxu0 %v5064_v7  ;;  %v5294_v43 = vcombine.low %v5259_v21, %v5262_v24  ;;  %v286_v45 = vrot.slane %v284_v33, 5  ;;  %v292_v46 = vrot.slane %v290_v34, 5  ;;  %v296_v47 = vrot.slane %v294_v35, 4  ;;  %v5329_v14 = vld [vmem:[%s5236_s10 + $0x2c] sm:$0x1]  ;;  %v5163_v37 = vld [vmem:[%s6224_s1 + $0x138] sm:$0xff]  }
  0x1a   : > { %v264_v44 = vrot.slane %v263_v32, 4  ;;  %v274_v49 = vrot.slane %v273_v38, 4  ;;  %v302_v50 = vrot.slane %v300_v40, 5  ;;  %v305_v51 = vshrl.u32 %v5287_v41, 16  ;;  %v5334_v22 = vld [vmem:[%s5236_s10 + $0x30] sm:$0xf] }
  0x1b   : > { %4351 = vmatpush3.bf16.msra.mxu1 %v5063_v6  ;;  %v308_v52 = vshll.u32 %v5287_v41, 16  ;;  %v287_v55 = vor.u32 %v286_v45, %v283_v39  ;;  %v297_v56 = vor.u32 %v296_v47, %v292_v46  ;;  %v314_v57 = vshll.u32 %v5290_v42, 16  ;;  %v5339_v30 = vld [vmem:[%s5236_s10 + $0x34] sm:$0xf]  ;;  %v5076_v34 = vld [vmem:[%s6224_s1 + $0x8] sm:$0xff]  }
  0x1c   : > { %4543 = vmatpush3.bf16.msra.mxu0 %v5064_v7  ;;  %4352 = vmatprep.subr.bf16.mxu1 %v5065_v8  ;;  %v269_v54 = vsel %vm5281_vm2, %v264_v44, %v268_v27  ;;  %v279_v58 = vsel %vm5281_vm2, %v274_v49, %v278_v29  ;;  %v307_v59 = vrot.slane %v305_v51, 4  ;;  %v318_v61 = vshrl.u32 %v5290_v42, 16  ;;  %v5348_v35 = vld [vmem:[%s5236_s10 + $0x38] sm:$0x1] }
  0x1d   : > { %4544 = vmatprep.subr.bf16.mxu0 %v5066_v9  ;;  %v310_v60 = vrot.slane %v308_v52, 5  ;;  %v3710_v62 = vcombine.low %v269_v54, %v279_v58  ;;  %v288_v63 = vrot.slane %v287_v55, 4  ;;  %v298_v0 = vrot.slane %v297_v56, 4  ;;  %v5363_v58 = vld [vmem:[%s5236_s10 + $0x3c] sm:$0xf] }
  0x1e   : > { %v316_v2 = vrot.slane %v314_v57, 5  ;;  %v320_v5 = vrot.slane %v318_v61, 4  ;;  %v324_v6 = vshll.u32 %v5297_v48, 16  ;;  %v1273_v7 = vrot.slane %v5297_v48, 5 }
  0x1f   : > { %4353 = vmatpush3.bf16.msra.mxu1 %v5065_v8  ;;  %v311_v4 = vor.u32 %v310_v60, %v307_v59  ;;  %v5074_v8 = vld [vmem:[%s6224_s1 + $0x140] sm:$0xff]   ;;  %4360 = vmatprep.mubr.bf16.mxu1 %v3710_v62  ;;  %v329_v15 = vshrl.u32 %v5314_v3, 16  ;;  %v332_v16 = vshll.u32 %v5314_v3, 16  ;;  %v348_v33 = vshll.u32 %v5329_v14, 16  ;;  %v5079_v59 = vld [vmem:[%s6224_s1 + $0x10] sm:$0xff]  }
  0x20   : > { %4545 = vmatpush3.bf16.msra.mxu0 %v5066_v9  ;;  %4354 = vmatprep.subr.bf16.mxu1 %v5067_v10  ;;  %v5322_v9 = vld [vmem:[%s5236_s10 + $0x28] sm:$0xf]  ;;  %v321_v19 = vor.u32 %v320_v5, %v316_v2  ;;  %v326_v20 = vrot.slane %v324_v6, 5  ;;  %v356_v44 = vshll.u32 %v5334_v22, 16  ;;  %v366_v56 = vshrl.u32 %v5339_v30, 16 }
  0x21   : > { %4546 = vmatprep.subr.bf16.mxu0 %v5068_v11  ;;  %v312_v18 = vrot.slane %v311_v4, 4  ;;  %v331_v23 = vrot.slane %v329_v15, 4  ;;  %v334_v27 = vrot.slane %v332_v16, 5  ;;  %v338_v28 = vshll.u32 %v5322_v9, 16  ;;  %v5077_v16 = vld [vmem:[%s6224_s1 + $0x150] sm:$0xff]  }
  0x22   : > { %v342_v29 = vshrl.u32 %v5322_v9, 16  ;;  %v322_v32 = vrot.slane %v321_v19, 4  ;;  %v350_v47 = vrot.slane %v348_v33, 5  ;;  %v358_v54 = vrot.slane %v356_v44, 5  ;;  %v5403_v33 = vld [vmem:[%s5236_s10 + $0x50] sm:$0x1] }
  0x23   : > { %4355 = vmatpush3.bf16.msra.mxu1 %v5067_v10  ;;  %v293_v10 = vsel %vm5281_vm2, %v288_v63, %v292_v46  ;;  %v335_v38 = vor.u32 %v334_v27, %v331_v23  ;;  %v340_v39 = vrot.slane %v338_v28, 5  ;;  %v5075_v46 = vld [vmem:[%s6224_s1 + $0x148] sm:$0xff]   ;;  %v372_v57 = vshll.u32 %v5348_v35, 16 }
  0x24   : > { %4547 = vmatpush3.bf16.msra.mxu0 %v5068_v11  ;;  %4356 = vmatprep.subr.bf16.mxu1 %v5069_v17  ;;  %v303_v11 = vsel %vm5281_vm2, %v298_v0, %v302_v50  ;;  %v344_v40 = vrot.slane %v342_v29, 4  ;;  %v327_v45 = vsel %vm5281_vm2, %v322_v32, %v326_v20  ;;  %v362_v50 = vshll.u32 %v5339_v30, 16  ;;  %v5377_v0 = vld [vmem:[%s5236_s10 + $0x40] sm:$0xf]  ;;  %v5394_v27 = vld [vmem:[%s5236_s10 + $0x48] sm:$0xf] }
  0x25   : > { %4548 = vmatprep.subr.bf16.mxu0 %v5070_v31  ;;  %v336_v52 = vrot.slane %v335_v38, 4  ;;  %v5370_v60 = vcombine.low %v5287_v41, %v5290_v42  ;;  %v368_v4 = vrot.slane %v366_v56, 4  ;;  %v374_v5 = vrot.slane %v372_v57, 5  ;;  %v5397_v28 = vld [vmem:[%s5236_s10 + $0x4c] sm:$0xf] }
  0x26   : > { %v364_v55 = vrot.slane %v362_v50, 5  ;;  %v380_v6 = vshll.u32 %v5363_v58, 16  ;;  %v410_v44 = vshll.u32 %v5397_v28, 16  ;;  %v414_v50 = vshrl.u32 %v5397_v28, 16 }
  0x27   : > { %4357 = vmatpush3.bf16.msra.mxu1 %v5069_v17  ;;  %v3711_v17 = vcombine.low %v293_v10, %v303_v11  ;;  %v341_v61 = vsel %vm5281_vm2, %v336_v52, %v340_v39  ;;  %v386_v10 = vshll.u32 %v5377_v0, 16 }
  0x28   : > { %4549 = vmatpush3.bf16.msra.mxu0 %v5070_v31  ;;  %4358 = vmatprep.subr.bf16.mxu1 %v5071_v36  ;;  %v317_v31 = vsel %vm5281_vm2, %v312_v18, %v316_v2  ;;  %v377_v2 = vshrl.u32 %v5363_v58, 16  ;;  %v369_v19 = vor.u32 %v368_v4, %v364_v55  ;;  %v382_v20 = vrot.slane %v380_v6, 5  ;;  %v5434_v6 = vld [vmem:[%s5236_s10 + $0x58] sm:$0xf] }
  0x29   : > { %4550 = vmatprep.subr.bf16.mxu0 %v5072_v53  ;;  %4552 = vmatprep.mubr.bf16.mxu0 %v3711_v17  ;;  %v5358_v51 = vcombine.low %v317_v31, %v327_v45  ;;  %v388_v23 = vrot.slane %v386_v10, 5  ;;  %v5078_v45 = vld [vmem:[%s6224_s1 + $0x158] sm:$0xff]  }
  0x2a   : > { %v370_v38 = vrot.slane %v369_v19, 4  ;;  %v5437_v10 = vld [vmem:[%s5236_s10 + $0x5c] sm:$0x1] }
  0x2b   : > { %4359 = vmatpush3.bf16.msra.mxu1 %v5071_v36  ;;  %v353_v36 = vshrl.u32 %v5334_v22, 16 }
  0x2c   : > { %4551 = vmatpush3.bf16.msra.mxu0 %v5072_v53  ;;  %4392 = vmatprep.subr.bf16.mxu1 %v5073_v1  ;;  %v345_v53 = vor.u32 %v344_v40, %v340_v39  ;;  %v404_v40 = vshll.u32 %v5394_v27, 16  ;;  %v375_v52 = vsel %vm5281_vm2, %v370_v38, %v374_v5  ;;  %v5431_v5 = vld [vmem:[%s5236_s10 + $0x54] sm:$0xf] }
  0x2d   : > { %4584 = vmatprep.subr.bf16.mxu0 %v5074_v8  ;;  %v355_v49 = vrot.slane %v353_v36, 4  ;;  %v5082_v36 = vld [vmem:[%s6224_s1 + $0x18] sm:$0xff]   ;;  %v425_v19 = vshrl.u32 %v5431_v5, 16 }
  0x2e   : > { %4361 = vmatmul.mubr.bf16.vlgmr.msra.gmra.mrb[0].mxu1 %v3711_v17  ;;  %v346_v62 = vrot.slane %v345_v53, 4  ;;  %v390_v17 = vshrl.u32 %v5377_v0, 16 }
  0x2f   : > { %4393 = vmatpush3.bf16.msra.mxu1 %v5073_v1  ;;  %4553 = vmatmul.mubr.bf16.vlgmr.msra.gmra.mrb[0].mxu0 %v5358_v51  ;;  %v359_v63 = vor.u32 %v358_v54, %v355_v49  ;;  %v5380_v1 = vld [vmem:[%s5236_s10 + $0x44] sm:$0x1]  ;;  %v406_v54 = vrot.slane %v404_v40, 5  ;;  %v438_v40 = vshrl.u32 %v5434_v6, 16 }
  0x30   : > { %4394 = vmatprep.subr.bf16.mxu1 %v5076_v34  ;;  %4364 = vmatprep.mubr.bf16.mxu1 %v5358_v51  ;;  %v351_v11 = vsel %vm5281_vm2, %v346_v62, %v350_v47  ;;  %v392_v31 = vrot.slane %v390_v17, 4  ;;  %v396_v32 = vshll.u32 %v5380_v1, 16  ;;  %v420_v62 = vshll.u32 %v5403_v33, 16 }
  0x31   : > { %4585 = vmatpush3.bf16.msra.mxu0 %v5074_v8  ;;  %v360_v15 = vrot.slane %v359_v63, 4  ;;  %v379_v8 = vrot.slane %v377_v2, 4  ;;  %v5391_v18 = vcombine.low %v341_v61, %v351_v11  ;;  %v416_v61 = vrot.slane %v414_v50, 4  ;;  %v5080_v63 = vld [vmem:[%s6224_s1 + $0x160] sm:$0xff]   ;;  %v5471_v50 = vld [vmem:[%s5236_s10 + $0x68] sm:$0x1] }
  0x32   : > { %4586 = vmatprep.subr.bf16.mxu0 %v5075_v46  ;;  %v393_v47 = vor.u32 %v392_v31, %v388_v23  ;;  %v398_v49 = vrot.slane %v396_v32, 5  ;;  %v5085_v2 = vld [vmem:[%s6224_s1 + $0x20] sm:$0xff]   ;;  %v5441_v11 = vcombine.low %v5314_v3, %v5322_v9  ;;  %v422_v17 = vrot.slane %v420_v62, 5 }
  0x33   : > { %4395 = vmatpush3.bf16.msra.mxu1 %v5076_v34  ;;  %6245 = vst [vmem:[#allocation2_spill] sm:$0xff] %v5391_v18  ;;  %v365_v29 = vsel %vm5281_vm2, %v360_v15, %v364_v55  ;;  %v401_v34 = vshrl.u32 %v5394_v27, 16  ;;  %4556 = vmatprep.mubr.bf16.mxu0 %v5391_v18  ;;  %v383_v39 = vor.u32 %v382_v20, %v379_v8  ;;  %v412_v55 = vrot.slane %v410_v44, 5  ;;  %v5457_v32 = vld [vmem:[%s5236_s10 + $0x60] sm:$0xf] }
  0x34   : > { %4396 = vmatprep.subr.bf16.mxu1 %v5079_v59  ;;  %v5419_v56 = vcombine.low %v365_v29, %v375_v52  ;;  %v394_v57 = vrot.slane %v393_v47, 4  ;;  %v5445_v15 = vcombine.low %v5334_v22, %v5339_v30  ;;  %v428_v29 = vshll.u32 %v5431_v5, 16  ;;  %v5465_v47 = vld [vmem:[%s5236_s10 + $0x64] sm:$0xf] }
  0x35   : > { %4587 = vmatpush3.bf16.msra.mxu0 %v5075_v46  ;;  %v403_v46 = vrot.slane %v401_v34, 4  ;;  %v384_v53 = vrot.slane %v383_v39, 4  ;;  %v417_v8 = vor.u32 %v416_v61, %v412_v55  ;;  %v434_v31 = vshll.u32 %v5434_v6, 16  ;;  %v5087_v34 = vld [vmem:[%s6224_s1 + $0x28] sm:$0xff]  }
  0x36   : > { %4365 = vmatmul.mubr.bf16.gmra.mrb[4].mxu1 %v5391_v18  ;;  %4588 = vmatprep.subr.bf16.mxu0 %v5077_v16  ;;  %6246 = vst [vmem:[#allocation3_spill] sm:$0xff] %v5419_v56  ;;  %v427_v39 = vrot.slane %v425_v19, 4  ;;  %v444_v44 = vshll.u32 %v5437_v10, 16  ;;  %v449_v52 = vshrl.u32 %v5457_v32, 16  ;;  %v468_v19 = vshll.u32 %v5471_v50, 16 }
  0x37   : > { %4397 = vmatpush3.bf16.msra.mxu1 %v5079_v59  ;;  %v389_v4 = vsel %vm5281_vm2, %v384_v53, %v388_v23  ;;  %v407_v59 = vor.u32 %v406_v54, %v403_v46  ;;  %4557 = vmatmul.mubr.bf16.gmra.mrb[4].mxu0 %v5419_v56  ;;  %v418_v38 = vrot.slane %v417_v8, 4  ;;  %v436_v46 = vrot.slane %v434_v31, 5 }
  0x38   : > { %4398 = vmatprep.subr.bf16.mxu1 %v5082_v36  ;;  %4368 = vmatprep.mubr.bf16.mxu1 %v5419_v56  ;;  %v440_v54 = vrot.slane %v438_v40, 4  ;;  %v5499_v40 = vld [vmem:[%s5236_s10 + $0x6c] sm:$0xf] }
  0x39   : > { %4589 = vmatpush3.bf16.msra.mxu0 %v5077_v16  ;;  %v399_v16 = vsel %vm5281_vm2, %v394_v57, %v398_v49  ;;  %v408_v23 = vrot.slane %v407_v59, 4  ;;  %v423_v53 = vsel %vm5281_vm2, %v418_v38, %v422_v17  ;;  %v446_v57 = vrot.slane %v444_v44, 5 }
  0x3a   : > { %4590 = vmatprep.subr.bf16.mxu0 %v5078_v45  ;;  %v5452_v20 = vcombine.low %v389_v4, %v399_v16  ;;  %v451_v4 = vrot.slane %v449_v52, 4  ;;  %v458_v59 = vshll.u32 %v5465_v47, 16  ;;  %v441_v16 = vor.u32 %v440_v54, %v436_v46 }
  0x3b   : > { %4399 = vmatpush3.bf16.msra.mxu1 %v5082_v36  ;;  %v413_v49 = vsel %vm5281_vm2, %v408_v23, %v412_v55  ;;  %v430_v36 = vrot.slane %v428_v29, 5  ;;  %v452_v55 = vshll.u32 %v5457_v32, 16  ;;  %v462_v17 = vshrl.u32 %v5465_v47, 16  ;;  %v5089_v29 = vld [vmem:[%s6224_s1 + $0x30] sm:$0xff]  }
  0x3c   : > { %6247 = vst [vmem:[#allocation4_spill] sm:$0xff] %v5452_v20  ;;  %4400 = vmatprep.subr.bf16.mxu1 %v5085_v2  ;;  %4560 = vmatprep.mubr.bf16.mxu0 %v5452_v20  ;;  %v5481_v61 = vcombine.low %v413_v49, %v423_v53  ;;  %v460_v31 = vrot.slane %v458_v59, 5  ;;  %v3759_v38 = vrot.slane %v5259_v21, 9  ;;  %v442_v44 = vrot.slane %v441_v16, 4  ;;  %v5506_v53 = vld [vmem:[%s5236_s10 + $0x70] sm:$0xf] }
  0x3d   : > { %4591 = vmatpush3.bf16.msra.mxu0 %v5078_v45  ;;  %v5081_v45 = vld [vmem:[%s6224_s1 + $0x168] sm:$0xff]   ;;  %v431_v62 = vor.u32 %v430_v36, %v427_v39  ;;  %v454_v8 = vrot.slane %v452_v55, 5  ;;  %v1263_v39 = vrot.slane %v5262_v24, 5  ;;  %v464_v36 = vrot.slane %v462_v17, 4 }
  0x3e   : > { %4369 = vmatmul.mubr.bf16.gmra.mrb[8].mxu1 %v5452_v20  ;;  %4592 = vmatprep.subr.bf16.mxu0 %v5080_v63  ;;  %6248 = vst [vmem:[#allocation5_spill] sm:$0xff] %v5481_v61  ;;  %v470_v52 = vrot.slane %v468_v19, 5  ;;  %v1266_v55 = vrot.slane %v5265_v25, 5  ;;  %v447_v59 = vsel %vm5281_vm2, %v442_v44, %v446_v57  ;;  %v482_v19 = vshll.u32 %v5506_v53, 16 }
  0x3f   : > { %4401 = vmatpush3.bf16.msra.mxu1 %v5085_v2  ;;  %4372 = vmatprep.mubr.bf16.mxu1 %v5481_v61  ;;  %v432_v2 = vrot.slane %v431_v62, 4  ;;  %v455_v49 = vor.u32 %v454_v8, %v451_v4  ;;  %v1264_v24 = vsel %vm5488_vm5, %v3759_v38, %v1263_v39  ;;  %v1265_v54 = vrot.slane %v1263_v39, 4  ;;  %v5514_v62 = vld [vmem:[%s5236_s10 + $0x74] sm:$0x1]  ;;  %v5091_v4 = vld [vmem:[%s6224_s1 + $0x38] sm:$0xff]  }
  0x40   : > { %4402 = vmatprep.subr.bf16.mxu1 %v5087_v34  ;;  %4561 = vmatmul.mubr.bf16.gmra.mrb[8].mxu0 %v5481_v61  ;;  %v465_v8 = vor.u32 %v464_v36, %v460_v31  ;;  %v484_v36 = vrot.slane %v482_v19, 5  ;;  %v1284_v20 = vrot.slane %v5339_v30, 5 }
  0x41   : > { %4593 = vmatpush3.bf16.msra.mxu0 %v5080_v63  ;;  %v5083_v63 = vld [vmem:[%s6224_s1 + $0x170] sm:$0xff]   ;;  %v437_v21 = vsel %vm5281_vm2, %v432_v2, %v436_v46  ;;  %v456_v16 = vrot.slane %v455_v49, 4  ;;  %v473_v46 = vshrl.u32 %v5499_v40, 16  ;;  %v1267_v25 = vsel %vm5488_vm5, %v1265_v54, %v1266_v55  ;;  %v5529_v2 = vld [vmem:[%s5236_s10 + $0x78] sm:$0xf] }
  0x42   : > { %4594 = vmatprep.subr.bf16.mxu0 %v5081_v45  ;;  %v5522_v17 = vcombine.low %v437_v21, %v447_v59  ;;  %v466_v38 = vrot.slane %v465_v8, 4  ;;  %v5536_v39 = vcombine.low %v1264_v24, %v1267_v25  ;;  %v486_v21 = vshrl.u32 %v5506_v53, 16  ;;  %v5543_v54 = vld [vmem:[%s5236_s10 + $0x7c] sm:$0xf] }
  0x43   : > { %4403 = vmatpush3.bf16.msra.mxu1 %v5087_v34  ;;  %v476_v34 = vshll.u32 %v5499_v40, 16  ;;  %v461_v57 = vsel %vm5281_vm2, %v456_v16, %v460_v31  ;;  %v475_v44 = vrot.slane %v473_v46, 4  ;;  %v492_v31 = vshll.u32 %v5514_v62, 16  ;;  %v5550_v16 = vld [vmem:[%s5236_s10 + $0x80] sm:$0x1] }
  0x44   : > { %4404 = vmatprep.subr.bf16.mxu1 %v5089_v29  ;;  %6251 = vst [vmem:[#allocation6_spill] sm:$0xff] %v5522_v17  ;;  %4564 = vmatprep.mubr.bf16.mxu0 %v5522_v17  ;;  %v471_v55 = vsel %vm5281_vm2, %v466_v38, %v470_v52  ;;  %v3760_v59 = vrot.slane %v5287_v41, 9  ;;  %v1270_v24 = vrot.slane %v5290_v42, 5  ;;  %v497_v8 = vshrl.u32 %v5529_v2, 16  ;;  %v5558_v52 = vld [vmem:[%s6224_s1 + $0x80] sm:$0xff]  }
  0x45   : > { %4595 = vmatpush3.bf16.msra.mxu0 %v5081_v45  ;;  %v5084_v45 = vld [vmem:[%s6224_s1 + $0x178] sm:$0xff]   ;;  %v478_v49 = vrot.slane %v476_v34, 5  ;;  %v5553_v46 = vcombine.low %v461_v57, %v471_v55  ;;  %v488_v34 = vrot.slane %v486_v21, 4  ;;  %v494_v19 = vrot.slane %v492_v31, 5  ;;  %v5567_v38 = vld [vmem:[%s5236_s10 + $0x84] sm:$0xf] }
  0x46   : > { %4596 = vmatprep.subr.bf16.mxu0 %v5083_v63  ;;  %4373 = vmatmul.mubr.bf16.gmra.mrb[12].mxu1 %v5522_v17  ;;  %v1271_v41 = vsel %vm5488_vm5, %v3760_v59, %v1270_v24  ;;  %v1272_v42 = vrot.slane %v1270_v24, 4  ;;  %v499_v57 = vrot.slane %v497_v8, 4  ;;  %v506_v21 = vshll.u32 %v5543_v54, 16 }
  0x47   : > { %4405 = vmatpush3.bf16.msra.mxu1 %v5089_v29  ;;  %6252 = vst [vmem:[#allocation7_spill] sm:$0xff] %v5553_v46  ;;  %v479_v25 = vor.u32 %v478_v49, %v475_v44  ;;  %v5086_v29 = vld [vmem:[%s6224_s1 + $0x180] sm:$0xff]   ;;  %4376 = vmatprep.mubr.bf16.mxu1 %v5553_v46  ;;  %v489_v49 = vor.u32 %v488_v34, %v484_v36  ;;  %v510_v31 = vshrl.u32 %v5543_v54, 16  ;;  %v516_v24 = vshll.u32 %v5550_v16, 16 }
  0x48   : > { %4406 = vmatprep.subr.bf16.mxu1 %v5091_v4  ;;  %4565 = vmatmul.mubr.bf16.gmra.mrb[12].mxu0 %v5553_v46  ;;  %v1274_v55 = vsel %vm5488_vm5, %v1272_v42, %v1273_v7  ;;  %v3761_v8 = vrot.slane %v5314_v3, 9  ;;  %v508_v46 = vrot.slane %v506_v21, 5  ;;  %v5587_v3 = vld [vmem:[%s5236_s10 + $0x88] sm:$0xf] }
  0x49   : > { %4597 = vmatpush3.bf16.msra.mxu0 %v5083_v63  ;;  %v500_v63 = vshll.u32 %v5529_v2, 16  ;;  %v480_v44 = vrot.slane %v479_v25, 4  ;;  %4600 = vmatprep.mubr.bf16.mxu0 %v5536_v39  ;;  %v490_v34 = vrot.slane %v489_v49, 4  ;;  %v5582_v26 = vcombine.low %v1271_v41, %v1274_v55 }
  0x4a   : > { %4598 = vmatprep.subr.bf16.mxu0 %v5084_v45  ;;  %v512_v7 = vrot.slane %v510_v31, 4  ;;  %v518_v42 = vrot.slane %v516_v24, 5  ;;  %v521_v41 = vshrl.u32 %v5567_v38, 16  ;;  %v5088_v31 = vld [vmem:[%s6224_s1 + $0x188] sm:$0xff]   ;;  %v5606_v24 = vld [vmem:[%s5236_s10 + $0x90] sm:$0xf] }
  0x4b   : > { %v502_v59 = vrot.slane %v500_v63, 5  ;;  %4407 = vmatpush3.bf16.msra.mxu1 %v5091_v4  ;;  %v485_v25 = vsel %vm5281_vm2, %v480_v44, %v484_v36  ;;  %v1277_v63 = vrot.slane %v5322_v9, 5  ;;  %v495_v4 = vsel %vm5281_vm2, %v490_v34, %v494_v19  ;;  %v5593_v36 = vld [vmem:[%s5236_s10 + $0x8c] sm:$0x1]  ;;  %v5609_v34 = vld [vmem:[%s5236_s10 + $0x94] sm:$0xf] }
  0x4c   : > { %4440 = vmatprep.subr.bf16.mxu1 %v5558_v52  ;;  %v524_v44 = vshll.u32 %v5567_v38, 16  ;;  %v513_v21 = vor.u32 %v512_v7, %v508_v46  ;;  %v523_v55 = vrot.slane %v521_v41, 4  ;;  %v540_v7 = vshll.u32 %v5593_v36, 16 }
  0x4d   : > { %4599 = vmatpush3.bf16.msra.mxu0 %v5084_v45  ;;  %v503_v48 = vor.u32 %v502_v59, %v499_v57  ;;  %v1280_v45 = vrot.slane %v5329_v14, 5  ;;  %v5597_v57 = vcombine.low %v485_v25, %v495_v4  ;;  %v1278_v9 = vsel %vm5488_vm5, %v3761_v8, %v1277_v63 }
  0x4e   : > { %4632 = vmatprep.subr.bf16.mxu0 %v5086_v29  ;;  %v1279_v19 = vrot.slane %v1277_v63, 4  ;;  %v526_v14 = vrot.slane %v524_v44, 5  ;;  %v530_v59 = vshll.u32 %v5587_v3, 16  ;;  %v534_v8 = vshrl.u32 %v5587_v3, 16 }
  0x4f   : > { %6253 = vst [vmem:[#allocation8_spill] sm:$0xff] %v5597_v57  ;;  %v504_v49 = vrot.slane %v503_v48, 4  ;;  %4377 = vmatmul.mubr.bf16.gmra.mrb[16].mxu1 %v5597_v57  ;;  %v514_v48 = vrot.slane %v513_v21, 4  ;;  %v3762_v44 = vrot.slane %v5334_v22, 9  ;;  %v542_v21 = vrot.slane %v540_v7, 5  ;;  %v5090_v22 = vld [vmem:[%s6224_s1 + $0x190] sm:$0xff]  }
  0x50   : > { %4601 = vmatmul.mubr.bf16.vlgmr.msra.gmra.mrb[0].mxu0 %v5582_v26  ;;  %v1281_v63 = vsel %vm5488_vm5, %v1279_v19, %v1280_v45  ;;  %v527_v4 = vor.u32 %v526_v14, %v523_v55  ;;  %v532_v41 = vrot.slane %v530_v59, 5  ;;  %v1287_v45 = vrot.slane %v5348_v35, 5  ;;  %v5645_v59 = vld [vmem:[%s5236_s10 + $0x9c] sm:$0xf] }
  0x51   : > { %v509_v25 = vsel %vm5281_vm2, %v504_v49, %v508_v46  ;;  %4633 = vmatpush3.bf16.msra.mxu0 %v5086_v29  ;;  %v519_v57 = vsel %vm5281_vm2, %v514_v48, %v518_v42  ;;  %v5622_v46 = vcombine.low %v1278_v9, %v1281_v63  ;;  %v536_v49 = vrot.slane %v534_v8, 4  ;;  %v5633_v42 = vld [vmem:[%s5236_s10 + $0x98] sm:$0x1]  ;;  %v5648_v63 = vld [vmem:[%s5236_s10 + $0xa0] sm:$0xf] }
  0x52   : > { %v5624_v17 = vcombine.low %v509_v25, %v519_v57  ;;  %v528_v61 = vrot.slane %v527_v4, 4  ;;  %4634 = vmatprep.subr.bf16.mxu0 %v5088_v31  ;;  %v545_v57 = vshrl.u32 %v5606_v24, 16  ;;  %v548_v9 = vshll.u32 %v5606_v24, 16 }
  0x53   : > { %4604 = vmatprep.mubr.bf16.mxu0 %v5622_v46  ;;  %v537_v29 = vor.u32 %v536_v49, %v532_v41  ;;  %v554_v19 = vshll.u32 %v5609_v34, 16  ;;  %v1285_v35 = vsel %vm5488_vm5, %v3762_v44, %v1284_v20  ;;  %v1286_v55 = vrot.slane %v1284_v20, 4  ;;  %v5655_v20 = vld [vmem:[%s5236_s10 + $0xa4] sm:$0x1] }
  0x54   : > { %6254 = vst [vmem:[#allocation9_spill] sm:$0xff] %v5624_v17  ;;  %4380 = vmatprep.mubr.bf16.mxu1 %v5624_v17  ;;  %v533_v30 = vsel %vm5281_vm2, %v528_v61, %v532_v41  ;;  %v558_v14 = vshrl.u32 %v5609_v34, 16  ;;  %v547_v48 = vrot.slane %v545_v57, 4  ;;  %v550_v8 = vrot.slane %v548_v9, 5 }
  0x55   : > { %v538_v25 = vrot.slane %v537_v29, 4  ;;  %4635 = vmatpush3.bf16.msra.mxu0 %v5088_v31  ;;  %v556_v7 = vrot.slane %v554_v19, 5  ;;  %v1288_v4 = vsel %vm5488_vm5, %v1286_v55, %v1287_v45  ;;  %v564_v61 = vshll.u32 %v5633_v42, 16  ;;  %v5092_v45 = vld [vmem:[%s6224_s1 + $0x198] sm:$0xff]  }
  0x56   : > { %v560_v49 = vrot.slane %v558_v14, 4  ;;  %v3763_v41 = vrot.slane %v5363_v58, 9  ;;  %4636 = vmatprep.subr.bf16.mxu0 %v5090_v22  ;;  %v5659_v44 = vcombine.low %v1285_v35, %v1288_v4  ;;  %v551_v29 = vor.u32 %v550_v8, %v547_v48 }
  0x57   : > { %v543_v31 = vsel %vm5281_vm2, %v538_v25, %v542_v21  ;;  %v1291_v57 = vrot.slane %v5377_v0, 5  ;;  %v566_v58 = vrot.slane %v564_v61, 5  ;;  %v1294_v55 = vrot.slane %v5380_v1, 5  ;;  %v5673_v25 = vld [vmem:[%s5236_s10 + $0xa8] sm:$0xf] }
  0x58   : > { %v5665_v9 = vcombine.low %v533_v30, %v543_v31  ;;  %v561_v19 = vor.u32 %v560_v49, %v556_v7  ;;  %4605 = vmatmul.mubr.bf16.gmra.mrb[4].mxu0 %v5659_v44  ;;  %v552_v14 = vrot.slane %v551_v29, 4  ;;  %v569_v0 = vshrl.u32 %v5645_v59, 16  ;;  %v5096_v30 = vld [vmem:[%s6224_s1 + $0x1a0] sm:$0xff]   ;;  %v5683_v49 = vld [vmem:[%s5236_s10 + $0xac] sm:$0xf] }
  0x59   : > { %v1292_v21 = vsel %vm5488_vm5, %v3763_v41, %v1291_v57  ;;  %v1293_v35 = vrot.slane %v1291_v57, 4  ;;  %v572_v1 = vshll.u32 %v5645_v59, 16  ;;  %v578_v8 = vshll.u32 %v5648_v63, 16  ;;  %4637 = vmatpush3.bf16.msra.mxu0 %v5090_v22 }
  0x5a   : > { %6255 = vst [vmem:[#allocation10_spill] sm:$0xff] %v5665_v9  ;;  %4381 = vmatmul.mubr.bf16.gmra.mrb[20].mxu1 %v5665_v9  ;;  %v562_v48 = vrot.slane %v561_v19, 4  ;;  %v582_v4 = vshrl.u32 %v5648_v63, 16  ;;  %v557_v61 = vsel %vm5281_vm2, %v552_v14, %v556_v7  ;;  %v571_v31 = vrot.slane %v569_v0, 4  ;;  %4638 = vmatprep.subr.bf16.mxu0 %v5092_v45  ;;  %v5698_v14 = vld [vmem:[%s5236_s10 + $0xb0] sm:$0x1] }
  0x5b   : > { %v1295_v41 = vsel %vm5488_vm5, %v1293_v35, %v1294_v55  ;;  %v588_v29 = vshll.u32 %v5655_v20, 16  ;;  %v574_v9 = vrot.slane %v572_v1, 5  ;;  %v580_v17 = vrot.slane %v578_v8, 5 }
  0x5c   : > { %v567_v57 = vsel %vm5281_vm2, %v562_v48, %v566_v58  ;;  %v5692_v19 = vcombine.low %v1292_v21, %v1295_v41  ;;  %v584_v56 = vrot.slane %v582_v4, 4  ;;  %v3764_v7 = vrot.slane %v5394_v27, 9 }
  0x5d   : > { %v5694_v22 = vcombine.low %v557_v61, %v567_v57  ;;  %v590_v18 = vrot.slane %v588_v29, 5  ;;  %v575_v55 = vor.u32 %v574_v9, %v571_v31  ;;  %v1298_v35 = vrot.slane %v5397_v28, 5  ;;  %4639 = vmatpush3.bf16.msra.mxu0 %v5092_v45  ;;  %v5100_v28 = vld [vmem:[%s6224_s1 + $0x1a8] sm:$0xff]  }
  0x5e   : > { %4608 = vmatprep.mubr.bf16.mxu0 %v5692_v19  ;;  %v1301_v0 = vrot.slane %v5403_v33, 5  ;;  %v593_v58 = vshrl.u32 %v5673_v25, 16  ;;  %v585_v21 = vor.u32 %v584_v56, %v580_v17  ;;  %v596_v48 = vshll.u32 %v5673_v25, 16  ;;  %4640 = vmatprep.subr.bf16.mxu0 %v5096_v30 }
  0x5f   : > { %6256 = vst [vmem:[#allocation11_spill] sm:$0xff] %v5694_v22  ;;  %4384 = vmatprep.mubr.bf16.mxu1 %v5694_v22  ;;  %v602_v1 = vshll.u32 %v5683_v49, 16  ;;  %v606_v27 = vshrl.u32 %v5683_v49, 16  ;;  %v576_v9 = vrot.slane %v575_v55, 4  ;;  %v1299_v33 = vsel %vm5488_vm5, %v3764_v7, %v1298_v35  ;;  %v5720_v22 = vld [vmem:[%s5236_s10 + $0xb4] sm:$0xf] }
  0x60   : > { %v1300_v45 = vrot.slane %v1298_v35, 4  ;;  %v595_v8 = vrot.slane %v593_v58, 4  ;;  %v586_v56 = vrot.slane %v585_v21, 4  ;;  %v598_v4 = vrot.slane %v596_v48, 5  ;;  %v5727_v48 = vld [vmem:[%s5236_s10 + $0xb8] sm:$0xf] }
  0x61   : > { %v604_v61 = vrot.slane %v602_v1, 5  ;;  %v608_v41 = vrot.slane %v606_v27, 4  ;;  %v581_v31 = vsel %vm5281_vm2, %v576_v9, %v580_v17  ;;  %v612_v57 = vshll.u32 %v5698_v14, 16  ;;  %4641 = vmatpush3.bf16.msra.mxu0 %v5096_v30  ;;  %v5104_v17 = vld [vmem:[%s6224_s1 + $0x1b0] sm:$0xff]   ;;  %v5737_v27 = vld [vmem:[%s5236_s10 + $0xbc] sm:$0x1] }
  0x62   : > { %v1302_v29 = vsel %vm5488_vm5, %v1300_v45, %v1301_v0  ;;  %v3765_v55 = vrot.slane %v5431_v5, 9  ;;  %v591_v7 = vsel %vm5281_vm2, %v586_v56, %v590_v18  ;;  %v599_v58 = vor.u32 %v598_v4, %v595_v8  ;;  %4642 = vmatprep.subr.bf16.mxu0 %v5100_v28  ;;  %v5108_v4 = vld [vmem:[%s6224_s1 + $0x1b8] sm:$0xff]  }
  0x63   : > { %v5724_v35 = vcombine.low %v1299_v33, %v1302_v29  ;;  %v609_v21 = vor.u32 %v608_v41, %v604_v61  ;;  %v5732_v0 = vcombine.low %v581_v31, %v591_v7  ;;  %v614_v5 = vrot.slane %v612_v57, 5 }
  0x64   : > { %v1305_v1 = vrot.slane %v5434_v6, 5  ;;  %v1308_v30 = vrot.slane %v5437_v10, 5  ;;  %v600_v18 = vrot.slane %v599_v58, 4  ;;  %v617_v33 = vshrl.u32 %v5720_v22, 16 }
  0x65   : > { %6257 = vst [vmem:[#allocation12_spill] sm:$0xff] %v5732_v0  ;;  %4609 = vmatmul.mubr.bf16.gmra.mrb[8].mxu0 %v5724_v35  ;;  %v610_v9 = vrot.slane %v609_v21, 4  ;;  %v620_v45 = vshll.u32 %v5720_v22, 16  ;;  %4385 = vmatmul.mubr.bf16.gmra.mrb[24].mxu1 %v5732_v0  ;;  %v626_v6 = vshll.u32 %v5727_v48, 16  ;;  %v630_v10 = vshrl.u32 %v5727_v48, 16 }
  0x66   : > { %v1306_v8 = vsel %vm5488_vm5, %v3765_v55, %v1305_v1  ;;  %v1307_v56 = vrot.slane %v1305_v1, 4  ;;  %4643 = vmatpush3.bf16.msra.mxu0 %v5100_v28  ;;  %v605_v41 = vsel %vm5281_vm2, %v600_v18, %v604_v61  ;;  %v619_v29 = vrot.slane %v617_v33, 4 }
  0x67   : > { %v615_v31 = vsel %vm5281_vm2, %v610_v9, %v614_v5  ;;  %v622_v57 = vrot.slane %v620_v45, 5  ;;  %4644 = vmatprep.subr.bf16.mxu0 %v5104_v17  ;;  %v628_v58 = vrot.slane %v626_v6, 5  ;;  %v632_v28 = vrot.slane %v630_v10, 4 }
  0x68   : > { %v5754_v55 = vcombine.low %v605_v41, %v615_v31  ;;  %v1309_v7 = vsel %vm5488_vm5, %v1307_v56, %v1308_v30  ;;  %v636_v0 = vshll.u32 %v5737_v27, 16  ;;  %v3766_v61 = vrot.slane %v5457_v32, 9  ;;  %v5769_v30 = vld [vmem:[%s6224_s1 + $0x1c0] sm:$0xff]  }
  0x69   : > { %v5758_v21 = vcombine.low %v1306_v8, %v1309_v7  ;;  %v623_v1 = vor.u32 %v622_v57, %v619_v29  ;;  %v633_v5 = vor.u32 %v632_v28, %v628_v58  ;;  %v1312_v18 = vrot.slane %v5465_v47, 5 }
  0x6a   : > { %4388 = vmatprep.mubr.bf16.mxu1 %v5754_v55  ;;  %v1315_v9 = vrot.slane %v5471_v50, 5  ;;  %v3767_v33 = vrot.slane %v5499_v40, 9  ;;  %4645 = vmatpush3.bf16.msra.mxu0 %v5104_v17  ;;  %v638_v8 = vrot.slane %v636_v0, 5  ;;  %v1319_v56 = vrot.slane %v5506_v53, 5 }
  0x6b   : > { %4612 = vmatprep.mubr.bf16.mxu0 %v5758_v21  ;;  %v624_v45 = vrot.slane %v623_v1, 4  ;;  %v1322_v6 = vrot.slane %v5514_v62, 5  ;;  %4646 = vmatprep.subr.bf16.mxu0 %v5108_v4  ;;  %v634_v10 = vrot.slane %v633_v5, 4  ;;  %v1313_v50 = vsel %vm5488_vm5, %v3766_v61, %v1312_v18 }
  0x6c   : > { %v1314_v41 = vrot.slane %v1312_v18, 4  ;;  %v3768_v17 = vrot.slane %v5529_v2, 9  ;;  %v1320_v29 = vsel %vm5488_vm5, %v3767_v33, %v1319_v56  ;;  %v1321_v57 = vrot.slane %v1319_v56, 4 }
  0x6d   : > { %v629_v31 = vsel %vm5281_vm2, %v624_v45, %v628_v58  ;;  %v1326_v0 = vrot.slane %v5543_v54, 5  ;;  %v639_v62 = vsel %vm5281_vm2, %v634_v10, %v638_v8  ;;  %v1329_v28 = vrot.slane %v5550_v16, 5 }
  0x6e   : > { %v1316_v7 = vsel %vm5488_vm5, %v1314_v41, %v1315_v9  ;;  %v3769_v1 = vrot.slane %v5567_v38, 9  ;;  %4647 = vmatpush3.bf16.msra.mxu0 %v5108_v4  ;;  %v5788_v61 = vcombine.low %v629_v31, %v639_v62  ;;  %v1323_v5 = vsel %vm5488_vm5, %v1321_v57, %v1322_v6  ;;  %v5099_v57 = vld [vmem:[%s6224_s1 + $0x88] sm:$0xff]  }
  0x6f   : > { %v5790_v58 = vcombine.low %v1313_v50, %v1316_v7  ;;  %4680 = vmatprep.subr.bf16.mxu0 %v5769_v30  ;;  %v5795_v18 = vcombine.low %v1320_v29, %v1323_v5  ;;  %v1328_v33 = vrot.slane %v1326_v0, 4  ;;  %v1333_v45 = vrot.slane %v5587_v3, 5 }
  0x70   : > { %v1336_v9 = vrot.slane %v5593_v36, 5  ;;  %4389 = vmatmul.mubr.bf16.gmra.mrb[28].mxu1 %v5788_v61  ;;  %v6258_v16 = vcombine.low %v5245_v12, %v5248_v13  ;;  %v1327_v4 = vsel %vm5488_vm5, %v3768_v17, %v1326_v0  ;;  %v1340_v6 = vrot.slane %v5609_v34, 5 }
  0x71   : > { %4613 = vmatmul.mubr.bf16.gmra.mrb[12].mxu0 %v5790_v58  ;;  %v1330_v8 = vsel %vm5488_vm5, %v1328_v33, %v1329_v28  ;;  %v1335_v56 = vrot.slane %v1333_v45, 4  ;;  %v1347_v36 = vrot.slane %v5648_v63, 5  ;;  %v1334_v10 = vsel %vm5488_vm5, %v3769_v1, %v1333_v45 }
  0x72   : > { %4408 = vmatprep.mubr.bf16.mxu1 %v6258_v16  ;;  %4616 = vmatprep.mubr.bf16.mxu0 %v5795_v18  ;;  %v5815_v13 = vcombine.low %v1327_v4, %v1330_v8  ;;  %v3770_v50 = vrot.slane %v5606_v24, 9  ;;  %v1343_v41 = vrot.slane %v5633_v42, 5  ;;  %v1342_v17 = vrot.slane %v1340_v6, 4 }
  0x73   : > { %v1337_v12 = vsel %vm5488_vm5, %v1335_v56, %v1336_v9  ;;  %v3771_v31 = vrot.slane %v5645_v59, 9  ;;  %v1349_v0 = vrot.slane %v1347_v36, 4  ;;  %v1350_v62 = vrot.slane %v5655_v20, 5 }
  0x74   : > { %v5820_v29 = vcombine.low %v1334_v10, %v1337_v12  ;;  %v1341_v7 = vsel %vm5488_vm5, %v3770_v50, %v1340_v6  ;;  %v1354_v42 = vrot.slane %v5683_v49, 5  ;;  %v5833_v28 = vcombine.low %v5457_v32, %v5465_v47  ;;  %v5103_v47 = vld [vmem:[%s6224_s1 + $0x90] sm:$0xff]   ;;  %v233_v6 = vld [vmem:[%s5236_s10 + $0xc8] sm:$0x1]  ;;  %v5148_v10 = vld [vmem:[%s5236_s10 + $0x40] sm:$0xf] }
  0x75   : > { %v1344_v20 = vsel %vm5488_vm5, %v1342_v17, %v1343_v41  ;;  %v1348_v1 = vsel %vm5488_vm5, %v3771_v31, %v1347_v36  ;;  %v3772_v5 = vrot.slane %v5673_v25, 9  ;;  %v5844_v33 = vcombine.low %v5499_v40, %v5506_v53  ;;  %v5147_v36 = vld [vmem:[%s5236_s10 + $0x3c] sm:$0xf]  ;;  %v5149_v41 = vld [vmem:[%s5236_s10 + $0x48] sm:$0xf] }
  0x76   : > { %v1351_v32 = vsel %vm5488_vm5, %v1349_v0, %v1350_v62  ;;  %v5855_v45 = vcombine.low %v5529_v2, %v5543_v54  ;;  %v5859_v40 = vcombine.low %v5567_v38, %v5587_v3  ;;  %v5863_v53 = vcombine.low %v5606_v24, %v5609_v34  ;;  %v5883_v24 = vld [vmem:[%s5236_s10 + $0xc4] sm:$0xf]  ;;  %v5150_v17 = vld [vmem:[%s5236_s10 + $0x4c] sm:$0xf] }
  0x77   : > { %v5867_v9 = vcombine.low %v5645_v59, %v5648_v63  ;;  %v5871_v16 = vcombine.low %v5673_v25, %v5683_v49  ;;  %v5873_v4 = vcombine.low %v1341_v7, %v1344_v20  ;;  %v1356_v2 = vrot.slane %v1354_v42, 4  ;;  %v5107_v25 = vld [vmem:[%s6224_s1 + $0x98] sm:$0xff]  }
  0x78   : > { %4409 = vmatmul.mubr.bf16.vlgmr.msra.gmra.mrb[0].mxu1 %v5294_v43  ;;  %v1357_v54 = vrot.slane %v5698_v14, 5  ;;  %v5878_v38 = vcombine.low %v5720_v22, %v5727_v48  ;;  %v5880_v3 = vcombine.low %v1348_v1, %v1351_v32  ;;  %v3773_v34 = vrot.slane %v5720_v22, 9  ;;  %v5897_v14 = vld [vmem:[%s5236_s10 + $0xc0] sm:$0xf] }
  0x79   : > { %4617 = vmatmul.mubr.bf16.gmra.mrb[16].mxu0 %v5815_v13  ;;  %4441 = vmatpush3.bf16.msra.mxu1 %v5558_v52  ;;  %v1361_v52 = vrot.slane %v5727_v48, 5  ;;  %v1364_v63 = vrot.slane %v5737_v27, 5  ;;  %v1355_v49 = vsel %vm5488_vm5, %v3772_v5, %v1354_v42  ;;  %v2241_v48 = vrot.slane %v5883_v24, 5  ;;  %v5111_v27 = vld [vmem:[%s6224_s1 + $0xa0] sm:$0xff]  }
  0x7a   : > { %4412 = vmatprep.mubr.bf16.mxu1 %v5370_v60  ;;  %4620 = vmatprep.mubr.bf16.mxu0 %v5820_v29  ;;  %v1358_v22 = vsel %vm5488_vm5, %v1356_v2, %v1357_v54  ;;  %v5912_v12 = vcombine.low %v5147_v36, %v5148_v10  ;;  %v5918_v31 = vcombine.low %v5149_v41, %v5150_v17  ;;  %v1956_v0 = vshll.u32 %v5897_v14, 16  ;;  %v5115_v54 = vld [vmem:[%s6224_s1 + $0xa8] sm:$0xff]   ;;  %v5119_v36 = vld [vmem:[%s6224_s1 + $0xb0] sm:$0xff]   ;;  %v5152_v10 = vld [vmem:[%s5236_s10 + $0x58] sm:$0xf] }
  0x7b   : > { %4442 = vmatprep.subr.bf16.mxu1 %v5099_v57  ;;  %v1363_v59 = vrot.slane %v1361_v52, 4  ;;  %v1362_v8 = vsel %vm5488_vm5, %v3773_v34, %v1361_v52  ;;  %v5914_v50 = vcombine.low %v1355_v49, %v1358_v22  ;;  %v1962_v62 = vshll.u32 %v5883_v24, 16 }
  0x7c   : > { %v1966_v7 = vshrl.u32 %v5883_v24, 16  ;;  %v3864_v20 = vrot.slane %v5897_v14, 9  ;;  %v2243_v1 = vrot.slane %v2241_v48, 4  ;;  %v2244_v5 = vrot.slane %v233_v6, 5 }
  0x7d   : > { %4443 = vmatpush3.bf16.msra.mxu1 %v5099_v57  ;;  %v1365_v56 = vsel %vm5488_vm5, %v1363_v59, %v1364_v63  ;;  %v1953_v57 = vshrl.u32 %v5897_v14, 16  ;;  %v1964_v52 = vrot.slane %v1962_v62, 5  ;;  %v1972_v63 = vshll.u32 %v233_v6, 16  ;;  %v5151_v6 = vld [vmem:[%s5236_s10 + $0x54] sm:$0xf]  ;;  %v5125_v62 = vld [vmem:[%s6224_s1 + $0xc0] sm:$0xff]  }
  0x7e   : > { %4444 = vmatprep.subr.bf16.mxu1 %v5103_v47  ;;  %v5924_v42 = vcombine.low %v1362_v8, %v1365_v56  ;;  %v1968_v2 = vrot.slane %v1966_v7, 4  ;;  %v2245_v49 = vsel %vm5488_vm5, %v2243_v1, %v2244_v5  ;;  %v5943_v41 = vcombine.low %v5151_v6, %v5152_v10  ;;  %v5116_v7 = vld [vmem:[%s6224_s1 + $0x1c8] sm:$0xff]   ;;  %v5124_v1 = vld [vmem:[%s6224_s1 + $0x1d8] sm:$0xff]   ;;  %v5129_v6 = vld [vmem:[%s6224_s1 + $0xd0] sm:$0xff]  }
  0x7f   : > { %v1955_v32 = vrot.slane %v1953_v57, 4  ;;  %v1974_v56 = vrot.slane %v1972_v63, 5  ;;  %v5132_v10 = vld [vmem:[%s6224_s1 + $0xd8] sm:$0xff]  }
  0x80   : > { %4413 = vmatmul.mubr.bf16.gmra.mrb[4].mxu1 %v5441_v11  ;;  %v1969_v59 = vor.u32 %v1968_v2, %v1964_v52  ;;  %v5155_v2 = vld [vmem:[%s5236_s10] sm:$0xf] }
  0x81   : > { %4621 = vmatmul.mubr.bf16.gmra.mrb[20].mxu0 %v5873_v4  ;;  %4416 = vmatprep.mubr.bf16.mxu1 %v5445_v15 }
  0x82   : > { %4624 = vmatprep.mubr.bf16.mxu0 %v5880_v3  ;;  %4445 = vmatpush3.bf16.msra.mxu1 %v5103_v47  ;;  %v1958_v47 = vrot.slane %v1956_v0, 5  ;;  %v1970_v8 = vrot.slane %v1969_v59, 4  ;;  %v5123_v0 = vld [vmem:[%s6224_s1 + $0xb8] sm:$0xff]   ;;  %v5128_v59 = vld [vmem:[%s6224_s1 + $0x1e8] sm:$0xff]  }
  0x83   : > { %4446 = vmatprep.subr.bf16.mxu1 %v5107_v25 }
  0x84   : > { %v1959_v34 = vor.u32 %v1958_v47, %v1955_v32  ;;  %v5126_v32 = vld [vmem:[%s6224_s1 + $0x1e0] sm:$0xff]   ;;  %v5154_v47 = vld [vmem:[%s5236_s10 + $0x8] sm:$0x1] }
  0x86   : > { %4447 = vmatpush3.bf16.msra.mxu1 %v5107_v25  ;;  %v2242_v25 = vsel %vm5488_vm5, %v3864_v20, %v2241_v48  ;;  %v1960_v22 = vrot.slane %v1959_v34, 4  ;;  %v5120_v20 = vld [vmem:[%s6224_s1 + $0x1d0] sm:$0xff]  }
  0x87   : > { %4448 = vmatprep.subr.bf16.mxu1 %v5111_v27  ;;  %v5945_v17 = vcombine.low %v2242_v25, %v2245_v49  ;;  %v5130_v49 = vld [vmem:[%s6224_s1 + $0x1f0] sm:$0xff]  }
  0x88   : > { %4417 = vmatmul.mubr.bf16.gmra.mrb[8].mxu1 %v5912_v12  ;;  %v1965_v48 = vsel %vm5281_vm2, %v1960_v22, %v1964_v52  ;;  %v1259_v52 = vrot.slane %v5154_v47, 5  ;;  %v6261_v47 = vld [vmem:[#allocation4_spill] sm:$0xff] }
  0x89   : > { %4625 = vmatmul.mubr.bf16.gmra.mrb[24].mxu0 %v5914_v50  ;;  %4420 = vmatprep.mubr.bf16.mxu1 %v5918_v31 }
  0x8a   : > { %4628 = vmatprep.mubr.bf16.mxu0 %v5924_v42  ;;  %4449 = vmatpush3.bf16.msra.mxu1 %v5111_v27  ;;  %v1975_v27 = vsel %vm5281_vm2, %v1970_v8, %v1974_v56  ;;  %v5134_v8 = vld [vmem:[%s6224_s1 + $0x1f8] sm:$0xff]   ;;  %v5136_v56 = vld [vmem:[%s6224_s1 + $0x200] sm:$0xff]  }
  0x8b   : > { %4450 = vmatprep.subr.bf16.mxu1 %v5115_v54  ;;  %v5951_v57 = vcombine.low %v1965_v48, %v1975_v27  ;;  %v6032_v48 = vcombine.low %v5897_v14, %v5883_v24  ;;  %v5137_v27 = vld [vmem:[%s6224_s1 + $0xe8] sm:$0xff]   ;;  %v5139_v24 = vld [vmem:[%s6224_s1 + $0xf0] sm:$0xff]  }
  0x8e   : > { %4451 = vmatpush3.bf16.msra.mxu1 %v5115_v54  ;;  %v3758_v54 = vrot.slane %v5155_v2, 9  ;;  %v5143_v2 = vld [vmem:[%s6224_s1 + $0x220] sm:$0xff]  }
  0x8f   : > { %4452 = vmatprep.subr.bf16.mxu1 %v5119_v36 }
  0x90   : > { %4421 = vmatmul.mubr.bf16.gmra.mrb[12].mxu1 %v5943_v41 }
  0x91   : > { %4629 = vmatmul.mubr.bf16.gmra.mrb[28].mxu0 %v5945_v17  ;;  %4424 = vmatprep.mubr.bf16.mxu1 %v5833_v28 }
  0x92   : > { %4648 = vmatprep.mubr.bf16.mxu0 %v5370_v60  ;;  %4453 = vmatpush3.bf16.msra.mxu1 %v5119_v36  ;;  %v5127_v36 = vld [vmem:[%s6224_s1 + $0xc8] sm:$0xff]  }
  0x93   : > { %4454 = vmatprep.subr.bf16.mxu1 %v5123_v0 }
  0x96   : > { %4455 = vmatpush3.bf16.msra.mxu1 %v5123_v0  ;;  %v6042_v0 = vld [vmem:[%s5236_s10 + $0xcc] sm:$0xf] }
  0x97   : > { %4488 = vmatprep.subr.bf16.mxu1 %v5125_v62 }
  0x98   : > { %4425 = vmatmul.mubr.bf16.gmra.mrb[16].mxu1 %v5844_v33 }
  0x99   : > { %4649 = vmatmul.mubr.bf16.vlgmr.msra.gmra.mrb[0].mxu0 %v5441_v11  ;;  %4428 = vmatprep.mubr.bf16.mxu1 %v5855_v45 }
  0x9a   : > { %4681 = vmatpush3.bf16.msra.mxu0 %v5769_v30  ;;  %4652 = vmatprep.mubr.bf16.mxu0 %v5445_v15  ;;  %v5153_v30 = vld [vmem:[%s5236_s10 + $0x4] sm:$0xf] }
  0x9b   : > { %4682 = vmatprep.subr.bf16.mxu0 %v5116_v7  ;;  %v1256_v5 = vrot.slane %v5153_v30, 5  ;;  %v6259_v30 = vld [vmem:[#allocation2_spill] sm:$0xff] }
  0x9d   : > { %v1258_v34 = vrot.slane %v1256_v5, 4  ;;  %v1257_v63 = vsel %vm5488_vm5, %v3758_v54, %v1256_v5  ;;  %v5140_v5 = vld [vmem:[%s6224_s1 + $0x210] sm:$0xff]   ;;  %v5144_v54 = vld [vmem:[%s6224_s1 + $0x228] sm:$0xff]  }
  0x9e   : > { %4683 = vmatpush3.bf16.msra.mxu0 %v5116_v7  ;;  %v5141_v7 = vld [vmem:[%s6224_s1 + $0xf8] sm:$0xff]  }
  0x9f   : > { %4684 = vmatprep.subr.bf16.mxu0 %v5120_v20  ;;  %v1260_v25 = vsel %vm5488_vm5, %v1258_v34, %v1259_v52  ;;  %v6262_v52 = vld [vmem:[#allocation5_spill] sm:$0xff]  ;;  %v6263_v34 = vld [vmem:[#allocation6_spill] sm:$0xff] }
  0xa0   : > { %4429 = vmatmul.mubr.bf16.gmra.mrb[20].mxu1 %v5859_v40  ;;  %v3790_v22 = vcombine.low %v1257_v63, %v1260_v25  ;;  %v5145_v63 = vld [vmem:[%s6224_s1 + $0x230] sm:$0xff]   ;;  %v5146_v25 = vld [vmem:[%s6224_s1 + $0x238] sm:$0xff]  }
  0xa1   : > { %4653 = vmatmul.mubr.bf16.gmra.mrb[4].mxu0 %v5912_v12  ;;  %4432 = vmatprep.mubr.bf16.mxu1 %v5863_v53 }
  0xa2   : > { %4656 = vmatprep.mubr.bf16.mxu0 %v5918_v31  ;;  %4685 = vmatpush3.bf16.msra.mxu0 %v5120_v20  ;;  %v5138_v20 = vld [vmem:[%s6224_s1 + $0x208] sm:$0xff]  }
  0xa3   : > { %4686 = vmatprep.subr.bf16.mxu0 %v5124_v1 }
  0xa6   : > { %4687 = vmatpush3.bf16.msra.mxu0 %v5124_v1  ;;  %v5156_v1 = vld [vmem:[%s6224_s1 + $0x100] sm:$0xff]  }
  0xa7   : > { %4688 = vmatprep.subr.bf16.mxu0 %v5126_v32 }
  0xa8   : > { %4433 = vmatmul.mubr.bf16.gmra.mrb[24].mxu1 %v5867_v9 }
  0xa9   : > { %4657 = vmatmul.mubr.bf16.gmra.mrb[8].mxu0 %v5943_v41  ;;  %4436 = vmatprep.mubr.bf16.mxu1 %v5871_v16 }
  0xaa   : > { %4660 = vmatprep.mubr.bf16.mxu0 %v5833_v28  ;;  %4689 = vmatpush3.bf16.msra.mxu0 %v5126_v32  ;;  %v5142_v32 = vld [vmem:[%s6224_s1 + $0x218] sm:$0xff]  }
  0xab   : > { %4690 = vmatprep.subr.bf16.mxu0 %v5128_v59 }
  0xae   : > { %4691 = vmatpush3.bf16.msra.mxu0 %v5128_v59  ;;  %v6264_v59 = vld [vmem:[#allocation7_spill] sm:$0xff] }
  0xaf   : > { %4692 = vmatprep.subr.bf16.mxu0 %v5130_v49 }
  0xb0   : > { %4437 = vmatmul.mubr.bf16.gmra.mrb[28].mxu1 %v5878_v38 }
  0xb1   : > { %4661 = vmatmul.mubr.bf16.gmra.mrb[12].mxu0 %v5844_v33  ;;  %4456 = vmatprep.mubr.bf16.mxu1 %v3790_v22  ;;  %v6266_v22 = vld [vmem:[#allocation9_spill] sm:$0xff] }
  0xb2   : > { %4664 = vmatprep.mubr.bf16.mxu0 %v5855_v45  ;;  %4693 = vmatpush3.bf16.msra.mxu0 %v5130_v49  ;;  %v6265_v49 = vld [vmem:[#allocation8_spill] sm:$0xff] }
  0xb3   : > { %4694 = vmatprep.subr.bf16.mxu0 %v5134_v8 }
  0xb6   : > { %4695 = vmatpush3.bf16.msra.mxu0 %v5134_v8  ;;  %v6267_v8 = vld [vmem:[#allocation10_spill] sm:$0xff] }
  0xb7   : > { %4728 = vmatprep.subr.bf16.mxu0 %v5136_v56 }
  0xb8   : > { %4457 = vmatmul.mubr.bf16.vlgmr.msra.gmra.mrb[0].mxu1 %v5536_v39  ;;  %v5135_v39 = vld [vmem:[%s6224_s1 + $0xe0] sm:$0xff]  }
  0xb9   : > { %4665 = vmatmul.mubr.bf16.gmra.mrb[16].mxu0 %v5859_v40  ;;  %4489 = vmatpush3.bf16.msra.mxu1 %v5125_v62  ;;  %v6045_v62 = vld [vmem:[%s5236_s10 + $0xd0] sm:$0xf] }
  0xba   : > { %4460 = vmatprep.mubr.bf16.mxu1 %v5582_v26  ;;  %4668 = vmatprep.mubr.bf16.mxu0 %v5863_v53  ;;  %v3906_v14 = vcombine.low %v6042_v0, %v6045_v62 }
  0xbb   : > { %4490 = vmatprep.subr.bf16.mxu1 %v5127_v36 }
  0xbd   : > { %4491 = vmatpush3.bf16.msra.mxu1 %v5127_v36  ;;  %v2776_v36 = vshll.u32 %v6042_v0, 16 }
  0xbe   : > { %4492 = vmatprep.subr.bf16.mxu1 %v5129_v6 }
  0xc0   : > { %4461 = vmatmul.mubr.bf16.gmra.mrb[4].mxu1 %v5622_v46 }
  0xc1   : > { %4669 = vmatmul.mubr.bf16.gmra.mrb[20].mxu0 %v5867_v9  ;;  %4464 = vmatprep.mubr.bf16.mxu1 %v5659_v44 }
  0xc2   : > { %4672 = vmatprep.mubr.bf16.mxu0 %v5871_v16  ;;  %4493 = vmatpush3.bf16.msra.mxu1 %v5129_v6  ;;  %v2786_v6 = vshrl.u32 %v6045_v62, 16 }
  0xc3   : > { %4494 = vmatprep.subr.bf16.mxu1 %v5132_v10 }
  0xc6   : > { %4495 = vmatpush3.bf16.msra.mxu1 %v5132_v10  ;;  %v6268_v10 = vld [vmem:[#allocation11_spill] sm:$0xff] }
  0xc7   : > { %4496 = vmatprep.subr.bf16.mxu1 %v5135_v39 }
  0xc8   : > { %4465 = vmatmul.mubr.bf16.gmra.mrb[8].mxu1 %v5692_v19 }
  0xc9   : > { %4673 = vmatmul.mubr.bf16.gmra.mrb[24].mxu0 %v5878_v38  ;;  %4468 = vmatprep.mubr.bf16.mxu1 %v5724_v35 }
  0xca   : > { %4676 = vmatprep.mubr.bf16.mxu0 %v6032_v48  ;;  %4497 = vmatpush3.bf16.msra.mxu1 %v5135_v39 }
  0xcb   : > { %4498 = vmatprep.subr.bf16.mxu1 %v5137_v27 }
  0xce   : > { %4499 = vmatpush3.bf16.msra.mxu1 %v5137_v27  ;;  %v2778_v27 = vrot.slane %v2776_v36, 5 }
  0xcf   : > { %4500 = vmatprep.subr.bf16.mxu1 %v5139_v24 }
  0xd0   : > { %4469 = vmatmul.mubr.bf16.gmra.mrb[12].mxu1 %v5758_v21 }
  0xd1   : > { %4677 = vmatmul.mubr.bf16.gmra.mrb[28].mxu0 %v3906_v14  ;;  %4472 = vmatprep.mubr.bf16.mxu1 %v5790_v58  ;;  %v2788_v14 = vrot.slane %v2786_v6, 4 }
  0xd2   : > { %4696 = vmatprep.mubr.bf16.mxu0 %v5358_v51  ;;  %4501 = vmatpush3.bf16.msra.mxu1 %v5139_v24  ;;  %v6260_v51 = vld [vmem:[#allocation3_spill] sm:$0xff] }
  0xd3   : > { %4502 = vmatprep.subr.bf16.mxu1 %v5141_v7 }
  0xd6   : > { %4503 = vmatpush3.bf16.msra.mxu1 %v5141_v7  ;;  %v5158_v7 = vld [vmem:[%s6224_s1 + $0x110] sm:$0xff]  }
  0xd7   : > { %4776 = vmatprep.subr.bf16.mxu1 %v5156_v1 }
  0xd8   : > { %4473 = vmatmul.mubr.bf16.gmra.mrb[16].mxu1 %v5795_v18 }
  0xd9   : > { %4697 = vmatmul.mubr.bf16.vlgmr.msra.gmra.mrb[0].mxu0 %v6259_v30  ;;  %4476 = vmatprep.mubr.bf16.mxu1 %v5815_v13 }
  0xda   : > { %4729 = vmatpush3.bf16.msra.mxu0 %v5136_v56  ;;  %4700 = vmatprep.mubr.bf16.mxu0 %v6260_v51  ;;  %v2773_v56 = vshrl.u32 %v6042_v0, 16 }
  0xdb   : > { %4730 = vmatprep.subr.bf16.mxu0 %v5138_v20 }
  0xdc   : > { %v2775_v39 = vrot.slane %v2773_v56, 4 }
  0xde   : > { %4731 = vmatpush3.bf16.msra.mxu0 %v5138_v20  ;;  %v6269_v20 = vld [vmem:[#allocation12_spill] sm:$0xff] }
  0xdf   : > { %4732 = vmatprep.subr.bf16.mxu0 %v5140_v5 }
  0xe0   : > { %4477 = vmatmul.mubr.bf16.gmra.mrb[20].mxu1 %v5820_v29 }
  0xe1   : > { %4701 = vmatmul.mubr.bf16.gmra.mrb[4].mxu0 %v6261_v47  ;;  %4480 = vmatprep.mubr.bf16.mxu1 %v5873_v4 }
  0xe2   : > { %4704 = vmatprep.mubr.bf16.mxu0 %v6262_v52  ;;  %4733 = vmatpush3.bf16.msra.mxu0 %v5140_v5  ;;  %v5159_v5 = vld [vmem:[%s6224_s1 + $0x118] sm:$0xff]  }
  0xe3   : > { %4734 = vmatprep.subr.bf16.mxu0 %v5142_v32 }
  0xe6   : > { %4735 = vmatpush3.bf16.msra.mxu0 %v5142_v32 }
  0xe7   : > { %4736 = vmatprep.subr.bf16.mxu0 %v5143_v2 }
  0xe8   : > { %4481 = vmatmul.mubr.bf16.gmra.mrb[24].mxu1 %v5880_v3 }
  0xe9   : > { %4705 = vmatmul.mubr.bf16.gmra.mrb[8].mxu0 %v6263_v34  ;;  %4484 = vmatprep.mubr.bf16.mxu1 %v5914_v50 }
  0xea   : > { %4708 = vmatprep.mubr.bf16.mxu0 %v6264_v59  ;;  %4737 = vmatpush3.bf16.msra.mxu0 %v5143_v2 }
  0xeb   : > { %4738 = vmatprep.subr.bf16.mxu0 %v5144_v54 }
  0xee   : > { %4739 = vmatpush3.bf16.msra.mxu0 %v5144_v54  ;;  %v5161_v54 = vld [vmem:[%s6224_s1 + $0x128] sm:$0xff]  }
  0xef   : > { %4740 = vmatprep.subr.bf16.mxu0 %v5145_v63 }
  0xf0   : > { %4485 = vmatmul.mubr.bf16.gmra.mrb[28].mxu1 %v5924_v42 }
  0xf1   : > { %4709 = vmatmul.mubr.bf16.gmra.mrb[12].mxu0 %v6265_v49  ;;  %4504 = vmatprep.mubr.bf16.mxu1 %v5294_v43  ;;  %v2782_v43 = vshll.u32 %v6045_v62, 16 }
  0xf2   : > { %4712 = vmatprep.mubr.bf16.mxu0 %v6266_v22  ;;  %4741 = vmatpush3.bf16.msra.mxu0 %v5145_v63 }
  0xf3   : > { %4742 = vmatprep.subr.bf16.mxu0 %v5146_v25  ;;  %v2784_v24 = vrot.slane %v2782_v43, 5 }
  0xf5   : > { %v2789_v30 = vor.u32 %v2788_v14, %v2784_v24 }
  0xf6   : > { %4743 = vmatpush3.bf16.msra.mxu0 %v5146_v25 }
  0xf7   : > { %v2790_v47 = vrot.slane %v2789_v30, 4 }
  0xf8   : > { %4505 = vmatmul.mubr.bf16.vlgmr.msra.gmra.mrb[0].mxu1 %v5370_v60  ;;  %v5157_v60 = vld [vmem:[%s6224_s1 + $0x108] sm:$0xff]  }
  0xf9   : > { %4713 = vmatmul.mubr.bf16.gmra.mrb[16].mxu0 %v6267_v8  ;;  %4784 = vmatpush3.bf16.msra.mxu1 %v5156_v1  ;;  %v2779_v1 = vor.u32 %v2778_v27, %v2775_v39 }
  0xfa   : > { %4508 = vmatprep.mubr.bf16.mxu1 %v5441_v11  ;;  %4716 = vmatprep.mubr.bf16.mxu0 %v6268_v10  ;;  %v6113_v11 = vld [vmem:[%s5236_s10 + $0xd4] sm:$0x1] }
  0xfb   : > { %4777 = vmatprep.subr.bf16.mxu1 %v5157_v60  ;;  %v2792_v51 = vshll.u32 %v6113_v11, 16  ;;  %v2780_v32 = vrot.slane %v2779_v1, 4 }
  0xfd   : > { %4785 = vmatpush3.bf16.msra.mxu1 %v5157_v60  ;;  %v2794_v52 = vrot.slane %v2792_v51, 5 }
  0xfe   : > { %4778 = vmatprep.subr.bf16.mxu1 %v5158_v7 }
  0xff   : > { %v2795_v2 = vsel %vm5281_vm2, %v2790_v47, %v2794_v52 }
 0x100   : > { %4509 = vmatmul.mubr.bf16.gmra.mrb[4].mxu1 %v5445_v15  ;;  %v5160_v15 = vld [vmem:[%s6224_s1 + $0x120] sm:$0xff]  }
 0x101   : > { %4717 = vmatmul.mubr.bf16.gmra.mrb[20].mxu0 %v6269_v20  ;;  %4512 = vmatprep.mubr.bf16.mxu1 %v5912_v12  ;;  %v2785_v12 = vsel %vm5281_vm2, %v2780_v32, %v2784_v24 }
 0x102   : > { %4720 = vmatprep.mubr.bf16.mxu0 %v5754_v55  ;;  %4786 = vmatpush3.bf16.msra.mxu1 %v5158_v7  ;;  %v3931_v34 = vcombine.low %v2785_v12, %v2795_v2 }
 0x103   : > { %4779 = vmatprep.subr.bf16.mxu1 %v5159_v5 }
 0x106   : > { %4787 = vmatpush3.bf16.msra.mxu1 %v5159_v5 }
 0x107   : > { %4780 = vmatprep.subr.bf16.mxu1 %v5160_v15 }
 0x108   : > { %4513 = vmatmul.mubr.bf16.gmra.mrb[8].mxu1 %v5918_v31  ;;  %v5162_v31 = vld [vmem:[%s6224_s1 + $0x130] sm:$0xff]  }
 0x109   : > { %4721 = vmatmul.mubr.bf16.gmra.mrb[24].mxu0 %v5788_v61  ;;  %4516 = vmatprep.mubr.bf16.mxu1 %v5943_v41 }
 0x10a   : > { %4724 = vmatprep.mubr.bf16.mxu0 %v5951_v57  ;;  %4788 = vmatpush3.bf16.msra.mxu1 %v5160_v15 }
 0x10b   : > { %4781 = vmatprep.subr.bf16.mxu1 %v5161_v54 }
 0x10e   : > { %4789 = vmatpush3.bf16.msra.mxu1 %v5161_v54 }
 0x10f   : > { %4782 = vmatprep.subr.bf16.mxu1 %v5162_v31 }
 0x110   : > { %4517 = vmatmul.mubr.bf16.gmra.mrb[12].mxu1 %v5833_v28 }
 0x111   : > { %4725 = vmatmul.mubr.bf16.gmra.mrb[28].mxu0 %v3931_v34  ;;  %4520 = vmatprep.mubr.bf16.mxu1 %v5844_v33 }
 0x112   : > { %4744 = vmatprep.mubr.bf16.mxu0 %v5582_v26  ;;  %4790 = vmatpush3.bf16.msra.mxu1 %v5162_v31  ;;  %v3061_v26 = vrot.slane %v6045_v62, 5 }
 0x113   : > { %4783 = vmatprep.subr.bf16.mxu1 %v5163_v37 }
 0x116   : > { %4791 = vmatpush3.bf16.msra.mxu1 %v5163_v37 }
 0x118   : > { %4521 = vmatmul.mubr.bf16.gmra.mrb[16].mxu1 %v5855_v45 }
 0x119   : > { %4745 = vmatmul.mubr.bf16.vlgmr.msra.gmra.mrb[0].mxu0 %v5622_v46  ;;  %4524 = vmatprep.mubr.bf16.mxu1 %v5859_v40  ;;  %v3940_v46 = vrot.slane %v6042_v0, 9 }
 0x11a   : > { %4748 = vmatprep.mubr.bf16.mxu0 %v5659_v44  ;;  %v3063_v44 = vrot.slane %v3061_v26, 4 }
 0x120   : > { %4525 = vmatmul.mubr.bf16.gmra.mrb[20].mxu1 %v5863_v53 }
 0x121   : > { %4749 = vmatmul.mubr.bf16.gmra.mrb[4].mxu0 %v5692_v19  ;;  %4528 = vmatprep.mubr.bf16.mxu1 %v5867_v9  ;;  %v3064_v19 = vrot.slane %v6113_v11, 5 }
 0x122   : > { %4752 = vmatprep.mubr.bf16.mxu0 %v5724_v35  ;;  %v3062_v35 = vsel %vm5488_vm5, %v3940_v46, %v3061_v26 }
 0x128   : > { %4529 = vmatmul.mubr.bf16.gmra.mrb[24].mxu1 %v5871_v16 }
 0x129   : > { %4753 = vmatmul.mubr.bf16.gmra.mrb[8].mxu0 %v5758_v21  ;;  %4532 = vmatprep.mubr.bf16.mxu1 %v5878_v38  ;;  %v3065_v21 = vsel %vm5488_vm5, %v3063_v44, %v3064_v19 }
 0x12a   : > { %4756 = vmatprep.mubr.bf16.mxu0 %v5790_v58  ;;  %v3957_v58 = vcombine.low %v3062_v35, %v3065_v21 }
 0x130   : > { %4533 = vmatmul.mubr.bf16.gmra.mrb[28].mxu1 %v6032_v48 }
 0x131   : > { %4757 = vmatmul.mubr.bf16.gmra.mrb[12].mxu0 %v5795_v18  ;;  %4568 = vmatprep.mubr.bf16.mxu1 %v6265_v49 }
 0x132   : > { %4760 = vmatprep.mubr.bf16.mxu0 %v5815_v13 }
 0x138   : > { %4569 = vmatmul.mubr.bf16.vlgmr.msra.gmra.mrb[16].mxu1 %v6266_v22 }
 0x139   : > { %4761 = vmatmul.mubr.bf16.gmra.mrb[16].mxu0 %v5820_v29  ;;  %4572 = vmatprep.mubr.bf16.mxu1 %v6267_v8 }
 0x13a   : > { %4764 = vmatprep.mubr.bf16.mxu0 %v5873_v4 }
 0x140   : > { %4573 = vmatmul.mubr.bf16.gmra.mrb[20].mxu1 %v6268_v10 }
 0x141   : > { %4765 = vmatmul.mubr.bf16.gmra.mrb[20].mxu0 %v5880_v3  ;;  %4576 = vmatprep.mubr.bf16.mxu1 %v6269_v20 }
 0x142   : > { %4768 = vmatprep.mubr.bf16.mxu0 %v5914_v50 }
 0x148   : > { %4577 = vmatmul.mubr.bf16.gmra.mrb[24].mxu1 %v5754_v55 }
 0x149   : > { %4769 = vmatmul.mubr.bf16.gmra.mrb[24].mxu0 %v5924_v42  ;;  %4580 = vmatprep.mubr.bf16.mxu1 %v5788_v61 }
 0x14a   : > { %4772 = vmatprep.mubr.bf16.mxu0 %v5945_v17 }
 0x150   : > { %4581 = vmatmul.mubr.bf16.gmra.mrb[28].mxu1 %v5951_v57 }
 0x151   : > { %4773 = vmatmul.mubr.bf16.gmra.mrb[28].mxu0 %v3957_v58 }
 0x1cb   : > { %v4506_v18 = vpop.f32.mrb[0].mxu1 }
 0x1cc   : > { %v1793_v13 = vpop.f32.mrb[1].mxu1 }
 0x1cd   : > { %v4507_v29 = vpop.f32.mrb[2].mxu1 }
 0x1ce   : > { %v1796_v55 = vpop.f32.mrb[3].mxu1 }
 0x1d3   : > { %v4510_v28 = vpop.f32.mrb[4].mxu1 }
 0x1d4   : > { %v1809_v33 = vpop.f32.mrb[5].mxu1 }
 0x1d5   : > { %v4511_v61 = vpop.f32.mrb[6].mxu1 }
 0x1d6   : > { %v1812_v45 = vpop.f32.mrb[7].mxu1 }
 0x1db   : > { %v4514_v40 = vpop.f32.mrb[8].mxu1 }
 0x1dc   : > { %v1825_v53 = vpop.f32.mrb[9].mxu1 }
 0x1dd   : > { %v4515_v9 = vpop.f32.mrb[10].mxu1 }
 0x1de   : > { %v1828_v16 = vpop.f32.mrb[11].mxu1 }
 0x1e3   : > { %v6182_v4 = vpop.f32.mrb[12].mxu1 }
 0x1e4   : > { %v6184_v23 = vpop.f32.mrb[13].mxu1 }
 0x1e5   : > { %v6186_v38 = vpop.f32.mrb[14].mxu1 }
 0x1e6   : > { %v6188_v3 = vpop.f32.mrb[15].mxu1 }
 0x1ec   : > { %v4746_v50 = vpop.f32.mrb[0].mxu0 }
 0x1ed   : > { %v4792_v42 = vadd.f32 %v4746_v50, %v4506_v18  ;;  %v3169_v41 = vpop.f32.mrb[1].mxu0 }
 0x1ee   : > { %v4793_v17 = vadd.f32 %v3169_v41, %v1793_v13  ;;  %v4747_v57 = vpop.f32.mrb[2].mxu0 }
 0x1ef   : > { %v4794_v48 = vadd.f32 %v4747_v57, %v4507_v29  ;;  %v3172_v0 = vpop.f32.mrb[3].mxu0  ;;  %v3527_v8 = vmul.f32 %v4792_v42, %v4792_v42 }
 0x1f0   : > { %v4795_v62 = vadd.f32 %v3172_v0, %v1796_v55  ;;  %v3525_v63 = vmul.f32 %v4793_v17, %v4793_v17 }
 0x1f1   : > { %v4041_v59 = vpack.c.bf16 %v4794_v48, %v4792_v42  ;;  %v3528_v60 = vmul.f32 %v4794_v48, %v4794_v48 }
 0x1f2   : > { %v4036_v25 = vpack.c.bf16 %v4795_v62, %v4793_v17  ;;  %v3488_v49 = vadd.f32 %v4795_v62, %v4793_v17  ;;  %v3526_v22 = vmul.f32 %v4795_v62, %v4795_v62 }
 0x1f3   : > { %4113 = vst [vmem:[%s6194_s8 + $0x8] sm:$0xff] %v4041_v59  }
 0x1f4   : > { %4037 = vst [vmem:[%s6194_s8] sm:$0xff] %v4036_v25   ;;  %v3489_v56 = vadd.f32 %v4792_v42, %v3488_v49  ;;  %v3557_v36 = vadd.f32 %v3526_v22, %v3525_v63  ;;  %v4750_v6 = vpop.f32.mrb[4].mxu0 }
 0x1f5   : > { %v4796_v43 = vadd.f32 %v4750_v6, %v4510_v28  ;;  %v3185_v10 = vpop.f32.mrb[5].mxu0 }
 0x1f6   : > { %v3558_v39 = vadd.f32 %v3557_v36, %v3527_v8  ;;  %v4797_v27 = vadd.f32 %v3185_v10, %v1809_v33  ;;  %v3490_v24 = vadd.f32 %v4794_v48, %v3489_v56  ;;  %v4751_v14 = vpop.f32.mrb[6].mxu0 }
 0x1f7   : > { %v4798_v7 = vadd.f32 %v4751_v14, %v4511_v61  ;;  %v3188_v11 = vpop.f32.mrb[7].mxu0  ;;  %v3531_v12 = vmul.f32 %v4796_v43, %v4796_v43 }
 0x1f8   : > { %v3491_v20 = vadd.f32 %v4797_v27, %v3490_v24  ;;  %v3529_v1 = vmul.f32 %v4797_v27, %v4797_v27  ;;  %v3559_v30 = vadd.f32 %v3558_v39, %v3528_v60  ;;  %v4799_v51 = vadd.f32 %v3188_v11, %v1812_v45 }
 0x1f9   : > { %v4051_v5 = vpack.c.bf16 %v4798_v7, %v4796_v43  ;;  %v3532_v26 = vmul.f32 %v4798_v7, %v4798_v7 }
 0x1fa   : > { %v3560_v32 = vadd.f32 %v3559_v30, %v3529_v1  ;;  %v4046_v47 = vpack.c.bf16 %v4799_v51, %v4797_v27  ;;  %v3492_v52 = vadd.f32 %v4799_v51, %v3491_v20  ;;  %v3530_v15 = vmul.f32 %v4799_v51, %v4799_v51 }
 0x1fb   : > { %4115 = vst [vmem:[%s6194_s8 + $0x18] sm:$0xff] %v4051_v5  }
 0x1fc   : > { %4114 = vst [vmem:[%s6194_s8 + $0x10] sm:$0xff] %v4046_v47   ;;  %v3493_v2 = vadd.f32 %v4796_v43, %v3492_v52  ;;  %v3561_v54 = vadd.f32 %v3560_v32, %v3530_v15  ;;  %v4754_v34 = vpop.f32.mrb[8].mxu0 }
 0x1fd   : > { %v4800_v31 = vadd.f32 %v4754_v34, %v4514_v40  ;;  %v3201_v37 = vpop.f32.mrb[9].mxu0 }
 0x1fe   : > { %v3562_v46 = vadd.f32 %v3561_v54, %v3531_v12  ;;  %v4801_v44 = vadd.f32 %v3201_v37, %v1825_v53  ;;  %v3494_v19 = vadd.f32 %v4798_v7, %v3493_v2  ;;  %v4755_v35 = vpop.f32.mrb[10].mxu0 }
 0x1ff   : > { %v4802_v21 = vadd.f32 %v4755_v35, %v4515_v9  ;;  %v3204_v58 = vpop.f32.mrb[11].mxu0  ;;  %v3535_v40 = vmul.f32 %v4800_v31, %v4800_v31 }
 0x200   : > { %v3495_v18 = vadd.f32 %v4801_v44, %v3494_v19  ;;  %v3533_v13 = vmul.f32 %v4801_v44, %v4801_v44  ;;  %v3563_v29 = vadd.f32 %v3562_v46, %v3532_v26  ;;  %v4803_v55 = vadd.f32 %v3204_v58, %v1828_v16 }
 0x201   : > { %v4061_v28 = vpack.c.bf16 %v4802_v21, %v4800_v31  ;;  %v3536_v9 = vmul.f32 %v4802_v21, %v4802_v21 }
 0x202   : > { %v3564_v33 = vadd.f32 %v3563_v29, %v3533_v13  ;;  %v4056_v61 = vpack.c.bf16 %v4803_v55, %v4801_v44  ;;  %v3496_v45 = vadd.f32 %v4803_v55, %v3495_v18  ;;  %v3534_v50 = vmul.f32 %v4803_v55, %v4803_v55 }
 0x203   : > { %4117 = vst [vmem:[%s6194_s8 + $0x28] sm:$0xff] %v4061_v28  }
 0x204   : > { %4116 = vst [vmem:[%s6194_s8 + $0x20] sm:$0xff] %v4056_v61   ;;  %v3497_v42 = vadd.f32 %v4800_v31, %v3496_v45  ;;  %v3565_v41 = vadd.f32 %v3564_v33, %v3534_v50  ;;  %v4758_v53 = vpop.f32.mrb[12].mxu0 }
 0x205   : > { %v4804_v17 = vadd.f32 %v4758_v53, %v6182_v4  ;;  %v3217_v57 = vpop.f32.mrb[13].mxu0 }
 0x206   : > { %v3566_v48 = vadd.f32 %v3565_v41, %v3535_v40  ;;  %v4805_v0 = vadd.f32 %v3217_v57, %v6184_v23  ;;  %v3498_v16 = vadd.f32 %v4802_v21, %v3497_v42  ;;  %v4759_v62 = vpop.f32.mrb[14].mxu0 }
 0x207   : > { %v4806_v59 = vadd.f32 %v4759_v62, %v6186_v38  ;;  %v3220_v63 = vpop.f32.mrb[15].mxu0  ;;  %v3539_v10 = vmul.f32 %v4804_v17, %v4804_v17 }
 0x208   : > { %v3499_v25 = vadd.f32 %v4805_v0, %v3498_v16  ;;  %v3537_v49 = vmul.f32 %v4805_v0, %v4805_v0  ;;  %v3567_v22 = vadd.f32 %v3566_v48, %v3536_v9  ;;  %v4807_v8 = vadd.f32 %v3220_v63, %v6188_v3 }
 0x209   : > { %v4071_v56 = vpack.c.bf16 %v4806_v59, %v4804_v17  ;;  %v3540_v7 = vmul.f32 %v4806_v59, %v4806_v59 }
 0x20a   : > { %v3568_v36 = vadd.f32 %v3567_v22, %v3537_v49  ;;  %v4066_v4 = vpack.c.bf16 %v4807_v8, %v4805_v0  ;;  %v3500_v6 = vadd.f32 %v4807_v8, %v3499_v25  ;;  %v3538_v43 = vmul.f32 %v4807_v8, %v4807_v8 }
 0x20b   : > { %4119 = vst [vmem:[%s6194_s8 + $0x38] sm:$0xff] %v4071_v56   ;;  %v4570_v39 = vpop.f32.mrb[16].mxu1 }
 0x20c   : > { %4118 = vst [vmem:[%s6194_s8 + $0x30] sm:$0xff] %v4066_v4   ;;  %v3501_v23 = vadd.f32 %v4804_v17, %v3500_v6  ;;  %v3569_v60 = vadd.f32 %v3568_v36, %v3538_v43  ;;  %v4762_v27 = vpop.f32.mrb[16].mxu0  ;;  %v2143_v38 = vpop.f32.mrb[17].mxu1 }
 0x20d   : > { %v4808_v24 = vadd.f32 %v4762_v27, %v4570_v39  ;;  %v3233_v14 = vpop.f32.mrb[17].mxu0  ;;  %v4571_v1 = vpop.f32.mrb[18].mxu1 }
 0x20e   : > { %v3570_v11 = vadd.f32 %v3569_v60, %v3539_v10  ;;  %v4809_v20 = vadd.f32 %v3233_v14, %v2143_v38  ;;  %v3502_v3 = vadd.f32 %v4806_v59, %v3501_v23  ;;  %v4763_v30 = vpop.f32.mrb[18].mxu0  ;;  %v2146_v5 = vpop.f32.mrb[19].mxu1 }
 0x20f   : > { %v4810_v51 = vadd.f32 %v4763_v30, %v4571_v1  ;;  %v3236_v32 = vpop.f32.mrb[19].mxu0  ;;  %v3543_v26 = vmul.f32 %v4808_v24, %v4808_v24 }
 0x210   : > { %v3503_v47 = vadd.f32 %v4809_v20, %v3502_v3  ;;  %v3541_v52 = vmul.f32 %v4809_v20, %v4809_v20  ;;  %v3571_v15 = vadd.f32 %v3570_v11, %v3540_v7  ;;  %v4811_v12 = vadd.f32 %v3236_v32, %v2146_v5 }
 0x211   : > { %v4081_v2 = vpack.c.bf16 %v4810_v51, %v4808_v24  ;;  %v3544_v13 = vmul.f32 %v4810_v51, %v4810_v51 }
 0x212   : > { %v3572_v54 = vadd.f32 %v3571_v15, %v3541_v52  ;;  %v4076_v34 = vpack.c.bf16 %v4811_v12, %v4809_v20  ;;  %v3504_v31 = vadd.f32 %v4811_v12, %v3503_v47  ;;  %v3542_v37 = vmul.f32 %v4811_v12, %v4811_v12 }
 0x213   : > { %4121 = vst [vmem:[%s6194_s8 + $0x48] sm:$0xff] %v4081_v2   ;;  %v4574_v19 = vpop.f32.mrb[20].mxu1 }
 0x214   : > { %4120 = vst [vmem:[%s6194_s8 + $0x40] sm:$0xff] %v4076_v34   ;;  %v3505_v46 = vadd.f32 %v4808_v24, %v3504_v31  ;;  %v3573_v44 = vadd.f32 %v3572_v54, %v3542_v37  ;;  %v4766_v35 = vpop.f32.mrb[20].mxu0  ;;  %v2159_v58 = vpop.f32.mrb[21].mxu1 }
 0x215   : > { %v4812_v21 = vadd.f32 %v4766_v35, %v4574_v19  ;;  %v3249_v18 = vpop.f32.mrb[21].mxu0  ;;  %v4575_v33 = vpop.f32.mrb[22].mxu1 }
 0x216   : > { %v3574_v29 = vadd.f32 %v3573_v44, %v3543_v26  ;;  %v4813_v55 = vadd.f32 %v3249_v18, %v2159_v58  ;;  %v3506_v28 = vadd.f32 %v4810_v51, %v3505_v46  ;;  %v4767_v61 = vpop.f32.mrb[22].mxu0  ;;  %v2162_v50 = vpop.f32.mrb[23].mxu1 }
 0x217   : > { %v4814_v45 = vadd.f32 %v4767_v61, %v4575_v33  ;;  %v3252_v40 = vpop.f32.mrb[23].mxu0  ;;  %v3547_v62 = vmul.f32 %v4812_v21, %v4812_v21 }
 0x218   : > { %v3507_v42 = vadd.f32 %v4813_v55, %v3506_v28  ;;  %v3545_v41 = vmul.f32 %v4813_v55, %v4813_v55  ;;  %v3575_v53 = vadd.f32 %v3574_v29, %v3544_v13  ;;  %v4815_v17 = vadd.f32 %v3252_v40, %v2162_v50 }
 0x219   : > { %v4091_v57 = vpack.c.bf16 %v4814_v45, %v4812_v21  ;;  %v3548_v36 = vmul.f32 %v4814_v45, %v4814_v45 }
 0x21a   : > { %v3576_v9 = vadd.f32 %v3575_v53, %v3545_v41  ;;  %v4086_v48 = vpack.c.bf16 %v4815_v17, %v4813_v55  ;;  %v3508_v0 = vadd.f32 %v4815_v17, %v3507_v42  ;;  %v3546_v16 = vmul.f32 %v4815_v17, %v4815_v17 }
 0x21b   : > { %4123 = vst [vmem:[%s6194_s8 + $0x58] sm:$0xff] %v4091_v57   ;;  %v4578_v25 = vpop.f32.mrb[24].mxu1 }
 0x21c   : > { %4122 = vst [vmem:[%s6194_s8 + $0x50] sm:$0xff] %v4086_v48   ;;  %v3509_v59 = vadd.f32 %v4812_v21, %v3508_v0  ;;  %v3577_v63 = vadd.f32 %v3576_v9, %v3546_v16  ;;  %v4770_v49 = vpop.f32.mrb[24].mxu0  ;;  %v2175_v8 = vpop.f32.mrb[25].mxu1 }
 0x21d   : > { %v4816_v22 = vadd.f32 %v4770_v49, %v4578_v25  ;;  %v3265_v56 = vpop.f32.mrb[25].mxu0  ;;  %v4579_v10 = vpop.f32.mrb[26].mxu1 }
 0x21e   : > { %v3578_v4 = vadd.f32 %v3577_v63, %v3547_v62  ;;  %v4817_v6 = vadd.f32 %v3265_v56, %v2175_v8  ;;  %v3510_v43 = vadd.f32 %v4814_v45, %v3509_v59  ;;  %v4771_v23 = vpop.f32.mrb[26].mxu0  ;;  %v2178_v39 = vpop.f32.mrb[27].mxu1 }
 0x21f   : > { %v4818_v60 = vadd.f32 %v4771_v23, %v4579_v10  ;;  %v3268_v27 = vpop.f32.mrb[27].mxu0  ;;  %v3551_v51 = vmul.f32 %v4816_v22, %v4816_v22 }
 0x220   : > { %v3511_v24 = vadd.f32 %v4817_v6, %v3510_v43  ;;  %v3549_v38 = vmul.f32 %v4817_v6, %v4817_v6  ;;  %v3579_v14 = vadd.f32 %v3578_v4, %v3548_v36  ;;  %v4819_v7 = vadd.f32 %v3268_v27, %v2178_v39 }
 0x221   : > { %v4101_v11 = vpack.c.bf16 %v4818_v60, %v4816_v22  ;;  %v3552_v54 = vmul.f32 %v4818_v60, %v4818_v60 }
 0x222   : > { %v3580_v20 = vadd.f32 %v3579_v14, %v3549_v38  ;;  %v4096_v3 = vpack.c.bf16 %v4819_v7, %v4817_v6  ;;  %v3512_v1 = vadd.f32 %v4819_v7, %v3511_v24  ;;  %v3550_v30 = vmul.f32 %v4819_v7, %v4819_v7 }
 0x223   : > { %4125 = vst [vmem:[%s6194_s8 + $0x68] sm:$0xff] %v4101_v11   ;;  %v4582_v47 = vpop.f32.mrb[28].mxu1 }
 0x224   : > { %4124 = vst [vmem:[%s6194_s8 + $0x60] sm:$0xff] %v4096_v3   ;;  %v3513_v5 = vadd.f32 %v4816_v22, %v3512_v1  ;;  %v3581_v32 = vadd.f32 %v3580_v20, %v3550_v30  ;;  %v4774_v52 = vpop.f32.mrb[28].mxu0  ;;  %v2191_v12 = vpop.f32.mrb[29].mxu1 }
 0x225   : > { %v4820_v15 = vadd.f32 %v4774_v52, %v4582_v47  ;;  %v3281_v2 = vpop.f32.mrb[29].mxu0  ;;  %v4583_v26 = vpop.f32.mrb[30].mxu1 }
 0x226   : > { %v3582_v34 = vadd.f32 %v3581_v32, %v3551_v51  ;;  %v4821_v31 = vadd.f32 %v3281_v2, %v2191_v12  ;;  %v3514_v37 = vadd.f32 %v4818_v60, %v3513_v5  ;;  %v4775_v46 = vpop.f32.mrb[30].mxu0  ;;  %v2194_v19 = vpop.f32.mrb[31].mxu1 }
 0x227   : > { %v4822_v44 = vadd.f32 %v4775_v46, %v4583_v26  ;;  %v3284_v35 = vpop.f32.mrb[31].mxu0  ;;  %v3555_v45 = vmul.f32 %v4820_v15, %v4820_v15 }
 0x228   : > { %v3515_v21 = vadd.f32 %v4821_v31, %v3514_v37  ;;  %v3553_v58 = vmul.f32 %v4821_v31, %v4821_v31  ;;  %v3583_v18 = vadd.f32 %v3582_v34, %v3552_v54  ;;  %v4823_v13 = vadd.f32 %v3284_v35, %v2194_v19 }
 0x229   : > { %v4111_v29 = vpack.c.bf16 %v4822_v44, %v4820_v15  ;;  %v3556_v42 = vmul.f32 %v4822_v44, %v4822_v44 }
 0x22a   : > { %v3584_v55 = vadd.f32 %v3583_v18, %v3553_v58  ;;  %v4106_v28 = vpack.c.bf16 %v4823_v13, %v4821_v31  ;;  %v3516_v33 = vadd.f32 %v4823_v13, %v3515_v21  ;;  %v3554_v61 = vmul.f32 %v4823_v13, %v4823_v13 }
 0x22b   : > { %4127 = vst [vmem:[%s6194_s8 + $0x78] sm:$0xff] %v4111_v29  }
 0x22c   : > { %4126 = vst [vmem:[%s6194_s8 + $0x70] sm:$0xff] %v4106_v28   ;;  %v3517_v50 = vadd.f32 %v4820_v15, %v3516_v33  ;;  %v3585_v40 = vadd.f32 %v3584_v55, %v3554_v61 }
 0x22e   : > { %v3518_v41 = vadd.f32 %v4822_v44, %v3517_v50  ;;  %v3586_v53 = vadd.f32 %v3585_v40, %v3555_v45 }
 0x230   : > { %v3519_v17 = vrot.slane %v3518_v41, 4  ;;  %v3587_v57 = vadd.f32 %v3586_v53, %v3556_v42 }
 0x232   : > { %v3520_v9 = vadd.f32 %v3519_v17, %v3518_v41  ;;  %v3588_v48 = vrot.slane %v3587_v57, 4 }
 0x234   : > { %v3521_v0 = vrot.slane %v3520_v9, 2  ;;  %v3589_v16 = vadd.f32 %v3588_v48, %v3587_v57 }
 0x236   : > { %v3522_v62 = vadd.f32 %v3521_v0, %v3520_v9  ;;  %v3590_v59 = vrot.slane %v3589_v16, 2 }
 0x238   : > { %v3523_v63 = vrot.slane %v3522_v62, 1  ;;  %v3591_v25 = vadd.f32 %v3590_v59, %v3589_v16 }
 0x23a   : > { %v3592_v49 = vrot.slane %v3591_v25, 1  ;;  %v3524_v22 = vadd.f32 %v3523_v63, %v3522_v62 }
 0x23c   : > { %v3593_v8 = vadd.f32 %v3592_v49, %v3591_v25 }
 0x23e   : > { %v3595_v56 = vsel %vm3594_vm6, %v3524_v22, %v3593_v8 }
 0x23f   : > { %v3597_v36 = vsel %vm3596_vm7, %v3595_v56, 0.0 }
 0x240   : > { %3598 = vst [vmem:[%s181_s15] sm:$0xff] %v3597_v36 }
 0x241 PF: > { %s14_s12 = sadd.s32 1, %s5170_s12  }
 0x242   : > { %p11_p4 = scmp.ge.s32.totalorder %s14_s12, 4  }
 0x244   :  { %13 = sbr.rel (!%p11_p4) target bundleno = 1 (0x1), region = 78 }

// kernel: residual_forward.4
= control target key start
LH: loop header
LB: loop body
LE: loop exit
PB: predicated region body
PF: predicated region fallthrough
CT: control target
= control target key end

     0   :  { %s6184_s18 = smov 0   ;;  %s7432_s0 = inlined_call_operand.vmem [shape: bf16[2,16,16,128], index: 0, kind: input, shape index: {}]   ;;  %s7433_s1 = inlined_call_operand.vmem [shape: f32[1,128], index: 1, kind: input, shape index: {}]   ;;  %s7434_s2 = inlined_call_operand.vmem [shape: f32[1,128], index: 2, kind: input, shape index: {}]   ;;  %s7435_s3 = inlined_call_operand.vmem [shape: bf16[9,128,128], index: 3, kind: input, shape index: {}]   ;;  %s7436_s4 = inlined_call_operand.vmem [shape: bf16[2,16,16,128], index: 4, kind: output, shape index: {0}]   ;;  %s7437_s5 = inlined_call_operand.vmem [shape: f32[2,8,128], index: 5, kind: output, shape index: {1}]  }
   0x1 LB: > { %s4504_s19 = sadd.s32 4294967295, %s6151_s18   ;;  %p4508_p0 = scmp.ge.s32.totalorder %s6151_s18, 1  ;;  %s6151_s18 = sphi %s6184_s18, %s16_s18  }
   0x2   : > { %p190_p1 = scmp.lt.s32.totalorder %s6151_s18, 3 }
   0x4   : > { %p191_p2 = pnand %p4508_p0, %p190_p1 }
   0x6   : > { %194 = sbr.rel (%p191_p2) target bundleno = 681 (0x2a9), region = 36 }
   0xd   : > { %v6023_v0 = vld [vmem:[%s7435_s3 + $0x40] sm:$0xff]   ;;  %v6153_v2 = vmov 0   ;;  %v6025_v3 = vld [vmem:[%s7435_s3 + $0x48] sm:$0xff]   ;;  %v6027_v5 = vld [vmem:[%s7435_s3 + $0x50] sm:$0xff]   ;;  %p222_p3 = scmp.lt.s32.totalorder %s4504_s19, 1  ;;  %vm885_vm3 = vcmask 1043456  }
   0xe   : > { %v6024_v1 = vld [vmem:[%s7435_s3 + $0x100] sm:$0xff]   ;;  %411 = vst [vmem:[#allocation2] sm:$0xf] %v6153_v2  ;;  %412 = vst [vmem:[#allocation2 + $0x4] sm:$0xf] %v6153_v2  ;;  %5310 = vmatprep.subr.bf16.mxu1 %v6023_v0  ;;  %v6026_v4 = vld [vmem:[%s7435_s3 + $0x108] sm:$0xff]  }
   0xf   : > { %413 = vst [vmem:[#allocation2 + $0x8] sm:$0x1] %v6153_v2  ;;  %414 = vst [vmem:[#allocation2 + $0xc] sm:$0xf] %v6153_v2  ;;  %5502 = vmatprep.subr.bf16.mxu0 %v6024_v1  ;;  %5311 = vmatpush3.bf16.msra.mxu1 %v6023_v0  ;;  %v6028_v6 = vld [vmem:[%s7435_s3 + $0x110] sm:$0xff]   ;;  %v6029_v7 = vld [vmem:[%s7435_s3 + $0x58] sm:$0xff]  }
  0x10   : > { %415 = vst [vmem:[#allocation2 + $0x10] sm:$0xf] %v6153_v2  ;;  %416 = vst [vmem:[#allocation2 + $0x14] sm:$0x1] %v6153_v2  ;;  %5503 = vmatpush3.bf16.msra.mxu0 %v6024_v1  ;;  %5312 = vmatprep.subr.bf16.mxu1 %v6025_v3  ;;  %s7489_s19 = smov (!%p222_p3, %s4504_s19), 1  ;;  %v6030_v8 = vld [vmem:[%s7435_s3 + $0x118] sm:$0xff]  }
  0x11   : > { %417 = vst [vmem:[#allocation2 + $0x18] sm:$0xf] %v6153_v2  ;;  %418 = vst [vmem:[#allocation2 + $0x1c] sm:$0xf] %v6153_v2  ;;  %5504 = vmatprep.subr.bf16.mxu0 %v6026_v4  ;;  %v6031_v9 = vld [vmem:[%s7435_s3 + $0x60] sm:$0xff]   ;;  %s4854_s13 = sshll.u32 %s7489_s19, 7 }
  0x12   : > { %419 = vst [vmem:[#allocation2 + $0x20] sm:$0x1] %v6153_v2  ;;  %420 = vst [vmem:[#allocation2 + $0x24] sm:$0xf] %v6153_v2  ;;  %v6032_v10 = vld [vmem:[%s7435_s3 + $0x120] sm:$0xff]   ;;  %v6033_v11 = vld [vmem:[%s7435_s3 + $0x68] sm:$0xff]   ;;  %s6237_s22 = scalar_lea.vmem %s7432_s0, %s4854_s13  ;;  %s7402_s21 = scalar_lea.vmem %s7436_s4, %s4854_s13 }
  0x13   : > { %421 = vst [vmem:[#allocation2 + $0x28] sm:$0xf] %v6153_v2  ;;  %422 = vst [vmem:[#allocation2 + $0x2c] sm:$0x1] %v6153_v2  ;;  %5313 = vmatpush3.bf16.msra.mxu1 %v6025_v3  ;;  %v6034_v15 = vld [vmem:[%s7435_s3 + $0x128] sm:$0xff]   ;;  %v4921_v21 = vld [vmem:[%s6237_s22] sm:$0xff]  }
  0x14   : > { %423 = vst [vmem:[#allocation2 + $0x30] sm:$0xf] %v6153_v2  ;;  %424 = vst [vmem:[#allocation2 + $0x34] sm:$0xf] %v6153_v2  ;;  %5505 = vmatpush3.bf16.msra.mxu0 %v6026_v4  ;;  %5314 = vmatprep.subr.bf16.mxu1 %v6027_v5  ;;  %vm1072_vm0 = vsmask.f32 3328  ;;  %v4922_v24 = vunpack.c.l.bf16 %v4921_v21  ;;  %v4923_v25 = vunpack.c.h.bf16 %v4921_v21 }
  0x15   : > { %425 = vst [vmem:[#allocation2 + $0x38] sm:$0x1] %v6153_v2  ;;  %426 = vst [vmem:[#allocation2 + $0x3c] sm:$0xf] %v6153_v2  ;;  %5506 = vmatprep.subr.bf16.mxu0 %v6028_v6  ;;  %v1002_v12 = vld [vmem:[#allocation2] sm:$0xf] }
  0x16   : > { %427 = vst [vmem:[#allocation2 + $0x40] sm:$0xf] %v6153_v2  ;;  %428 = vst [vmem:[#allocation2 + $0x44] sm:$0x1] %v6153_v2  ;;  %v1003_v13 = vld [vmem:[#allocation2 + $0x4] sm:$0xf] }
  0x17   : > { %429 = vst [vmem:[#allocation2 + $0x48] sm:$0xf] %v6153_v2  ;;  %430 = vst [vmem:[#allocation2 + $0x4c] sm:$0xf] %v6153_v2  ;;  %5315 = vmatpush3.bf16.msra.mxu1 %v6027_v5  ;;  %v1004_v14 = vld [vmem:[#allocation2 + $0x8] sm:$0x1] }
  0x18   : > { %431 = vst [vmem:[#allocation2 + $0x50] sm:$0x1] %v6153_v2  ;;  %432 = vst [vmem:[#allocation2 + $0x54] sm:$0xf] %v6153_v2  ;;  %5507 = vmatpush3.bf16.msra.mxu0 %v6028_v6  ;;  %5316 = vmatprep.subr.bf16.mxu1 %v6029_v7  ;;  %v1076_v16 = vshrl.u32 %v1002_v12, 16  ;;  %v1079_v17 = vshll.u32 %v1002_v12, 16 }
  0x19   : > { %433 = vst [vmem:[#allocation2 + $0x58] sm:$0xf] %v6153_v2  ;;  %434 = vst [vmem:[#allocation2 + $0x5c] sm:$0x1] %v6153_v2  ;;  %5508 = vmatprep.subr.bf16.mxu0 %v6030_v8  ;;  %vm1073_vm1 = vsmask.f32 7440 }
  0x1a   : > { %435 = vst [vmem:[#allocation2 + $0x60] sm:$0xf] %v6153_v2  ;;  %436 = vst [vmem:[#allocation2 + $0x64] sm:$0xf] %v6153_v2  ;;  %v1085_v18 = vshll.u32 %v1003_v13, 16  ;;  %v1089_v19 = vshrl.u32 %v1003_v13, 16 }
  0x1b   : > { %437 = vst [vmem:[#allocation2 + $0x68] sm:$0x1] %v6153_v2  ;;  %438 = vst [vmem:[#allocation2 + $0x6c] sm:$0xf] %v6153_v2  ;;  %5317 = vmatpush3.bf16.msra.mxu1 %v6029_v7  ;;  %v1095_v20 = vshll.u32 %v1004_v14, 16  ;;  %v1078_v22 = vrot.slane %v1076_v16, 4 }
  0x1c   : > { %439 = vst [vmem:[#allocation2 + $0x70] sm:$0xf] %v6153_v2  ;;  %440 = vst [vmem:[#allocation2 + $0x74] sm:$0x1] %v6153_v2  ;;  %5509 = vmatpush3.bf16.msra.mxu0 %v6030_v8  ;;  %5318 = vmatprep.subr.bf16.mxu1 %v6031_v9  ;;  %v1081_v23 = vrot.slane %v1079_v17, 5  ;;  %v6035_v27 = vld [vmem:[%s7435_s3 + $0x70] sm:$0xff]  }
  0x1d   : > { %441 = vst [vmem:[#allocation2 + $0x78] sm:$0xf] %v6153_v2  ;;  %442 = vst [vmem:[#allocation2 + $0x7c] sm:$0xf] %v6153_v2  ;;  %5510 = vmatprep.subr.bf16.mxu0 %v6032_v10  ;;  %v6246_v26 = vld [vmem:[%s7433_s1] ss:$0 sm:$0xff] }
  0x1e   : > { %443 = vst [vmem:[#allocation2 + $0x80] sm:$0x1] %v6153_v2  ;;  %444 = vst [vmem:[#allocation2 + $0x84] sm:$0xf] %v6153_v2  ;;  %v1087_v28 = vrot.slane %v1085_v18, 5  ;;  %v1091_v29 = vrot.slane %v1089_v19, 4  ;;  %v1082_v32 = vor.u32 %v1081_v23, %v1078_v22  ;;  %v308_v33 = vmul.f32 %v4922_v24, %v6246_v26 }
  0x1f   : > { %445 = vst [vmem:[#allocation2 + $0x88] sm:$0xf] %v6153_v2  ;;  %446 = vst [vmem:[#allocation2 + $0x8c] sm:$0x1] %v6153_v2  ;;  %5319 = vmatpush3.bf16.msra.mxu1 %v6031_v9  ;;  %v6254_v30 = vld [vmem:[%s7434_s2] ss:$0 sm:$0xff]  ;;  %v309_v34 = vmul.f32 %v4923_v25, %v6246_v26 }
  0x20   : > { %447 = vst [vmem:[#allocation2 + $0x90] sm:$0xf] %v6153_v2  ;;  %448 = vst [vmem:[#allocation2 + $0x94] sm:$0xf] %v6153_v2  ;;  %5511 = vmatpush3.bf16.msra.mxu0 %v6032_v10  ;;  %5320 = vmatprep.subr.bf16.mxu1 %v6033_v11  ;;  %v6036_v31 = vld [vmem:[%s7435_s3 + $0x130] sm:$0xff]   ;;  %v1092_v36 = vor.u32 %v1091_v29, %v1087_v28  ;;  %v1097_v37 = vrot.slane %v1095_v20, 5  ;;  %v347_v39 = vadd.f32 %v6254_v30, %v308_v33 }
  0x21   : > { %449 = vst [vmem:[#allocation2 + $0x98] sm:$0x1] %v6153_v2  ;;  %450 = vst [vmem:[#allocation2 + $0x9c] sm:$0xf] %v6153_v2  ;;  %5512 = vmatprep.subr.bf16.mxu0 %v6034_v15  ;;  %v1083_v38 = vrot.slane %v1082_v32, 4  ;;  %v348_v40 = vadd.f32 %v6254_v30, %v309_v34  ;;  %v6037_v41 = vld [vmem:[%s7435_s3 + $0x78] sm:$0xff]  }
  0x22   : > { %451 = vst [vmem:[#allocation2 + $0xa0] sm:$0xf] %v6153_v2  ;;  %452 = vst [vmem:[#allocation2 + $0xa4] sm:$0x1] %v6153_v2  ;;  %v6038_v42 = vld [vmem:[%s7435_s3 + $0x138] sm:$0xff]   ;;  %v1093_v43 = vrot.slane %v1092_v36, 4 }
  0x23   : > { %453 = vst [vmem:[#allocation2 + $0xa8] sm:$0xf] %v6153_v2  ;;  %454 = vst [vmem:[#allocation2 + $0xac] sm:$0xf] %v6153_v2  ;;  %5321 = vmatpush3.bf16.msra.mxu1 %v6033_v11  ;;  %vm892_vm4 = vcmask 1040384   ;;  %v5064_v44 = vld [vmem:[%s6237_s22 + $0x8] sm:$0xff]  }
  0x24   : > { %455 = vst [vmem:[#allocation2 + $0xb0] sm:$0x1] %v6153_v2  ;;  %456 = vst [vmem:[#allocation2 + $0xb4] sm:$0xf] %v6153_v2  ;;  %5513 = vmatpush3.bf16.msra.mxu0 %v6034_v15  ;;  %5322 = vmatprep.subr.bf16.mxu1 %v6035_v27  ;;  %v379_v46 = vmax.f32 %v347_v39, 0.0  ;;  %v380_v47 = vmax.f32 %v348_v40, 0.0  ;;  %v4926_v48 = vunpack.c.l.bf16 %v5064_v44  ;;  %v4927_v50 = vunpack.c.h.bf16 %v5064_v44 }
  0x25   : > { %457 = vst [vmem:[#allocation2 + $0xb8] sm:$0xf] %v6153_v2  ;;  %458 = vst [vmem:[#allocation2 + $0xbc] sm:$0x1] %v6153_v2  ;;  %5514 = vmatprep.subr.bf16.mxu0 %v6036_v31  ;;  %vm561_vm5 = vsmask.f32 256 }
  0x26   : > { %459 = vst [vmem:[#allocation2 + $0xc0] sm:$0xf] %v6153_v2  ;;  %460 = vst [vmem:[#allocation2 + $0xc4] sm:$0xf] %v6153_v2  ;;  %vm562_vm6 = vsmask.f32 4368  ;;  %v4856_v53 = vpack.c.bf16 %v379_v46, %v379_v46  ;;  %v4857_v54 = vpack.c.bf16 %v380_v47, %v380_v47  ;;  %v310_v56 = vmul.f32 %v4926_v48, %v6246_v26 }
  0x27   : > { %461 = vst [vmem:[#allocation2 + $0xc8] sm:$0x1] %v6153_v2  ;;  %462 = vst [vmem:[#allocation2 + $0xcc] sm:$0xf] %v6153_v2  ;;  %v5065_v51 = vld [vmem:[%s6237_s22 + $0x10] sm:$0xff]   ;;  %5323 = vmatpush3.bf16.msra.mxu1 %v6035_v27  ;;  %v6284_v55 = vld [vmem:[%s7435_s3] sm:$0xff]   ;;  %v311_v57 = vmul.f32 %v4927_v50, %v6246_v26 }
  0x28   : > { %463 = vst [vmem:[#allocation2 + $0xd0] sm:$0xf] %v6153_v2  ;;  %464 = vst [vmem:[#allocation2 + $0xd4] sm:$0x1] %v6153_v2  ;;  %5515 = vmatpush3.bf16.msra.mxu0 %v6036_v31  ;;  %5324 = vmatprep.subr.bf16.mxu1 %v6037_v41  ;;  %vm886_vm7 = vsmask.f32 7938  ;;  %v4930_v58 = vunpack.c.l.bf16 %v5065_v51  ;;  %v4931_v59 = vunpack.c.h.bf16 %v5065_v51  ;;  %v349_v3 = vadd.f32 %v6254_v30, %v310_v56 }
  0x29   : > { %vm6263_vm2 = vmor %vm1072_vm0, %vm1073_vm1  ;;  %5516 = vmatprep.subr.bf16.mxu0 %v6038_v42  ;;  %v565_v60 = vshrl.u32 %v4856_v53, 16  ;;  %v568_v61 = vshll.u32 %v4856_v53, 16  ;;  %v573_v62 = vshrl.u32 %v4857_v54, 16  ;;  %v576_v63 = vshll.u32 %v4857_v54, 16  ;;  %v6291_v0 = vld [vmem:[%s7435_s3 + $0x140] sm:$0xff]   ;;  %v5066_v1 = vld [vmem:[%s6237_s22 + $0x18] sm:$0xff]  }
  0x2a   : > { %v1088_v45 = vsel %vm6263_vm2, %v1083_v38, %v1087_v28  ;;  %v1098_v49 = vsel %vm6263_vm2, %v1093_v43, %v1097_v37  ;;  %vm6296_vm8 = vmand %vm892_vm4, %vm561_vm5  ;;  %v350_v4 = vadd.f32 %v6254_v30, %v311_v57  ;;  %v312_v5 = vmul.f32 %v4930_v58, %v6246_v26  ;;  %v888_v13 = vld [vmem:[#allocation2 + $0xc] sm:$0xf]  ;;  %v894_v14 = vld [vmem:[#allocation2 + $0x14] sm:$0x1]  ;;  %s4513_s13 = sshll.u32 %s7489_s19, 3 }
  0x2b   : > { %v4564_v52 = vcombine.low %v1088_v45, %v1098_v49  ;;  %v313_v6 = vmul.f32 %v4931_v59, %v6246_v26  ;;  %5325 = vmatpush3.bf16.msra.mxu1 %v6037_v41  ;;  %vm6306_vm9 = vmor %vm561_vm5, %vm562_vm6  ;;  %v567_v8 = vrot.slane %v565_v60, 7  ;;  %v575_v9 = vrot.slane %v573_v62, 7  ;;  %v5067_v33 = vld [vmem:[%s6237_s22 + $0x20] sm:$0xff]   ;;  %v897_v45 = vld [vmem:[#allocation2 + $0x18] sm:$0xf]  ;;  %s235_s25 = scalar_lea.vmem %s7437_s5, %s4513_s13 }
  0x2c   : > { %v4934_v10 = vunpack.c.l.bf16 %v5066_v1  ;;  %v4935_v11 = vunpack.c.h.bf16 %v5066_v1  ;;  %5517 = vmatpush3.bf16.msra.mxu0 %v6038_v42  ;;  %vm6312_vm10 = vmand %vm885_vm3, %vm886_vm7  ;;  %5358 = vmatprep.subr.bf16.mxu1 %v6284_v55  ;;  %v381_v15 = vmax.f32 %v349_v3, 0.0  ;;  %v382_v16 = vmax.f32 %v350_v4, 0.0  ;;  %v901_v48 = vld [vmem:[#allocation2 + $0x20] sm:$0x1]  ;;  %v904_v3 = vld [vmem:[#allocation2 + $0x24] sm:$0xf] }
  0x2d   : > { %5326 = vmatprep.mubr.bf16.mxu1 %v4564_v52  ;;  %v351_v17 = vadd.f32 %v6254_v30, %v312_v5  ;;  %v352_v18 = vadd.f32 %v6254_v30, %v313_v6  ;;  %v570_v19 = vor.u32 %v568_v61, %v567_v8  ;;  %v571_v20 = vrot.slane %v567_v8, 4  ;;  %5550 = vmatprep.subr.bf16.mxu0 %v6291_v0  ;;  %v6081_v2 = vld [vmem:[%s7435_s3 + $0xa8] sm:$0xff]   ;;  %v6144_v35 = vld [vmem:[%s7435_s3 + $0x138] sm:$0xff]  }
  0x2e   : > { %v578_v21 = vor.u32 %v576_v63, %v575_v9  ;;  %v580_v22 = vrot.slane %v575_v9, 4  ;;  %v4858_v23 = vpack.c.bf16 %v381_v15, %v381_v15  ;;  %v4859_v24 = vpack.c.bf16 %v382_v16, %v382_v16 }
  0x2f   : > { %v383_v25 = vmax.f32 %v351_v17, 0.0  ;;  %v384_v27 = vmax.f32 %v352_v18, 0.0  ;;  %v889_v29 = vsel %vm6312_vm10, %v570_v19, %v888_v13  ;;  %v314_v32 = vmul.f32 %v4934_v10, %v6246_v26  ;;  %v908_v18 = vld [vmem:[#allocation2 + $0x2c] sm:$0x1] }
  0x30   : > { %v579_v28 = vsel %vm6306_vm9, %v571_v20, %v578_v21  ;;  %v895_v31 = vsel %vm6296_vm8, %v580_v22, %v894_v14  ;;  %890 = vst [vmem:[#allocation2 + $0xc] sm:$0xf] %v889_v29  ;;  %v582_v34 = vshrl.u32 %v4858_v23, 16  ;;  %v585_v36 = vshll.u32 %v4858_v23, 16  ;;  %v6355_v23 = vld [vmem:[%s6237_s22 + $0x28] sm:$0xff]  }
  0x31   : > { %891 = vst [vmem:[#allocation2 + $0x10] sm:$0xf] %v579_v28  ;;  %896 = vst [vmem:[#allocation2 + $0x14] sm:$0x1] %v895_v31  ;;  %v590_v37 = vshrl.u32 %v4859_v24, 16  ;;  %v593_v38 = vshll.u32 %v4859_v24, 16  ;;  %v4860_v39 = vpack.c.bf16 %v383_v25, %v383_v25  ;;  %v4861_v40 = vpack.c.bf16 %v384_v27, %v384_v27 }
  0x32   : > { %v315_v41 = vmul.f32 %v4935_v11, %v6246_v26  ;;  %v353_v42 = vadd.f32 %v6254_v30, %v314_v32  ;;  %v584_v43 = vrot.slane %v582_v34, 7  ;;  %v4938_v46 = vunpack.c.l.bf16 %v5067_v33  ;;  %v6362_v34 = vld [vmem:[%s6237_s22 + $0x30] sm:$0xff]  }
  0x33   : > { %v592_v44 = vrot.slane %v590_v37, 7  ;;  %v4939_v47 = vunpack.c.h.bf16 %v5067_v33  ;;  %v599_v49 = vshrl.u32 %v4860_v39, 16  ;;  %v602_v50 = vshll.u32 %v4860_v39, 16 }
  0x34   : > { %v607_v51 = vshrl.u32 %v4861_v40, 16  ;;  %v610_v52 = vshll.u32 %v4861_v40, 16  ;;  %v587_v53 = vor.u32 %v585_v36, %v584_v43  ;;  %v588_v54 = vrot.slane %v584_v43, 4 }
  0x35   : > { %v595_v56 = vor.u32 %v593_v38, %v592_v44  ;;  %v597_v57 = vrot.slane %v592_v44, 4  ;;  %v601_v58 = vrot.slane %v599_v49, 7  ;;  %v354_v60 = vadd.f32 %v6254_v30, %v315_v41 }
  0x36   : > { %v609_v59 = vrot.slane %v607_v51, 7  ;;  %v385_v61 = vmax.f32 %v353_v42, 0.0  ;;  %v898_v63 = vsel %vm6312_vm10, %v587_v53, %v897_v45  ;;  %v316_v4 = vmul.f32 %v4938_v46, %v6246_v26 }
  0x37   : > { %v596_v62 = vsel %vm6306_vm9, %v588_v54, %v595_v56  ;;  %v902_v1 = vsel %vm6296_vm8, %v597_v57, %v901_v48  ;;  %v6338_v5 = vld [vmem:[#allocation2 + $0xc] sm:$0xf]  ;;  %899 = vst [vmem:[#allocation2 + $0x18] sm:$0xf] %v898_v63  ;;  %v604_v9 = vor.u32 %v602_v50, %v601_v58  ;;  %v317_v13 = vmul.f32 %v4939_v47, %v6246_v26 }
  0x38   : > { %v6340_v6 = vld [vmem:[#allocation2 + $0x10] sm:$0xf]  ;;  %v6342_v8 = vld [vmem:[#allocation2 + $0x14] sm:$0x1]  ;;  %900 = vst [vmem:[#allocation2 + $0x1c] sm:$0xf] %v596_v62  ;;  %v612_v10 = vor.u32 %v610_v52, %v609_v59  ;;  %v6344_v11 = vpack.c.bf16 %v385_v61, %v385_v61  ;;  %v6369_v41 = vadd.f32 %v6254_v30, %v316_v4  ;;  %v4942_v43 = vunpack.c.l.bf16 %v6355_v23 }
  0x39   : > { %903 = vst [vmem:[#allocation2 + $0x20] sm:$0x1] %v902_v1  ;;  %v1100_v14 = vshrl.u32 %v6338_v5, 16  ;;  %v1103_v15 = vshll.u32 %v6338_v5, 16  ;;  %v1109_v16 = vshll.u32 %v6340_v6, 16  ;;  %v1113_v17 = vshrl.u32 %v6340_v6, 16 }
  0x3a   : > { %v1119_v19 = vshll.u32 %v6342_v8, 16  ;;  %v605_v20 = vrot.slane %v601_v58, 4  ;;  %v614_v21 = vrot.slane %v609_v59, 4  ;;  %v905_v22 = vsel %vm6312_vm10, %v604_v9, %v904_v3  ;;  %v6042_v3 = vld [vmem:[%s7435_s3 + $0x8] sm:$0xff]  }
  0x3b   : > { %v1102_v24 = vrot.slane %v1100_v14, 4  ;;  %v1105_v25 = vrot.slane %v1103_v15, 5  ;;  %v1111_v27 = vrot.slane %v1109_v16, 5  ;;  %v1115_v28 = vrot.slane %v1113_v17, 4  ;;  %906 = vst [vmem:[#allocation2 + $0x24] sm:$0xf] %v905_v22 }
  0x3c   : > { %v1121_v29 = vrot.slane %v1119_v19, 5  ;;  %v613_v31 = vsel %vm6306_vm9, %v605_v20, %v612_v10  ;;  %v909_v32 = vsel %vm6296_vm8, %v614_v21, %v908_v18  ;;  %v386_v33 = vmax.f32 %v354_v60, 0.0 }
  0x3d   : > { %v1106_v36 = vor.u32 %v1105_v25, %v1102_v24  ;;  %v1116_v37 = vor.u32 %v1115_v28, %v1111_v27  ;;  %907 = vst [vmem:[#allocation2 + $0x28] sm:$0xf] %v613_v31  ;;  %910 = vst [vmem:[#allocation2 + $0x2c] sm:$0x1] %v909_v32  ;;  %v616_v38 = vshrl.u32 %v6344_v11, 16  ;;  %v619_v39 = vshll.u32 %v6344_v11, 16 }
  0x3e   : > { %v6366_v40 = vpack.c.bf16 %v386_v33, %v386_v33  ;;  %v6372_v42 = vadd.f32 %v6254_v30, %v317_v13  ;;  %v6375_v46 = vld [vmem:[#allocation2 + $0x18] sm:$0xf]  ;;  %v4943_v48 = vunpack.c.h.bf16 %v6355_v23  ;;  %v4946_v49 = vunpack.c.l.bf16 %v6362_v34  ;;  %v6045_v31 = vld [vmem:[%s7435_s3 + $0x10] sm:$0xff]  }
  0x3f   : > { %v1107_v44 = vrot.slane %v1106_v36, 4  ;;  %v1117_v45 = vrot.slane %v1116_v37, 4  ;;  %v6377_v47 = vld [vmem:[#allocation2 + $0x1c] sm:$0xf]  ;;  %v1124_v51 = vshrl.u32 %v6375_v46, 16  ;;  %v1127_v52 = vshll.u32 %v6375_v46, 16 }
  0x40   : > { %v6381_v50 = vld [vmem:[#allocation2 + $0x20] sm:$0x1]  ;;  %v1133_v53 = vshll.u32 %v6377_v47, 16  ;;  %v1137_v54 = vshrl.u32 %v6377_v47, 16  ;;  %v618_v16 = vrot.slane %v616_v38, 7  ;;  %v624_v17 = vshrl.u32 %v6366_v40, 16 }
  0x41   : > { %v1112_v56 = vsel %vm6263_vm2, %v1107_v44, %v1111_v27  ;;  %v1122_v57 = vsel %vm6263_vm2, %v1117_v45, %v1121_v29  ;;  %v1143_v58 = vshll.u32 %v6381_v50, 16  ;;  %v2092_v59 = vrot.slane %v6381_v50, 5  ;;  %v911_v29 = vld [vmem:[#allocation2 + $0x30] sm:$0xf]  ;;  %v915_v37 = vld [vmem:[#allocation2 + $0x38] sm:$0x1] }
  0x42   : > { %v4565_v60 = vcombine.low %v1112_v56, %v1122_v57  ;;  %v1126_v61 = vrot.slane %v1124_v51, 4  ;;  %v1129_v62 = vrot.slane %v1127_v52, 5  ;;  %v1135_v63 = vrot.slane %v1133_v53, 5  ;;  %v6393_v1 = vld [vmem:[#allocation2 + $0x24] sm:$0xf]  ;;  %v6041_v56 = vld [vmem:[%s7435_s3 + $0x148] sm:$0xff]  }
  0x43   : > { %v1139_v4 = vrot.slane %v1137_v54, 4  ;;  %v1145_v9 = vrot.slane %v1143_v58, 5  ;;  %v1148_v10 = vshrl.u32 %v6393_v1, 16  ;;  %v1151_v11 = vshll.u32 %v6393_v1, 16 }
  0x44   : > { %5327 = vmatmul.mubr.bf16.vlgmr.msra.gmra.mrb[0].mxu1 %v4565_v60  ;;  %5518 = vmatprep.mubr.bf16.mxu0 %v4565_v60  ;;  %v1130_v13 = vor.u32 %v1129_v62, %v1126_v61  ;;  %v6400_v14 = vld [vmem:[#allocation2 + $0x28] sm:$0xf]  ;;  %v6402_v15 = vld [vmem:[#allocation2 + $0x2c] sm:$0x1]  ;;  %v318_v18 = vmul.f32 %v4942_v43, %v6246_v26  ;;  %v621_v28 = vor.u32 %v619_v39, %v618_v16  ;;  %v622_v36 = vrot.slane %v618_v16, 4  ;;  %v6048_v61 = vld [vmem:[%s7435_s3 + $0x18] sm:$0xff]  }
  0x45   : > { %5359 = vmatpush3.bf16.msra.mxu1 %v6284_v55  ;;  %v1140_v19 = vor.u32 %v1139_v4, %v1135_v63  ;;  %v1150_v20 = vrot.slane %v1148_v10, 4  ;;  %v1153_v21 = vrot.slane %v1151_v11, 5  ;;  %v1157_v22 = vshll.u32 %v6400_v14, 16  ;;  %v6043_v16 = vld [vmem:[%s7435_s3 + $0x150] sm:$0xff]  }
  0x46   : > { %v1131_v24 = vrot.slane %v1130_v13, 4  ;;  %v1161_v25 = vshrl.u32 %v6400_v14, 16  ;;  %v1167_v27 = vshll.u32 %v6402_v15, 16  ;;  %5360 = vmatprep.subr.bf16.mxu1 %v6042_v3  ;;  %v626_v45 = vrot.slane %v624_v17, 7 }
  0x47   : > { %v1141_v32 = vrot.slane %v1140_v19, 4  ;;  %v1154_v33 = vor.u32 %v1153_v21, %v1150_v20  ;;  %v1159_v55 = vrot.slane %v1157_v22, 5  ;;  %v627_v52 = vshll.u32 %v6366_v40, 16  ;;  %v6451_v19 = vld [vmem:[%s6237_s22 + $0x38] sm:$0xff]  }
  0x48   : > { %v1136_v38 = vsel %vm6263_vm2, %v1131_v24, %v1135_v63  ;;  %v1163_v43 = vrot.slane %v1161_v25, 4  ;;  %v1169_v44 = vrot.slane %v1167_v27, 5  ;;  %v912_v53 = vsel %vm6312_vm10, %v621_v28, %v911_v29  ;;  %v918_v27 = vld [vmem:[#allocation2 + $0x3c] sm:$0xf]  ;;  %v922_v28 = vld [vmem:[#allocation2 + $0x44] sm:$0x1] }
  0x49   : > { %v1146_v51 = vsel %vm6263_vm2, %v1141_v32, %v1145_v9  ;;  %v1155_v39 = vrot.slane %v1154_v33, 4  ;;  %5361 = vmatpush3.bf16.msra.mxu1 %v6042_v3  ;;  %v631_v58 = vrot.slane %v626_v45, 4  ;;  %913 = vst [vmem:[#allocation2 + $0x30] sm:$0xf] %v912_v53  ;;  %v387_v60 = vmax.f32 %v6369_v41, 0.0  ;;  %v6051_v33 = vld [vmem:[%s7435_s3 + $0x20] sm:$0xff]  }
  0x4a   : > { %v6420_v54 = vcombine.low %v1136_v38, %v1146_v51  ;;  %v1164_v57 = vor.u32 %v1163_v43, %v1159_v55  ;;  %5362 = vmatprep.subr.bf16.mxu1 %v6045_v31  ;;  %v629_v62 = vor.u32 %v627_v52, %v626_v45  ;;  %v388_v63 = vmax.f32 %v6372_v42, 0.0 }
  0x4b   : > { %v1160_v40 = vsel %vm6263_vm2, %v1155_v39, %v1159_v55  ;;  %v319_v3 = vmul.f32 %v4943_v48, %v6246_v26  ;;  %v916_v4 = vsel %vm6296_vm8, %v631_v58, %v915_v37  ;;  %v4864_v9 = vpack.c.bf16 %v387_v60, %v387_v60 }
  0x4c   : > { %7461 = vst [vmem:[#allocation3_spill] sm:$0xff] %v6420_v54  ;;  %5519 = vmatmul.mubr.bf16.vlgmr.msra.gmra.mrb[0].mxu0 %v6420_v54  ;;  %5330 = vmatprep.mubr.bf16.mxu1 %v6420_v54  ;;  %v1165_v41 = vrot.slane %v1164_v57, 4  ;;  %v357_v10 = vadd.f32 %v6254_v30, %v318_v18  ;;  %v630_v42 = vsel %vm6306_vm9, %v622_v36, %v629_v62  ;;  %917 = vst [vmem:[#allocation2 + $0x38] sm:$0x1] %v916_v4  ;;  %vm2070_vm11 = vcmask 1042432  }
  0x4d   : > { %5551 = vmatpush3.bf16.msra.mxu0 %v6291_v0  ;;  %v4865_v23 = vpack.c.bf16 %v388_v63, %v388_v63  ;;  %5363 = vmatpush3.bf16.msra.mxu1 %v6045_v31  ;;  %v358_v48 = vadd.f32 %v6254_v30, %v319_v3  ;;  %v4947_v11 = vunpack.c.h.bf16 %v6362_v34  ;;  %914 = vst [vmem:[#allocation2 + $0x34] sm:$0xf] %v630_v42  ;;  %v633_v0 = vshrl.u32 %v4864_v9, 16  ;;  %v925_v63 = vld [vmem:[#allocation2 + $0x48] sm:$0xf] }
  0x4e   : > { %5552 = vmatprep.subr.bf16.mxu0 %v6041_v56  ;;  %v1170_v13 = vsel %vm6263_vm2, %v1165_v41, %v1169_v44  ;;  %v636_v17 = vshll.u32 %v4864_v9, 16  ;;  %v389_v18 = vmax.f32 %v357_v10, 0.0  ;;  %5364 = vmatprep.subr.bf16.mxu1 %v6048_v61  ;;  %v6458_v31 = vmul.f32 %v4946_v49, %v6246_v26  ;;  %v6044_v44 = vld [vmem:[%s7435_s3 + $0x158] sm:$0xff]   ;;  %v6053_v3 = vld [vmem:[%s7435_s3 + $0x28] sm:$0xff]   ;;  %v929_v42 = vld [vmem:[#allocation2 + $0x50] sm:$0x1] }
  0x4f   : > { %v6453_v20 = vcombine.low %v1160_v40, %v1170_v13  ;;  %v641_v21 = vshrl.u32 %v4865_v23, 16  ;;  %v644_v22 = vshll.u32 %v4865_v23, 16  ;;  %v390_v24 = vmax.f32 %v358_v48, 0.0  ;;  %v6046_v13 = vld [vmem:[%s7435_s3 + $0x160] sm:$0xff]  }
  0x50   : > { %v635_v25 = vrot.slane %v633_v0, 7  ;;  %v4866_v29 = vpack.c.bf16 %v389_v18, %v389_v18  ;;  %v321_v32 = vmul.f32 %v4947_v11, %v6246_v26  ;;  %v6465_v55 = vld [vmem:[#allocation2 + $0x30] sm:$0xf]  ;;  %v4950_v38 = vunpack.c.l.bf16 %v6451_v19 }
  0x51   : > { %7462 = vst [vmem:[#allocation4_spill] sm:$0xff] %v6453_v20  ;;  %5553 = vmatpush3.bf16.msra.mxu0 %v6041_v56  ;;  %5331 = vmatmul.mubr.bf16.gmra.mrb[4].mxu1 %v6453_v20  ;;  %v643_v36 = vrot.slane %v641_v21, 7  ;;  %v4867_v37 = vpack.c.bf16 %v390_v24, %v390_v24  ;;  %v4951_v43 = vunpack.c.h.bf16 %v6451_v19  ;;  %v1172_v34 = vshrl.u32 %v6465_v55, 16  ;;  %v6055_v24 = vld [vmem:[%s7435_s3 + $0x30] sm:$0xff]  }
  0x52   : > { %5522 = vmatprep.mubr.bf16.mxu0 %v6453_v20  ;;  %5554 = vmatprep.subr.bf16.mxu0 %v6043_v16  ;;  %v1175_v49 = vshll.u32 %v6465_v55, 16  ;;  %v638_v45 = vor.u32 %v636_v17, %v635_v25  ;;  %v639_v51 = vrot.slane %v635_v25, 4  ;;  %v650_v53 = vshrl.u32 %v4866_v29, 16 }
  0x53   : > { %v646_v39 = vor.u32 %v644_v22, %v643_v36  ;;  %v648_v52 = vrot.slane %v643_v36, 4  ;;  %v653_v56 = vshll.u32 %v4866_v29, 16  ;;  %5365 = vmatpush3.bf16.msra.mxu1 %v6048_v61  ;;  %v6475_v57 = vld [vmem:[#allocation2 + $0x38] sm:$0x1]  ;;  %v1174_v58 = vrot.slane %v1172_v34, 4  ;;  %v6495_v22 = vld [vmem:[%s6237_s22 + $0x40] sm:$0xff]  }
  0x54   : > { %v1177_v60 = vrot.slane %v1175_v49, 5  ;;  %v919_v40 = vsel %vm6312_vm10, %v638_v45, %v918_v27  ;;  %v658_v62 = vshrl.u32 %v4867_v37, 16  ;;  %5366 = vmatprep.subr.bf16.mxu1 %v6051_v33  ;;  %v6482_v41 = vld [vmem:[#allocation2 + $0x34] sm:$0xf]  ;;  %v1191_v4 = vshll.u32 %v6475_v57, 16  ;;  %v6503_v36 = vld [vmem:[%s7435_s3 + $0x168] sm:$0xff]  }
  0x55   : > { %5555 = vmatpush3.bf16.msra.mxu0 %v6043_v16  ;;  %v647_v61 = vsel %vm6306_vm9, %v639_v51, %v646_v39  ;;  %920 = vst [vmem:[#allocation2 + $0x3c] sm:$0xf] %v919_v40  ;;  %v923_v9 = vsel %vm6296_vm8, %v648_v52, %v922_v28  ;;  %v652_v10 = vrot.slane %v650_v53, 7  ;;  %v1181_v48 = vshll.u32 %v6482_v41, 16 }
  0x56   : > { %v1178_v23 = vor.u32 %v1177_v60, %v1174_v58  ;;  %v1185_v11 = vshrl.u32 %v6482_v41, 16  ;;  %5556 = vmatprep.subr.bf16.mxu0 %v6044_v44  ;;  %921 = vst [vmem:[#allocation2 + $0x40] sm:$0xf] %v647_v61  ;;  %924 = vst [vmem:[#allocation2 + $0x44] sm:$0x1] %v923_v9  ;;  %v660_v16 = vrot.slane %v658_v62, 7  ;;  %v360_v49 = vadd.f32 %v6254_v30, %v321_v32 }
  0x57   : > { %v1193_v0 = vrot.slane %v1191_v4, 5  ;;  %v655_v17 = vor.u32 %v653_v56, %v652_v10  ;;  %v656_v18 = vrot.slane %v652_v10, 4  ;;  %v661_v21 = vshll.u32 %v4867_v37, 16  ;;  %5367 = vmatpush3.bf16.msra.mxu1 %v6051_v33  ;;  %v6057_v62 = vld [vmem:[%s7435_s3 + $0x38] sm:$0xff]  }
  0x58   : > { %v1179_v25 = vrot.slane %v1178_v23, 4  ;;  %v1183_v27 = vrot.slane %v1181_v48, 5  ;;  %v1187_v28 = vrot.slane %v1185_v11, 4  ;;  %v665_v29 = vrot.slane %v660_v16, 4  ;;  %5368 = vmatprep.subr.bf16.mxu1 %v6053_v3 }
  0x59   : > { %5557 = vmatpush3.bf16.msra.mxu0 %v6044_v44  ;;  %v663_v34 = vor.u32 %v661_v21, %v660_v16  ;;  %v926_v37 = vsel %vm6312_vm10, %v655_v17, %v925_v63  ;;  %v359_v33 = vadd.f32 %v6254_v30, %v6458_v31  ;;  %v322_v44 = vmul.f32 %v4950_v38, %v6246_v26  ;;  %v6049_v17 = vld [vmem:[%s7435_s3 + $0x170] sm:$0xff]  }
  0x5a   : > { %v1184_v45 = vsel %vm6263_vm2, %v1179_v25, %v1183_v27  ;;  %v1188_v51 = vor.u32 %v1187_v28, %v1183_v27  ;;  %5558 = vmatprep.subr.bf16.mxu0 %v6046_v13  ;;  %927 = vst [vmem:[#allocation2 + $0x48] sm:$0xf] %v926_v37  ;;  %v930_v39 = vsel %vm6296_vm8, %v665_v29, %v929_v42  ;;  %v392_v56 = vmax.f32 %v360_v49, 0.0 }
  0x5b   : > { %v664_v52 = vsel %vm6306_vm9, %v656_v18, %v663_v34  ;;  %931 = vst [vmem:[#allocation2 + $0x50] sm:$0x1] %v930_v39  ;;  %v391_v53 = vmax.f32 %v359_v33, 0.0  ;;  %v323_v31 = vmul.f32 %v4951_v43, %v6246_v26  ;;  %5369 = vmatpush3.bf16.msra.mxu1 %v6053_v3  ;;  %v6523_v60 = vadd.f32 %v6254_v30, %v322_v44 }
  0x5c   : > { %v1189_v32 = vrot.slane %v1188_v51, 4  ;;  %v6520_v58 = vld [vmem:[#allocation2 + $0x3c] sm:$0xf]  ;;  %928 = vst [vmem:[#allocation2 + $0x4c] sm:$0xf] %v664_v52  ;;  %v4954_v38 = vunpack.c.l.bf16 %v6495_v22  ;;  %v4955_v40 = vunpack.c.h.bf16 %v6495_v22  ;;  %5370 = vmatprep.subr.bf16.mxu1 %v6055_v24  ;;  %v4869_v61 = vpack.c.bf16 %v392_v56, %v392_v56 }
  0x5d   : > { %v6530_v63 = vld [vmem:[#allocation2 + $0x40] sm:$0xf]  ;;  %v6532_v19 = vld [vmem:[#allocation2 + $0x44] sm:$0x1]  ;;  %v1196_v43 = vshrl.u32 %v6520_v58, 16  ;;  %v1199_v3 = vshll.u32 %v6520_v58, 16  ;;  %5559 = vmatpush3.bf16.msra.mxu0 %v6046_v13  ;;  %v4868_v4 = vpack.c.bf16 %v391_v53, %v391_v53  ;;  %v362_v44 = vadd.f32 %v6254_v30, %v323_v31 }
  0x5e   : > { %v1194_v9 = vsel %vm6263_vm2, %v1189_v32, %v1193_v0  ;;  %v1205_v10 = vshll.u32 %v6530_v63, 16  ;;  %v1209_v42 = vshrl.u32 %v6530_v63, 16  ;;  %v1215_v23 = vshll.u32 %v6532_v19, 16  ;;  %5560 = vmatprep.subr.bf16.mxu0 %v6503_v36  ;;  %v6061_v0 = vld [vmem:[%s7435_s3 + $0x80] sm:$0xff]  }
  0x5f   : > { %vm2071_vm12 = vcmask 1046532   ;;  %v6542_v48 = vcombine.low %v1184_v45, %v1194_v9  ;;  %v1198_v11 = vrot.slane %v1196_v43, 4  ;;  %v1201_v16 = vrot.slane %v1199_v3, 5  ;;  %5371 = vmatpush3.bf16.msra.mxu1 %v6055_v24  ;;  %v932_v24 = vld [vmem:[#allocation2 + $0x54] sm:$0xf]  ;;  %v6050_v3 = vld [vmem:[%s7435_s3 + $0x178] sm:$0xff]  }
  0x60   : > { %v667_v13 = vshrl.u32 %v4868_v4, 16  ;;  %v1207_v18 = vrot.slane %v1205_v10, 5  ;;  %v1211_v21 = vrot.slane %v1209_v42, 4  ;;  %v1217_v25 = vrot.slane %v1215_v23, 5  ;;  %5372 = vmatprep.subr.bf16.mxu1 %v6057_v62  ;;  %v936_v10 = vld [vmem:[#allocation2 + $0x5c] sm:$0x1]  ;;  %vm6593_vm13 = vmor %vm2070_vm11, %vm2071_vm12 }
  0x61   : > { %7463 = vst [vmem:[#allocation5_spill] sm:$0xff] %v6542_v48  ;;  %v670_v27 = vshll.u32 %v4868_v4, 16  ;;  %5523 = vmatmul.mubr.bf16.gmra.mrb[4].mxu0 %v6542_v48  ;;  %5334 = vmatprep.mubr.bf16.mxu1 %v6542_v48  ;;  %v1202_v28 = vor.u32 %v1201_v16, %v1198_v11  ;;  %v6552_v29 = vld [vmem:[#allocation2 + $0x48] sm:$0xf]  ;;  %v675_v37 = vshrl.u32 %v4869_v61, 16  ;;  %v678_v33 = vshll.u32 %v4869_v61, 16 }
  0x62   : > { %v669_v34 = vrot.slane %v667_v13, 7  ;;  %v1212_v49 = vor.u32 %v1211_v21, %v1207_v18  ;;  %v6554_v45 = vld [vmem:[#allocation2 + $0x50] sm:$0x1]  ;;  %v1220_v51 = vshrl.u32 %v6552_v29, 16  ;;  %v1223_v39 = vshll.u32 %v6552_v29, 16  ;;  %5561 = vmatpush3.bf16.msra.mxu0 %v6503_v36 }
  0x63   : > { %v1203_v52 = vrot.slane %v1202_v28, 4  ;;  %v6560_v53 = vld [vmem:[#allocation2 + $0x4c] sm:$0xf]  ;;  %v1239_v56 = vshll.u32 %v6554_v45, 16  ;;  %5562 = vmatprep.subr.bf16.mxu0 %v6049_v17  ;;  %5373 = vmatpush3.bf16.msra.mxu1 %v6057_v62  ;;  %v677_v11 = vrot.slane %v675_v37, 7  ;;  %vm4415_vm14 = vcmask 1041408  }
  0x64   : > { %v672_v32 = vor.u32 %v670_v27, %v669_v34  ;;  %v673_v43 = vrot.slane %v669_v34, 4  ;;  %v1213_v4 = vrot.slane %v1212_v49, 4  ;;  %v1222_v61 = vrot.slane %v1220_v51, 4  ;;  %5406 = vmatprep.subr.bf16.mxu1 %v6061_v0  ;;  %v6127_v7 = vld [vmem:[#allocation2 + $0x40] sm:$0xf] }
  0x65   : > { %v1225_v9 = vrot.slane %v1223_v39, 5  ;;  %v1229_v36 = vshll.u32 %v6560_v53, 16  ;;  %v1208_v31 = vsel %vm6263_vm2, %v1203_v52, %v1207_v18  ;;  %v1233_v42 = vshrl.u32 %v6560_v53, 16  ;;  %v6579_v18 = vld [vmem:[%s7435_s3 + $0x180] sm:$0xff]   ;;  %v6128_v12 = vld [vmem:[#allocation2 + $0x48] sm:$0xf] }
  0x66   : > { %v1241_v23 = vrot.slane %v1239_v56, 5  ;;  %v1218_v16 = vsel %vm6263_vm2, %v1213_v4, %v1217_v25  ;;  %v933_v62 = vsel %vm6312_vm10, %v672_v32, %v932_v24  ;;  %5563 = vmatpush3.bf16.msra.mxu0 %v6049_v17  ;;  %v680_v0 = vor.u32 %v678_v33, %v677_v11 }
  0x67   : > { %v1226_v13 = vor.u32 %v1225_v9, %v1222_v61  ;;  %v1231_v21 = vrot.slane %v1229_v36, 5  ;;  %v6574_v27 = vcombine.low %v1208_v31, %v1218_v16  ;;  %v1235_v28 = vrot.slane %v1233_v42, 4  ;;  %934 = vst [vmem:[#allocation2 + $0x54] sm:$0xf] %v933_v62  ;;  %5564 = vmatprep.subr.bf16.mxu0 %v6050_v3  ;;  %v943_v62 = vld [vmem:[#allocation2 + $0x68] sm:$0x1] }
  0x68   : > { %v682_v34 = vrot.slane %v677_v11, 4  ;;  %v393_v25 = vmax.f32 %v6523_v60, 0.0  ;;  %v394_v49 = vmax.f32 %v362_v44, 0.0  ;;  %v324_v17 = vmul.f32 %v4954_v38, %v6246_v26  ;;  %v939_v11 = vld [vmem:[#allocation2 + $0x60] sm:$0xf] }
  0x69   : > { %7464 = vst [vmem:[#allocation6_spill] sm:$0xff] %v6574_v27  ;;  %v1227_v37 = vrot.slane %v1226_v13, 4  ;;  %5335 = vmatmul.mubr.bf16.gmra.mrb[8].mxu1 %v6574_v27  ;;  %5526 = vmatprep.mubr.bf16.mxu0 %v6574_v27  ;;  %v1236_v33 = vor.u32 %v1235_v28, %v1231_v21  ;;  %v681_v24 = vsel %vm6306_vm9, %v673_v43, %v680_v0  ;;  %v4613_v39 = vrot.slane %v6338_v5, 9  ;;  %v967_v27 = vld [vmem:[#allocation2 + $0x90] sm:$0xf] }
  0x6a   : > { %v937_v51 = vsel %vm6296_vm8, %v682_v34, %v936_v10  ;;  %935 = vst [vmem:[#allocation2 + $0x58] sm:$0xf] %v681_v24  ;;  %v4870_v44 = vpack.c.bf16 %v393_v25, %v393_v25  ;;  %v4871_v52 = vpack.c.bf16 %v394_v49, %v394_v49  ;;  %5565 = vmatpush3.bf16.msra.mxu0 %v6050_v3  ;;  %v2082_v4 = vrot.slane %v6340_v6, 5 }
  0x6b   : > { %v1232_v38 = vsel %vm6263_vm2, %v1227_v37, %v1231_v21  ;;  %938 = vst [vmem:[#allocation2 + $0x5c] sm:$0x1] %v937_v51  ;;  %v325_v56 = vmul.f32 %v4955_v40, %v6246_v26  ;;  %v1237_v32 = vrot.slane %v1236_v33, 4  ;;  %v363_v43 = vadd.f32 %v6254_v30, %v324_v17  ;;  %5598 = vmatprep.subr.bf16.mxu0 %v6579_v18 }
  0x6c   : > { %v2085_v61 = vrot.slane %v6342_v8, 5  ;;  %v684_v5 = vshrl.u32 %v4870_v44, 16  ;;  %v687_v9 = vshll.u32 %v4870_v44, 16  ;;  %v692_v36 = vshrl.u32 %v4871_v52, 16 }
  0x6d   : > { %v695_v10 = vshll.u32 %v4871_v52, 16  ;;  %v1242_v3 = vsel %vm6263_vm2, %v1237_v32, %v1241_v23  ;;  %v364_v31 = vadd.f32 %v6254_v30, %v325_v56  ;;  %v395_v22 = vmax.f32 %v363_v43, 0.0 }
  0x6e   : > { %v2083_v26 = vsel %vm6593_vm13, %v4613_v39, %v2082_v4  ;;  %v6612_v40 = vcombine.low %v1232_v38, %v1242_v3  ;;  %v6614_v6 = vld [vmem:[#allocation2 + $0x54] sm:$0xf]  ;;  %v686_v8 = vrot.slane %v684_v5, 7  ;;  %v694_v42 = vrot.slane %v692_v36, 7  ;;  %v5072_v5 = vld [vmem:[%s6237_s22 + $0x48] sm:$0xff]  }
  0x6f   : > { %v2084_v16 = vrot.slane %v2082_v4, 4  ;;  %v1244_v13 = vshrl.u32 %v6614_v6, 16  ;;  %v1247_v21 = vshll.u32 %v6614_v6, 16  ;;  %v396_v23 = vmax.f32 %v364_v31, 0.0  ;;  %v946_v3 = vld [vmem:[#allocation2 + $0x6c] sm:$0xf] }
  0x70   : > { %7467 = vst [vmem:[#allocation7_spill] sm:$0xff] %v6612_v40  ;;  %v4872_v28 = vpack.c.bf16 %v395_v22, %v395_v22  ;;  %5527 = vmatmul.mubr.bf16.gmra.mrb[8].mxu0 %v6612_v40  ;;  %5338 = vmatprep.mubr.bf16.mxu1 %v6612_v40  ;;  %v689_v30 = vor.u32 %v687_v9, %v686_v8  ;;  %v690_v0 = vrot.slane %v686_v8, 4  ;;  %v699_v37 = vrot.slane %v694_v42, 4 }
  0x71   : > { %v697_v34 = vor.u32 %v695_v10, %v694_v42  ;;  %v6620_v25 = vld [vmem:[#allocation2 + $0x58] sm:$0xf]  ;;  %v1246_v17 = vrot.slane %v1244_v13, 4  ;;  %v1249_v33 = vrot.slane %v1247_v21, 5  ;;  %v4873_v24 = vpack.c.bf16 %v396_v23, %v396_v23 }
  0x72   : > { %v6622_v49 = vld [vmem:[#allocation2 + $0x5c] sm:$0x1]  ;;  %v2086_v51 = vsel %vm6593_vm13, %v2084_v16, %v2085_v61  ;;  %v1253_v39 = vshll.u32 %v6620_v25, 16  ;;  %v1257_v38 = vshrl.u32 %v6620_v25, 16  ;;  %v940_v32 = vsel %vm6312_vm10, %v689_v30, %v939_v11 }
  0x73   : > { %v1263_v44 = vshll.u32 %v6622_v49, 16  ;;  %v698_v52 = vsel %vm6306_vm9, %v690_v0, %v697_v34  ;;  %v1250_v56 = vor.u32 %v1249_v33, %v1246_v17  ;;  %v944_v43 = vsel %vm6296_vm8, %v699_v37, %v943_v62  ;;  %941 = vst [vmem:[#allocation2 + $0x60] sm:$0xf] %v940_v32  ;;  %v950_v34 = vld [vmem:[#allocation2 + $0x74] sm:$0x1] }
  0x74   : > { %942 = vst [vmem:[#allocation2 + $0x64] sm:$0xf] %v698_v52  ;;  %v701_v4 = vshrl.u32 %v4872_v28, 16  ;;  %v1255_v61 = vrot.slane %v1253_v39, 5  ;;  %v1259_v9 = vrot.slane %v1257_v38, 4  ;;  %v704_v10 = vshll.u32 %v4872_v28, 16 }
  0x75   : > { %v1265_v36 = vrot.slane %v1263_v44, 5  ;;  %945 = vst [vmem:[#allocation2 + $0x68] sm:$0x1] %v944_v43  ;;  %v1251_v31 = vrot.slane %v1250_v56, 4  ;;  %v709_v8 = vshrl.u32 %v4873_v24, 16  ;;  %v712_v42 = vshll.u32 %v4873_v24, 16 }
  0x76   : > { %v703_v22 = vrot.slane %v701_v4, 7  ;;  %v1260_v16 = vor.u32 %v1259_v9, %v1255_v61  ;;  %v6636_v11 = vcombine.low %v2083_v26, %v2086_v51  ;;  %v4614_v13 = vrot.slane %v6375_v46, 9  ;;  %v5073_v28 = vld [vmem:[%s6237_s22 + $0x50] sm:$0xff]   ;;  %v6658_v52 = vld [vmem:[%s7433_s1] ss:$0 sm:$0xff] }
  0x77   : > { %v2089_v21 = vrot.slane %v6377_v47, 5  ;;  %v1256_v62 = vsel %vm6263_vm2, %v1251_v31, %v1255_v61  ;;  %v711_v0 = vrot.slane %v709_v8, 7  ;;  %v4958_v24 = vunpack.c.l.bf16 %v5072_v5 }
  0x78   : > { %v706_v23 = vor.u32 %v704_v10, %v703_v22  ;;  %v707_v30 = vrot.slane %v703_v22, 4  ;;  %v1261_v37 = vrot.slane %v1260_v16, 4  ;;  %v4959_v47 = vunpack.c.h.bf16 %v5072_v5 }
  0x79   : > { %v2090_v17 = vsel %vm6593_vm13, %v4614_v13, %v2089_v21  ;;  %v2091_v33 = vrot.slane %v2089_v21, 4  ;;  %v714_v26 = vor.u32 %v712_v42, %v711_v0  ;;  %v716_v51 = vrot.slane %v711_v0, 4 }
  0x7a   : > { %v947_v46 = vsel %vm6312_vm10, %v706_v23, %v946_v3  ;;  %v1266_v39 = vsel %vm6263_vm2, %v1261_v37, %v1265_v36  ;;  %v326_v56 = vmul.f32 %v6658_v52, %v4958_v24  ;;  %v4962_v32 = vunpack.c.l.bf16 %v5073_v28  ;;  %v6663_v4 = vld [vmem:[#allocation2 + $0x60] sm:$0xf] }
  0x7b   : > { %v6649_v38 = vld [vmem:[#allocation2 + $0x64] sm:$0xf]  ;;  %948 = vst [vmem:[#allocation2 + $0x6c] sm:$0xf] %v947_v46  ;;  %v2093_v44 = vsel %vm6593_vm13, %v2091_v33, %v2092_v59  ;;  %v6661_v43 = vcombine.low %v1256_v62, %v1266_v39  ;;  %v715_v59 = vsel %vm6306_vm9, %v707_v30, %v714_v26  ;;  %v1268_v9 = vshrl.u32 %v6663_v4, 16 }
  0x7c   : > { %v6665_v5 = vld [vmem:[#allocation2 + $0x68] sm:$0x1]  ;;  %v1277_v61 = vshll.u32 %v6649_v38, 16  ;;  %v1281_v50 = vshrl.u32 %v6649_v38, 16  ;;  %v1271_v36 = vshll.u32 %v6663_v4, 16  ;;  %v951_v3 = vsel %vm6296_vm8, %v716_v51, %v950_v34 }
  0x7d   : > { %7468 = vst [vmem:[#allocation8_spill] sm:$0xff] %v6661_v43  ;;  %v1287_v10 = vshll.u32 %v6665_v5, 16  ;;  %949 = vst [vmem:[#allocation2 + $0x70] sm:$0xf] %v715_v59  ;;  %5339 = vmatmul.mubr.bf16.gmra.mrb[12].mxu1 %v6661_v43  ;;  %5530 = vmatprep.mubr.bf16.mxu0 %v6661_v43  ;;  %v6678_v8 = vcombine.low %v2090_v17, %v2093_v44  ;;  %v327_v42 = vmul.f32 %v6658_v52, %v4959_v47  ;;  %v6684_v62 = vld [vmem:[%s7434_s2] ss:$0 sm:$0xff] }
  0x7e   : > { %v1279_v31 = vrot.slane %v1277_v61, 5  ;;  %v1283_v22 = vrot.slane %v1281_v50, 4  ;;  %952 = vst [vmem:[#allocation2 + $0x74] sm:$0x1] %v951_v3  ;;  %v1270_v16 = vrot.slane %v1268_v9, 4  ;;  %v1273_v13 = vrot.slane %v1271_v36, 5 }
  0x7f   : > { %v1289_v21 = vrot.slane %v1287_v10, 5  ;;  %v365_v23 = vadd.f32 %v6684_v62, %v326_v56  ;;  %v366_v0 = vadd.f32 %v6684_v62, %v327_v42  ;;  %v4963_v34 = vunpack.c.h.bf16 %v5073_v28 }
  0x80   : > { %v1284_v30 = vor.u32 %v1283_v22, %v1279_v31  ;;  %v328_v37 = vmul.f32 %v6658_v52, %v4962_v32  ;;  %v1274_v17 = vor.u32 %v1273_v13, %v1270_v16  ;;  %v4615_v24 = vrot.slane %v6393_v1, 9 }
  0x81   : > { %v397_v33 = vmax.f32 %v365_v23, 0.0  ;;  %v2096_v26 = vrot.slane %v6400_v14, 5  ;;  %v398_v47 = vmax.f32 %v366_v0, 0.0  ;;  %v329_v39 = vmul.f32 %v6658_v52, %v4963_v34 }
  0x82   : > { %v1285_v51 = vrot.slane %v1284_v30, 4  ;;  %v6691_v46 = vld [vmem:[#allocation2 + $0x6c] sm:$0xf]  ;;  %v367_v44 = vadd.f32 %v6684_v62, %v328_v37  ;;  %v1275_v56 = vrot.slane %v1274_v17, 4 }
  0x83   : > { %v1292_v61 = vshrl.u32 %v6691_v46, 16  ;;  %v1295_v28 = vshll.u32 %v6691_v46, 16  ;;  %v4874_v32 = vpack.c.bf16 %v397_v33, %v397_v33  ;;  %v4875_v59 = vpack.c.bf16 %v398_v47, %v398_v47  ;;  %v953_v33 = vld [vmem:[#allocation2 + $0x78] sm:$0xf] }
  0x84   : > { %v1290_v50 = vsel %vm6263_vm2, %v1285_v51, %v1289_v21  ;;  %v6699_v1 = vld [vmem:[#allocation2 + $0x70] sm:$0xf]  ;;  %v368_v9 = vadd.f32 %v6684_v62, %v329_v39  ;;  %v399_v36 = vmax.f32 %v367_v44, 0.0  ;;  %v1280_v10 = vsel %vm6263_vm2, %v1275_v56, %v1279_v31  ;;  %v957_v44 = vld [vmem:[#allocation2 + $0x80] sm:$0x1] }
  0x85   : > { %v6704_v3 = vld [vmem:[#allocation2 + $0x74] sm:$0x1]  ;;  %v1294_v22 = vrot.slane %v1292_v61, 4  ;;  %v1297_v42 = vrot.slane %v1295_v28, 5  ;;  %v1301_v16 = vshll.u32 %v6699_v1, 16  ;;  %v6707_v13 = vcombine.low %v1280_v10, %v1290_v50 }
  0x86   : > { %v1305_v23 = vshrl.u32 %v6699_v1, 16  ;;  %v1311_v21 = vshll.u32 %v6704_v3, 16  ;;  %v718_v30 = vshrl.u32 %v4874_v32, 16  ;;  %v721_v37 = vshll.u32 %v4874_v32, 16 }
  0x87   : > { %7469 = vst [vmem:[#allocation9_spill] sm:$0xff] %v6707_v13  ;;  %v1298_v0 = vor.u32 %v1297_v42, %v1294_v22  ;;  %v1303_v34 = vrot.slane %v1301_v16, 5  ;;  %v726_v17 = vshrl.u32 %v4875_v59, 16  ;;  %5531 = vmatmul.mubr.bf16.gmra.mrb[12].mxu0 %v6707_v13  ;;  %5342 = vmatprep.mubr.bf16.mxu1 %v6707_v13  ;;  %v729_v39 = vshll.u32 %v4875_v59, 16 }
  0x88   : > { %v1307_v31 = vrot.slane %v1305_v23, 4  ;;  %v1313_v51 = vrot.slane %v1311_v21, 5  ;;  %v720_v47 = vrot.slane %v718_v30, 7  ;;  %5566 = vmatprep.mubr.bf16.mxu0 %v6636_v11  ;;  %v400_v28 = vmax.f32 %v368_v9, 0.0 }
  0x89   : > { %v1299_v56 = vrot.slane %v1298_v0, 4  ;;  %v728_v61 = vrot.slane %v726_v17, 7  ;;  %v4876_v50 = vpack.c.bf16 %v399_v36, %v399_v36  ;;  %v2097_v42 = vsel %vm6593_vm13, %v4615_v24, %v2096_v26 }
  0x8a   : > { %v1308_v10 = vor.u32 %v1307_v31, %v1303_v34  ;;  %v723_v22 = vor.u32 %v721_v37, %v720_v47  ;;  %v724_v32 = vrot.slane %v720_v47, 4  ;;  %v4877_v21 = vpack.c.bf16 %v400_v28, %v400_v28 }
  0x8b   : > { %v1304_v16 = vsel %vm6263_vm2, %v1299_v56, %v1303_v34  ;;  %v731_v23 = vor.u32 %v729_v39, %v728_v61  ;;  %v733_v59 = vrot.slane %v728_v61, 4  ;;  %v735_v9 = vshrl.u32 %v4876_v50, 16  ;;  %v960_v34 = vld [vmem:[#allocation2 + $0x84] sm:$0xf]  ;;  %v964_v39 = vld [vmem:[#allocation2 + $0x8c] sm:$0x1] }
  0x8c   : > { %v1309_v30 = vrot.slane %v1308_v10, 4  ;;  %v954_v0 = vsel %vm6312_vm10, %v723_v22, %v953_v33  ;;  %v738_v36 = vshll.u32 %v4876_v50, 16  ;;  %v743_v24 = vshrl.u32 %v4877_v21, 16  ;;  %v5074_v22 = vld [vmem:[%s6237_s22 + $0x58] sm:$0xff]  }
  0x8d   : > { %v732_v37 = vsel %vm6306_vm9, %v724_v32, %v731_v23  ;;  %955 = vst [vmem:[#allocation2 + $0x78] sm:$0xf] %v954_v0  ;;  %v958_v17 = vsel %vm6296_vm8, %v733_v59, %v957_v44  ;;  %v746_v31 = vshll.u32 %v4877_v21, 16  ;;  %v737_v33 = vrot.slane %v735_v9, 7  ;;  %v6054_v44 = vld [vmem:[%s7435_s3 + $0x188] sm:$0xff]  }
  0x8e   : > { %v1314_v47 = vsel %vm6263_vm2, %v1309_v30, %v1313_v51  ;;  %956 = vst [vmem:[#allocation2 + $0x7c] sm:$0xf] %v732_v37  ;;  %959 = vst [vmem:[#allocation2 + $0x80] sm:$0x1] %v958_v17  ;;  %v2098_v56 = vrot.slane %v2096_v26, 4  ;;  %v2099_v61 = vrot.slane %v6402_v15, 5  ;;  %v4966_v0 = vunpack.c.l.bf16 %v5074_v22 }
  0x8f   : > { %v6734_v28 = vcombine.low %v1304_v16, %v1314_v47  ;;  %v745_v50 = vrot.slane %v743_v24, 7  ;;  %v4616_v10 = vrot.slane %v6465_v55, 9  ;;  %v2103_v51 = vrot.slane %v6482_v41, 5  ;;  %5567 = vmatmul.mubr.bf16.vlgmr.msra.gmra.mrb[0].mxu0 %v6678_v8  ;;  %v5075_v26 = vld [vmem:[%s6237_s22 + $0x60] sm:$0xff]   ;;  %v6066_v47 = vld [vmem:[%s7435_s3 + $0x1a8] sm:$0xff]  }
  0x90   : > { %v740_v32 = vor.u32 %v738_v36, %v737_v33  ;;  %v741_v23 = vrot.slane %v737_v33, 4  ;;  %v2100_v14 = vsel %vm6593_vm13, %v2098_v56, %v2099_v61  ;;  %v2106_v15 = vrot.slane %v6475_v57, 5  ;;  %5599 = vmatpush3.bf16.msra.mxu0 %v6579_v18  ;;  %v6056_v57 = vld [vmem:[%s7435_s3 + $0x190] sm:$0xff]  }
  0x91   : > { %7470 = vst [vmem:[#allocation10_spill] sm:$0xff] %v6734_v28  ;;  %5343 = vmatmul.mubr.bf16.gmra.mrb[16].mxu1 %v6734_v28  ;;  %v748_v16 = vor.u32 %v746_v31, %v745_v50  ;;  %v750_v59 = vrot.slane %v745_v50, 4  ;;  %v6746_v55 = vcombine.low %v2097_v42, %v2100_v14  ;;  %v2104_v41 = vsel %vm6593_vm13, %v4616_v10, %v2103_v51  ;;  %v6058_v14 = vld [vmem:[%s7435_s3 + $0x198] sm:$0xff]  }
  0x92   : > { %v961_v21 = vsel %vm6312_vm10, %v740_v32, %v960_v34  ;;  %5600 = vmatprep.subr.bf16.mxu0 %v6054_v44  ;;  %v2105_v30 = vrot.slane %v2103_v51, 4  ;;  %v4967_v9 = vunpack.c.h.bf16 %v5074_v22  ;;  %v4970_v36 = vunpack.c.l.bf16 %v5075_v26 }
  0x93   : > { %v749_v18 = vsel %vm6306_vm9, %v741_v23, %v748_v16  ;;  %962 = vst [vmem:[#allocation2 + $0x84] sm:$0xf] %v961_v21  ;;  %v965_v42 = vsel %vm6296_vm8, %v750_v59, %v964_v39  ;;  %5570 = vmatprep.mubr.bf16.mxu0 %v6746_v55  ;;  %v4971_v37 = vunpack.c.h.bf16 %v5075_v26  ;;  %v330_v31 = vmul.f32 %v6658_v52, %v4966_v0  ;;  %v6787_v0 = vld [vmem:[%s6237_s22 + $0x68] sm:$0xff]  }
  0x94   : > { %v6760_v17 = vld [vmem:[#allocation2 + $0x78] sm:$0xf]  ;;  %963 = vst [vmem:[#allocation2 + $0x88] sm:$0xf] %v749_v18  ;;  %966 = vst [vmem:[#allocation2 + $0x8c] sm:$0x1] %v965_v42  ;;  %v2107_v24 = vsel %vm6593_vm13, %v2105_v30, %v2106_v15  ;;  %v331_v34 = vmul.f32 %v6658_v52, %v4967_v9  ;;  %5601 = vmatpush3.bf16.msra.mxu0 %v6054_v44  ;;  %v332_v10 = vmul.f32 %v6658_v52, %v4970_v36 }
  0x95   : > { %v6767_v33 = vld [vmem:[#allocation2 + $0x7c] sm:$0xf]  ;;  %v6769_v39 = vld [vmem:[#allocation2 + $0x80] sm:$0x1]  ;;  %v1316_v56 = vshrl.u32 %v6760_v17, 16  ;;  %v1319_v61 = vshll.u32 %v6760_v17, 16  ;;  %v6773_v50 = vcombine.low %v2104_v41, %v2107_v24  ;;  %v369_v23 = vadd.f32 %v6684_v62, %v330_v31  ;;  %5602 = vmatprep.subr.bf16.mxu0 %v6056_v57 }
  0x96   : > { %v1325_v51 = vshll.u32 %v6767_v33, 16  ;;  %v1329_v22 = vshrl.u32 %v6767_v33, 16  ;;  %v1335_v32 = vshll.u32 %v6769_v39, 16  ;;  %v370_v44 = vadd.f32 %v6684_v62, %v331_v34 }
  0x97   : > { %v1318_v15 = vrot.slane %v1316_v56, 4  ;;  %v1321_v26 = vrot.slane %v1319_v61, 5  ;;  %v333_v16 = vmul.f32 %v6658_v52, %v4971_v37  ;;  %5571 = vmatmul.mubr.bf16.gmra.mrb[4].mxu0 %v6773_v50  ;;  %v401_v30 = vmax.f32 %v369_v23, 0.0  ;;  %v6062_v61 = vld [vmem:[%s7435_s3 + $0x1a0] sm:$0xff]  }
  0x98   : > { %v1327_v59 = vrot.slane %v1325_v51, 5  ;;  %v1331_v41 = vrot.slane %v1329_v22, 4  ;;  %v1337_v21 = vrot.slane %v1335_v32, 5  ;;  %v402_v18 = vmax.f32 %v370_v44, 0.0  ;;  %5603 = vmatpush3.bf16.msra.mxu0 %v6056_v57 }
  0x99   : > { %v1322_v9 = vor.u32 %v1321_v26, %v1318_v15  ;;  %v371_v42 = vadd.f32 %v6684_v62, %v332_v10  ;;  %v372_v36 = vadd.f32 %v6684_v62, %v333_v16  ;;  %v4878_v34 = vpack.c.bf16 %v401_v30, %v401_v30  ;;  %5604 = vmatprep.subr.bf16.mxu0 %v6058_v14 }
  0x9a   : > { %v1332_v24 = vor.u32 %v1331_v41, %v1327_v59  ;;  %v6791_v31 = vld [vmem:[#allocation2 + $0x84] sm:$0xf]  ;;  %v2110_v37 = vrot.slane %v6530_v63, 5  ;;  %v4879_v32 = vpack.c.bf16 %v402_v18, %v402_v18 }
  0x9b   : > { %v1323_v51 = vrot.slane %v1322_v9, 4  ;;  %v6798_v22 = vld [vmem:[#allocation2 + $0x88] sm:$0xf]  ;;  %v6800_v10 = vld [vmem:[#allocation2 + $0x8c] sm:$0x1]  ;;  %v1340_v57 = vshrl.u32 %v6791_v31, 16 }
  0x9c   : > { %v1333_v15 = vrot.slane %v1332_v24, 4  ;;  %v1343_v63 = vshll.u32 %v6791_v31, 16  ;;  %v1349_v26 = vshll.u32 %v6798_v22, 16  ;;  %v1353_v44 = vshrl.u32 %v6798_v22, 16  ;;  %5605 = vmatpush3.bf16.msra.mxu0 %v6058_v14 }
  0x9d   : > { %v1328_v16 = vsel %vm6263_vm2, %v1323_v51, %v1327_v59  ;;  %v1342_v41 = vrot.slane %v1340_v57, 4  ;;  %v1359_v30 = vshll.u32 %v6800_v10, 16  ;;  %v752_v9 = vshrl.u32 %v4878_v34, 16  ;;  %5606 = vmatprep.subr.bf16.mxu0 %v6062_v61 }
  0x9e   : > { %v1338_v18 = vsel %vm6263_vm2, %v1333_v15, %v1337_v21  ;;  %v1345_v56 = vrot.slane %v1343_v63, 5  ;;  %v1351_v23 = vrot.slane %v1349_v26, 5  ;;  %v1355_v24 = vrot.slane %v1353_v44, 4 }
  0x9f   : > { %v6815_v28 = vcombine.low %v1328_v16, %v1338_v18  ;;  %v1361_v13 = vrot.slane %v1359_v30, 5  ;;  %v754_v59 = vrot.slane %v752_v9, 7  ;;  %v755_v51 = vshll.u32 %v4878_v34, 16 }
  0xa0   : > { %v1346_v57 = vor.u32 %v1345_v56, %v1342_v41  ;;  %v1356_v43 = vor.u32 %v1355_v24, %v1351_v23  ;;  %v760_v40 = vshrl.u32 %v4879_v32, 16  ;;  %v763_v14 = vshll.u32 %v4879_v32, 16  ;;  %5607 = vmatpush3.bf16.msra.mxu0 %v6062_v61  ;;  %v6070_v56 = vld [vmem:[%s7435_s3 + $0x1b0] sm:$0xff]   ;;  %v971_v41 = vld [vmem:[#allocation2 + $0x98] sm:$0x1] }
  0xa1   : > { %7471 = vst [vmem:[#allocation11_spill] sm:$0xff] %v6815_v28  ;;  %5346 = vmatprep.mubr.bf16.mxu1 %v6815_v28  ;;  %v757_v21 = vor.u32 %v755_v51, %v754_v59  ;;  %v758_v15 = vrot.slane %v754_v59, 4  ;;  %v403_v63 = vmax.f32 %v371_v42, 0.0  ;;  %v404_v26 = vmax.f32 %v372_v36, 0.0  ;;  %5608 = vmatprep.subr.bf16.mxu0 %v6066_v47 }
  0xa2   : > { %v1347_v44 = vrot.slane %v1346_v57, 4  ;;  %v1357_v48 = vrot.slane %v1356_v43, 4  ;;  %v762_v20 = vrot.slane %v760_v40, 7  ;;  %v7472_v16 = vrot.slane %v6520_v58, 9  ;;  %v974_v57 = vld [vmem:[#allocation2 + $0x9c] sm:$0xf] }
  0xa3   : > { %v968_v32 = vsel %vm6312_vm10, %v757_v21, %v967_v27  ;;  %v4880_v42 = vpack.c.bf16 %v403_v63, %v403_v63  ;;  %v4881_v36 = vpack.c.bf16 %v404_v26, %v404_v26  ;;  %v2112_v61 = vrot.slane %v2110_v37, 4  ;;  %v978_v21 = vld [vmem:[#allocation2 + $0xa4] sm:$0x1] }
  0xa4   : > { %v2111_v34 = vsel %vm6593_vm13, %v7472_v16, %v2110_v37  ;;  %v1352_v40 = vsel %vm6263_vm2, %v1347_v44, %v1351_v23  ;;  %v1362_v58 = vsel %vm6263_vm2, %v1357_v48, %v1361_v13  ;;  %v765_v43 = vor.u32 %v763_v14, %v762_v20  ;;  %969 = vst [vmem:[#allocation2 + $0x90] sm:$0xf] %v968_v32  ;;  %v5077_v32 = vld [vmem:[%s6237_s22 + $0x70] sm:$0xff]  }
  0xa5   : > { %v767_v30 = vrot.slane %v762_v20, 4  ;;  %v6831_v9 = vcombine.low %v1352_v40, %v1362_v58  ;;  %v769_v18 = vshrl.u32 %v4880_v42, 16  ;;  %v772_v24 = vshll.u32 %v4880_v42, 16  ;;  %5609 = vmatpush3.bf16.msra.mxu0 %v6066_v47  ;;  %v6074_v20 = vld [vmem:[%s7435_s3 + $0x1b8] sm:$0xff]  }
  0xa6   : > { %v777_v59 = vshrl.u32 %v4881_v36, 16  ;;  %v766_v27 = vsel %vm6306_vm9, %v758_v15, %v765_v43  ;;  %v780_v51 = vshll.u32 %v4881_v36, 16  ;;  %v7474_v23 = vrot.slane %v6532_v19, 5  ;;  %5610 = vmatprep.subr.bf16.mxu0 %v6070_v56 }
  0xa7   : > { %7473 = vst [vmem:[#allocation12_spill] sm:$0xff] %v6831_v9  ;;  %v972_v37 = vsel %vm6296_vm8, %v767_v30, %v971_v41  ;;  %5347 = vmatmul.mubr.bf16.gmra.mrb[20].mxu1 %v6831_v9  ;;  %970 = vst [vmem:[#allocation2 + $0x94] sm:$0xf] %v766_v27  ;;  %v771_v13 = vrot.slane %v769_v18, 7  ;;  %v4618_v19 = vrot.slane %v6552_v29, 9  ;;  %v2117_v15 = vrot.slane %v6560_v53, 5 }
  0xa8   : > { %v2114_v48 = vsel %vm6593_vm13, %v2112_v61, %v7474_v23  ;;  %973 = vst [vmem:[#allocation2 + $0x98] sm:$0x1] %v972_v37  ;;  %v779_v47 = vrot.slane %v777_v59, 7  ;;  %v2120_v63 = vrot.slane %v6554_v45, 5  ;;  %v4975_v26 = vunpack.c.h.bf16 %v6787_v0 }
  0xa9   : > { %v6845_v14 = vcombine.low %v2111_v34, %v2114_v48  ;;  %v7475_v44 = vunpack.c.l.bf16 %v6787_v0  ;;  %v774_v41 = vor.u32 %v772_v24, %v771_v13  ;;  %v775_v42 = vrot.slane %v771_v13, 4  ;;  %5611 = vmatpush3.bf16.msra.mxu0 %v6070_v56  ;;  %v6863_v0 = vld [vmem:[%s7435_s3 + $0x1c0] sm:$0xff]  }
  0xaa   : > { %v782_v36 = vor.u32 %v780_v51, %v779_v47  ;;  %v784_v61 = vrot.slane %v779_v47, 4  ;;  %v2118_v29 = vsel %vm6593_vm13, %v4618_v19, %v2117_v15  ;;  %v2119_v53 = vrot.slane %v2117_v15, 4  ;;  %5612 = vmatprep.subr.bf16.mxu0 %v6074_v20 }
  0xab   : > { %v334_v16 = vmul.f32 %v6658_v52, %v7475_v44  ;;  %5574 = vmatprep.mubr.bf16.mxu0 %v6845_v14  ;;  %v335_v45 = vmul.f32 %v6658_v52, %v4975_v26  ;;  %v6865_v40 = vld [vmem:[#allocation2 + $0x90] sm:$0xf]  ;;  %v975_v56 = vsel %vm6312_vm10, %v774_v41, %v974_v57  ;;  %v4978_v30 = vunpack.c.l.bf16 %v5077_v32 }
  0xac   : > { %v783_v58 = vsel %vm6306_vm9, %v775_v42, %v782_v36  ;;  %v979_v43 = vsel %vm6296_vm8, %v784_v61, %v978_v21  ;;  %v1364_v18 = vshrl.u32 %v6865_v40, 16  ;;  %v1367_v24 = vshll.u32 %v6865_v40, 16  ;;  %976 = vst [vmem:[#allocation2 + $0x9c] sm:$0xf] %v975_v56 }
  0xad   : > { %v373_v34 = vadd.f32 %v6684_v62, %v334_v16  ;;  %977 = vst [vmem:[#allocation2 + $0xa0] sm:$0xf] %v783_v58  ;;  %980 = vst [vmem:[#allocation2 + $0xa4] sm:$0x1] %v979_v43  ;;  %v2121_v59 = vsel %vm6593_vm13, %v2119_v53, %v2120_v63  ;;  %v374_v27 = vadd.f32 %v6684_v62, %v335_v45  ;;  %v4979_v23 = vunpack.c.h.bf16 %v5077_v32 }
  0xae   : > { %v6878_v37 = vcombine.low %v2118_v29, %v2121_v59  ;;  %5613 = vmatpush3.bf16.msra.mxu0 %v6074_v20  ;;  %v6880_v48 = vld [vmem:[#allocation2 + $0x94] sm:$0xf]  ;;  %v1366_v47 = vrot.slane %v1364_v18, 4  ;;  %v1369_v57 = vrot.slane %v1367_v24, 5  ;;  %v336_v19 = vmul.f32 %v6658_v52, %v4978_v30 }
  0xaf   : > { %v405_v51 = vmax.f32 %v373_v34, 0.0  ;;  %v6882_v13 = vld [vmem:[#allocation2 + $0x98] sm:$0x1]  ;;  %5646 = vmatprep.subr.bf16.mxu0 %v6863_v0  ;;  %v1373_v21 = vshll.u32 %v6880_v48, 16  ;;  %v1377_v15 = vshrl.u32 %v6880_v48, 16  ;;  %v406_v26 = vmax.f32 %v374_v27, 0.0 }
  0xb0   : > { %7476 = vst [vmem:[#allocation13_spill] sm:$0xff] %v6878_v37  ;;  %v1383_v63 = vshll.u32 %v6882_v13, 16  ;;  %5575 = vmatmul.mubr.bf16.gmra.mrb[8].mxu0 %v6878_v37  ;;  %v1370_v20 = vor.u32 %v1369_v57, %v1366_v47  ;;  %v337_v16 = vmul.f32 %v6658_v52, %v4979_v23  ;;  %v375_v43 = vadd.f32 %v6684_v62, %v336_v19 }
  0xb1   : > { %v4882_v44 = vpack.c.bf16 %v405_v51, %v405_v51  ;;  %v1375_v32 = vrot.slane %v1373_v21, 5  ;;  %v1379_v41 = vrot.slane %v1377_v15, 4  ;;  %v4883_v61 = vpack.c.bf16 %v406_v26, %v406_v26  ;;  %v981_v26 = vld [vmem:[#allocation2 + $0xa8] sm:$0xf] }
  0xb2   : > { %v1385_v42 = vrot.slane %v1383_v63, 5  ;;  %v1371_v36 = vrot.slane %v1370_v20, 4  ;;  %v376_v30 = vadd.f32 %v6684_v62, %v337_v16 }
  0xb3   : > { %v786_v29 = vshrl.u32 %v4882_v44, 16  ;;  %v789_v53 = vshll.u32 %v4882_v44, 16  ;;  %v1380_v45 = vor.u32 %v1379_v41, %v1375_v32  ;;  %v6891_v34 = vld [vmem:[#allocation2 + $0x9c] sm:$0xf]  ;;  %v794_v63 = vshrl.u32 %v4883_v61, 16 }
  0xb4   : > { %v6893_v58 = vld [vmem:[#allocation2 + $0xa0] sm:$0xf]  ;;  %v6895_v56 = vld [vmem:[#allocation2 + $0xa4] sm:$0x1]  ;;  %v1376_v18 = vsel %vm6263_vm2, %v1371_v36, %v1375_v32  ;;  %v1388_v24 = vshrl.u32 %v6891_v34, 16  ;;  %v1391_v59 = vshll.u32 %v6891_v34, 16 }
  0xb5   : > { %v1397_v27 = vshll.u32 %v6893_v58, 16  ;;  %v1381_v51 = vrot.slane %v1380_v45, 4  ;;  %v1401_v23 = vshrl.u32 %v6893_v58, 16  ;;  %v1407_v47 = vshll.u32 %v6895_v56, 16 }
  0xb6   : > { %v788_v57 = vrot.slane %v786_v29, 7  ;;  %v1390_v21 = vrot.slane %v1388_v24, 4  ;;  %v1393_v15 = vrot.slane %v1391_v59, 5  ;;  %v796_v9 = vrot.slane %v794_v63, 7  ;;  %v985_v24 = vld [vmem:[#allocation2 + $0xb0] sm:$0x1] }
  0xb7   : > { %v1399_v19 = vrot.slane %v1397_v27, 5  ;;  %v1386_v20 = vsel %vm6263_vm2, %v1381_v51, %v1385_v42  ;;  %v1403_v44 = vrot.slane %v1401_v23, 4  ;;  %v1409_v16 = vrot.slane %v1407_v47, 5 }
  0xb8   : > { %v791_v32 = vor.u32 %v789_v53, %v788_v57  ;;  %v6908_v41 = vcombine.low %v1376_v18, %v1386_v20  ;;  %v1394_v36 = vor.u32 %v1393_v15, %v1390_v21  ;;  %v792_v45 = vrot.slane %v788_v57, 4 }
  0xb9   : > { %v1404_v28 = vor.u32 %v1403_v44, %v1399_v19  ;;  %v797_v54 = vshll.u32 %v4883_v61, 16  ;;  %v407_v59 = vmax.f32 %v375_v43, 0.0  ;;  %v801_v37 = vrot.slane %v796_v9, 4  ;;  %v988_v44 = vld [vmem:[#allocation2 + $0xb4] sm:$0xf] }
  0xba   : > { %v982_v29 = vsel %vm6312_vm10, %v791_v32, %v981_v26  ;;  %5350 = vmatprep.mubr.bf16.mxu1 %v6908_v41  ;;  %v1395_v27 = vrot.slane %v1394_v36, 4  ;;  %v408_v42 = vmax.f32 %v376_v30, 0.0  ;;  %v4619_v53 = vrot.slane %v6614_v6, 9 }
  0xbb   : > { %983 = vst [vmem:[#allocation2 + $0xa8] sm:$0xf] %v982_v29  ;;  %v1405_v18 = vrot.slane %v1404_v28, 4  ;;  %v799_v51 = vor.u32 %v797_v54, %v796_v9  ;;  %v4884_v23 = vpack.c.bf16 %v407_v59, %v407_v59  ;;  %v2124_v47 = vrot.slane %v6620_v25, 5  ;;  %v992_v59 = vld [vmem:[#allocation2 + $0xbc] sm:$0x1] }
  0xbc   : > { %v1400_v61 = vsel %vm6263_vm2, %v1395_v27, %v1399_v19  ;;  %v986_v57 = vsel %vm6296_vm8, %v801_v37, %v985_v24  ;;  %v4885_v43 = vpack.c.bf16 %v408_v42, %v408_v42  ;;  %v2127_v21 = vrot.slane %v6622_v49, 5 }
  0xbd   : > { %v1410_v15 = vsel %vm6263_vm2, %v1405_v18, %v1409_v16  ;;  %v800_v6 = vsel %vm6306_vm9, %v792_v45, %v799_v51  ;;  %987 = vst [vmem:[#allocation2 + $0xb0] sm:$0x1] %v986_v57  ;;  %v803_v54 = vshrl.u32 %v4884_v23, 16  ;;  %v806_v28 = vshll.u32 %v4884_v23, 16 }
  0xbe   : > { %v6924_v9 = vcombine.low %v1400_v61, %v1410_v15  ;;  %984 = vst [vmem:[#allocation2 + $0xac] sm:$0xf] %v800_v6  ;;  %v811_v25 = vshrl.u32 %v4885_v43, 16  ;;  %v814_v30 = vshll.u32 %v4885_v43, 16  ;;  %v2125_v37 = vsel %vm6593_vm13, %v4619_v53, %v2124_v47 }
  0xbf   : > { %v805_v19 = vrot.slane %v803_v54, 7  ;;  %v2126_v63 = vrot.slane %v2124_v47, 4  ;;  %v4620_v49 = vrot.slane %v6663_v4, 9  ;;  %v2131_v26 = vrot.slane %v6649_v38, 5 }
  0xc0   : > { %5351 = vmatmul.mubr.bf16.gmra.mrb[24].mxu1 %v6924_v9  ;;  %v813_v20 = vrot.slane %v811_v25, 7  ;;  %v2134_v16 = vrot.slane %v6665_v5, 5  ;;  %v4621_v32 = vrot.slane %v6691_v46, 9  ;;  %v2138_v36 = vrot.slane %v6699_v1, 5 }
  0xc1   : > { %v808_v29 = vor.u32 %v806_v28, %v805_v19  ;;  %v809_v24 = vrot.slane %v805_v19, 4  ;;  %v2128_v4 = vsel %vm6593_vm13, %v2126_v63, %v2127_v21  ;;  %v2132_v38 = vsel %vm6593_vm13, %v4620_v49, %v2131_v26 }
  0xc2   : > { %v6934_v45 = vld [vmem:[#allocation2 + $0xa8] sm:$0xf]  ;;  %v816_v5 = vor.u32 %v814_v30, %v813_v20  ;;  %v818_v53 = vrot.slane %v813_v20, 4  ;;  %v6944_v1 = vcombine.low %v2125_v37, %v2128_v4  ;;  %v2133_v18 = vrot.slane %v2131_v26, 4 }
  0xc3   : > { %v1412_v27 = vshrl.u32 %v6934_v45, 16  ;;  %v1415_v42 = vshll.u32 %v6934_v45, 16  ;;  %v989_v46 = vsel %vm6312_vm10, %v808_v29, %v988_v44  ;;  %v2139_v51 = vsel %vm6593_vm13, %v4621_v32, %v2138_v36 }
  0xc4   : > { %v6948_v23 = vld [vmem:[#allocation2 + $0xb0] sm:$0x1]  ;;  %v817_v57 = vsel %vm6306_vm9, %v809_v24, %v816_v5  ;;  %990 = vst [vmem:[#allocation2 + $0xb4] sm:$0xf] %v989_v46  ;;  %v993_v43 = vsel %vm6296_vm8, %v818_v53, %v992_v59  ;;  %5578 = vmatprep.mubr.bf16.mxu0 %v6944_v1  ;;  %v2135_v6 = vsel %vm6593_vm13, %v2133_v18, %v2134_v16  ;;  %v2140_v54 = vrot.slane %v2138_v36, 4 }
  0xc5   : > { %v1414_v47 = vrot.slane %v1412_v27, 4  ;;  %v1417_v61 = vrot.slane %v1415_v42, 5  ;;  %v6954_v21 = vld [vmem:[#allocation2 + $0xac] sm:$0xf]  ;;  %v1431_v15 = vshll.u32 %v6948_v23, 16  ;;  %v2141_v28 = vrot.slane %v6704_v3, 5 }
  0xc6   : > { %991 = vst [vmem:[#allocation2 + $0xb8] sm:$0xf] %v817_v57  ;;  %994 = vst [vmem:[#allocation2 + $0xbc] sm:$0x1] %v993_v43  ;;  %v1421_v30 = vshll.u32 %v6954_v21, 16  ;;  %v1425_v37 = vshrl.u32 %v6954_v21, 16  ;;  %v6963_v19 = vcombine.low %v2132_v38, %v2135_v6 }
  0xc7   : > { %v1418_v25 = vor.u32 %v1417_v61, %v1414_v47  ;;  %v2142_v63 = vsel %vm6593_vm13, %v2140_v54, %v2141_v28  ;;  %v4622_v49 = vrot.slane %v6760_v17, 9  ;;  %v2145_v26 = vrot.slane %v6767_v33, 5 }
  0xc8   : > { %v1423_v44 = vrot.slane %v1421_v30, 5  ;;  %v1427_v16 = vrot.slane %v1425_v37, 4  ;;  %5579 = vmatmul.mubr.bf16.gmra.mrb[12].mxu0 %v6963_v19  ;;  %v6970_v3 = vcombine.low %v2139_v51, %v2142_v63  ;;  %v1433_v32 = vrot.slane %v1431_v15, 5 }
  0xc9   : > { %v1419_v20 = vrot.slane %v1418_v25, 4  ;;  %v2146_v36 = vsel %vm6593_vm13, %v4622_v49, %v2145_v26  ;;  %v2147_v29 = vrot.slane %v2145_v26, 4  ;;  %v2148_v24 = vrot.slane %v6769_v39, 5 }
  0xca   : > { %v1428_v59 = vor.u32 %v1427_v16, %v1423_v44  ;;  %5582 = vmatprep.mubr.bf16.mxu0 %v6970_v3  ;;  %v4623_v4 = vrot.slane %v6791_v31, 9  ;;  %v2152_v38 = vrot.slane %v6798_v22, 5  ;;  %v2155_v27 = vrot.slane %v6800_v10, 5 }
  0xcb   : > { %v6979_v42 = vld [vmem:[#allocation2 + $0xb4] sm:$0xf]  ;;  %v2149_v5 = vsel %vm6593_vm13, %v2147_v29, %v2148_v24  ;;  %v4624_v53 = vrot.slane %v6865_v40, 9  ;;  %v2159_v46 = vrot.slane %v6880_v48, 5  ;;  %v2162_v39 = vrot.slane %v6882_v13, 5 }
  0xcc   : > { %v1424_v18 = vsel %vm6263_vm2, %v1419_v20, %v1423_v44  ;;  %v1429_v51 = vrot.slane %v1428_v59, 4  ;;  %v1436_v10 = vshrl.u32 %v6979_v42, 16  ;;  %v6993_v57 = vcombine.low %v2146_v36, %v2149_v5 }
  0xcd   : > { %v6988_v47 = vld [vmem:[#allocation2 + $0xb8] sm:$0xf]  ;;  %v6990_v61 = vld [vmem:[#allocation2 + $0xbc] sm:$0x1]  ;;  %v1439_v43 = vshll.u32 %v6979_v42, 16  ;;  %v2153_v25 = vsel %vm6593_vm13, %v4623_v4, %v2152_v38  ;;  %v2154_v30 = vrot.slane %v2152_v38, 4  ;;  %v2160_v16 = vsel %vm6593_vm13, %v4624_v53, %v2159_v46 }
  0xce   : > { %v1445_v15 = vshll.u32 %v6988_v47, 16  ;;  %v1449_v6 = vshrl.u32 %v6988_v47, 16  ;;  %v1455_v13 = vshll.u32 %v6990_v61, 16  ;;  %v1434_v54 = vsel %vm6263_vm2, %v1429_v51, %v1433_v32  ;;  %v7018_v53 = vld [vmem:[#allocation2] sm:$0xf] }
  0xcf   : > { %v1438_v28 = vrot.slane %v1436_v10, 4  ;;  %v7003_v37 = vcombine.low %v1424_v18, %v1434_v54  ;;  %v1441_v63 = vrot.slane %v1439_v43, 5  ;;  %v2156_v44 = vsel %vm6593_vm13, %v2154_v30, %v2155_v27 }
  0xd0   : > { %v1447_v49 = vrot.slane %v1445_v15, 5  ;;  %v1451_v26 = vrot.slane %v1449_v6, 4  ;;  %v1457_v20 = vrot.slane %v1455_v13, 5  ;;  %5583 = vmatmul.mubr.bf16.gmra.mrb[16].mxu0 %v6993_v57  ;;  %v2161_v32 = vrot.slane %v2159_v46, 4  ;;  %v7020_v46 = vld [vmem:[#allocation2 + $0x4] sm:$0xf] }
  0xd1   : > { %5354 = vmatprep.mubr.bf16.mxu1 %v7003_v37  ;;  %v1442_v36 = vor.u32 %v1441_v63, %v1438_v28  ;;  %v7011_v24 = vcombine.low %v2153_v25, %v2156_v44  ;;  %v4625_v59 = vrot.slane %v6891_v34, 9  ;;  %v2166_v38 = vrot.slane %v6893_v58, 5  ;;  %v5078_v25 = vld [vmem:[%s6237_s22 + $0x78] sm:$0xff]  }
  0xd2   : > { %v1452_v29 = vor.u32 %v1451_v26, %v1447_v49  ;;  %v2163_v4 = vsel %vm6593_vm13, %v2161_v32, %v2162_v39  ;;  %v2169_v5 = vrot.slane %v6895_v56, 5  ;;  %v4588_v51 = vcombine.low %v7018_v53, %v7020_v46 }
  0xd3   : > { %v1443_v27 = vrot.slane %v1442_v36, 4  ;;  %5586 = vmatprep.mubr.bf16.mxu0 %v7011_v24  ;;  %v2173_v10 = vrot.slane %v6954_v21, 5  ;;  %v7026_v43 = vcombine.low %v2160_v16, %v2163_v4  ;;  %v2167_v39 = vsel %vm6593_vm13, %v4625_v59, %v2166_v38 }
  0xd4   : > { %v1453_v18 = vrot.slane %v1452_v29, 4  ;;  %v2168_v56 = vrot.slane %v2166_v38, 4  ;;  %v4626_v15 = vrot.slane %v6934_v45, 9  ;;  %v2176_v28 = vrot.slane %v6948_v23, 5 }
  0xd5   : > { %v1448_v6 = vsel %vm6263_vm2, %v1443_v27, %v1447_v49  ;;  %v2175_v54 = vrot.slane %v2173_v10, 4  ;;  %v4627_v26 = vrot.slane %v6979_v42, 9  ;;  %v2180_v16 = vrot.slane %v6988_v47, 5 }
  0xd6   : > { %v1458_v13 = vsel %vm6263_vm2, %v1453_v18, %v1457_v20  ;;  %v2170_v63 = vsel %vm6593_vm13, %v2168_v56, %v2169_v5  ;;  %v2183_v49 = vrot.slane %v6990_v61, 5  ;;  %v4982_v20 = vunpack.c.l.bf16 %v5078_v25 }
  0xd7   : > { %v7037_v30 = vcombine.low %v1448_v6, %v1458_v13  ;;  %v7042_v44 = vcombine.low %v2167_v39, %v2170_v63  ;;  %v4983_v23 = vunpack.c.h.bf16 %v5078_v25  ;;  %v2174_v32 = vsel %vm6593_vm13, %v4626_v15, %v2173_v10  ;;  %v6069_v13 = vld [vmem:[%s7435_s3 + $0x90] sm:$0xff]  }
  0xd8   : > { %5587 = vmatmul.mubr.bf16.gmra.mrb[20].mxu0 %v7026_v43  ;;  %v2177_v36 = vsel %vm6593_vm13, %v2175_v54, %v2176_v28  ;;  %v2181_v29 = vsel %vm6593_vm13, %v4627_v26, %v2180_v16  ;;  %v2182_v59 = vrot.slane %v2180_v16, 4  ;;  %v338_v61 = vmul.f32 %v6658_v52, %v4982_v20  ;;  %v6122_v26 = vld [vmem:[#allocation2 + $0x24] sm:$0xf]  ;;  %v6123_v16 = vld [vmem:[#allocation2 + $0x28] sm:$0xf] }
  0xd9   : > { %5355 = vmatmul.mubr.bf16.gmra.mrb[28].mxu1 %v7037_v30  ;;  %5590 = vmatprep.mubr.bf16.mxu0 %v7042_v44  ;;  %v339_v4 = vmul.f32 %v6658_v52, %v4983_v23  ;;  %v7059_v38 = vcombine.low %v6791_v31, %v6798_v22  ;;  %v7063_v5 = vcombine.low %v6865_v40, %v6880_v48  ;;  %v6117_v31 = vld [vmem:[#allocation2 + $0xc] sm:$0xf]  ;;  %v6118_v22 = vld [vmem:[#allocation2 + $0x10] sm:$0xf] }
  0xda   : > { %5374 = vmatprep.mubr.bf16.mxu1 %v4588_v51  ;;  %v2184_v27 = vsel %vm6593_vm13, %v2182_v59, %v2183_v49  ;;  %v7069_v18 = vcombine.low %v6891_v34, %v6893_v58  ;;  %v7073_v51 = vcombine.low %v6934_v45, %v6954_v21  ;;  %v7077_v52 = vcombine.low %v6979_v42, %v6988_v47  ;;  %v6119_v34 = vld [vmem:[#allocation2 + $0x18] sm:$0xf]  ;;  %v6120_v58 = vld [vmem:[#allocation2 + $0x1c] sm:$0xf]  ;;  %v6065_v45 = vld [vmem:[%s7435_s3 + $0x88] sm:$0xff]  }
  0xdb   : > { %v7079_v10 = vcombine.low %v6117_v31, %v6118_v22  ;;  %v7081_v40 = vcombine.low %v2174_v32, %v2177_v36  ;;  %v377_v48 = vadd.f32 %v6684_v62, %v338_v61  ;;  %v378_v39 = vadd.f32 %v6684_v62, %v339_v4  ;;  %v6121_v62 = vld [vmem:[%s7435_s3 + $0x80] sm:$0xff]   ;;  %v6124_v32 = vld [vmem:[#allocation2 + $0x30] sm:$0xf]  ;;  %v6125_v36 = vld [vmem:[#allocation2 + $0x34] sm:$0xf] }
  0xdc   : > { %v7085_v56 = vcombine.low %v6119_v34, %v6120_v58  ;;  %v7090_v21 = vcombine.low %v2181_v29, %v2184_v27  ;;  %v7102_v49 = vcombine.low %v6122_v26, %v6123_v16  ;;  %v7104_v29 = vcombine.low %v6124_v32, %v6125_v36  ;;  %v995_v59 = vld [vmem:[#allocation2 + $0xc0] sm:$0xf]  ;;  %v999_v61 = vld [vmem:[#allocation2 + $0xc8] sm:$0x1]  ;;  %v6073_v4 = vld [vmem:[%s7435_s3 + $0x98] sm:$0xff]  }
  0xdd   : > { %v409_v42 = vmax.f32 %v377_v48, 0.0  ;;  %v410_v47 = vmax.f32 %v378_v39, 0.0  ;;  %v6085_v26 = vld [vmem:[%s7435_s3 + $0xb0] sm:$0xff]  }
  0xde   : > { %v6130_v36 = vld [vmem:[#allocation2 + $0x54] sm:$0xf] }
  0xdf   : > { %v4886_v15 = vpack.c.bf16 %v409_v42, %v409_v42  ;;  %v4887_v6 = vpack.c.bf16 %v410_v47, %v410_v47  ;;  %v6126_v42 = vld [vmem:[#allocation2 + $0x3c] sm:$0xf] }
  0xe0   : > { %5591 = vmatmul.mubr.bf16.gmra.mrb[24].mxu0 %v7081_v40  ;;  %v7120_v47 = vcombine.low %v6126_v42, %v6127_v7  ;;  %v6133_v42 = vld [vmem:[#allocation2 + $0x60] sm:$0xf] }
  0xe1   : > { %5375 = vmatmul.mubr.bf16.vlgmr.msra.gmra.mrb[0].mxu1 %v7079_v10  ;;  %5594 = vmatprep.mubr.bf16.mxu0 %v7090_v21  ;;  %v820_v54 = vshrl.u32 %v4886_v15, 16  ;;  %v823_v28 = vshll.u32 %v4886_v15, 16  ;;  %v828_v25 = vshrl.u32 %v4887_v6, 16  ;;  %v831_v63 = vshll.u32 %v4887_v6, 16  ;;  %v6129_v15 = vld [vmem:[#allocation2 + $0x4c] sm:$0xf] }
  0xe2   : > { %5407 = vmatpush3.bf16.msra.mxu1 %v6121_v62  ;;  %5378 = vmatprep.mubr.bf16.mxu1 %v7085_v56  ;;  %v7122_v6 = vcombine.low %v6128_v12, %v6129_v15 }
  0xe3   : > { %5408 = vmatprep.subr.bf16.mxu1 %v6065_v45  ;;  %v822_v20 = vrot.slane %v820_v54, 7  ;;  %v830_v23 = vrot.slane %v828_v25, 7 }
  0xe5   : > { %v825_v27 = vor.u32 %v823_v28, %v822_v20  ;;  %v826_v31 = vrot.slane %v822_v20, 4  ;;  %v833_v22 = vor.u32 %v831_v63, %v830_v23  ;;  %v835_v48 = vrot.slane %v830_v23, 4 }
  0xe6   : > { %5409 = vmatpush3.bf16.msra.mxu1 %v6065_v45  ;;  %v6077_v45 = vld [vmem:[%s7435_s3 + $0xa0] sm:$0xff]  }
  0xe7   : > { %5410 = vmatprep.subr.bf16.mxu1 %v6069_v13  ;;  %v834_v39 = vsel %vm6306_vm9, %v826_v31, %v833_v22  ;;  %v996_v34 = vsel %vm6312_vm10, %v825_v27, %v995_v59  ;;  %v1000_v58 = vsel %vm6296_vm8, %v835_v48, %v999_v61  ;;  %v6131_v59 = vld [vmem:[#allocation2 + $0x58] sm:$0xf] }
  0xe8   : > { %997 = vst [vmem:[#allocation2 + $0xc0] sm:$0xf] %v996_v34  ;;  %998 = vst [vmem:[#allocation2 + $0xc4] sm:$0xf] %v834_v39  ;;  %v7142_v61 = vcombine.low %v6130_v36, %v6131_v59  ;;  %v6135_v59 = vld [vmem:[#allocation2 + $0x70] sm:$0xf] }
  0xe9   : > { %5379 = vmatmul.mubr.bf16.gmra.mrb[4].mxu1 %v7102_v49  ;;  %1001 = vst [vmem:[#allocation2 + $0xc8] sm:$0x1] %v1000_v58 }
  0xea   : > { %5382 = vmatprep.mubr.bf16.mxu1 %v7104_v29  ;;  %5411 = vmatpush3.bf16.msra.mxu1 %v6069_v13 }
  0xeb   : > { %5412 = vmatprep.subr.bf16.mxu1 %v6073_v4 }
  0xee   : > { %5413 = vmatpush3.bf16.msra.mxu1 %v6073_v4 }
  0xef   : > { %5414 = vmatprep.subr.bf16.mxu1 %v6077_v45  ;;  %v7128_v62 = vld [vmem:[#allocation2 + $0xc0] sm:$0xf]  ;;  %v7130_v13 = vld [vmem:[#allocation2 + $0xc4] sm:$0xf] }
  0xf0   : > { %v1052_v54 = vld [vmem:[#allocation2 + $0xc8] sm:$0x1]  ;;  %v4718_v28 = vrot.slane %v7128_v62, 9  ;;  %v3060_v25 = vrot.slane %v7130_v13, 5  ;;  %v2772_v16 = vshrl.u32 %v7128_v62, 16  ;;  %v2775_v20 = vshll.u32 %v7128_v62, 16 }
  0xf1   : > { %5383 = vmatmul.mubr.bf16.gmra.mrb[8].mxu1 %v7120_v47  ;;  %v3063_v63 = vrot.slane %v1052_v54, 5  ;;  %v2781_v23 = vshll.u32 %v7130_v13, 16  ;;  %v2785_v32 = vshrl.u32 %v7130_v13, 16  ;;  %v2791_v31 = vshll.u32 %v1052_v54, 16  ;;  %v6089_v54 = vld [vmem:[%s7435_s3 + $0xb8] sm:$0xff]  }
  0xf2   : > { %5386 = vmatprep.mubr.bf16.mxu1 %v7122_v6  ;;  %5415 = vmatpush3.bf16.msra.mxu1 %v6077_v45  ;;  %v3061_v4 = vsel %vm6593_vm13, %v4718_v28, %v3060_v25  ;;  %v3062_v27 = vrot.slane %v3060_v25, 4  ;;  %v2774_v22 = vrot.slane %v2772_v16, 4  ;;  %v2777_v48 = vrot.slane %v2775_v20, 5  ;;  %v6132_v45 = vld [vmem:[#allocation2 + $0x64] sm:$0xf] }
  0xf3   : > { %5416 = vmatprep.subr.bf16.mxu1 %v6081_v2  ;;  %v2783_v39 = vrot.slane %v2781_v23, 5  ;;  %v2787_v34 = vrot.slane %v2785_v32, 4  ;;  %v7148_v7 = vcombine.low %v6133_v42, %v6132_v45  ;;  %v2793_v28 = vrot.slane %v2791_v31, 5  ;;  %v6091_v20 = vld [vmem:[%s7435_s3 + $0xc0] sm:$0xff]   ;;  %v6134_v32 = vld [vmem:[#allocation2 + $0x6c] sm:$0xf] }
  0xf4   : > { %v3064_v58 = vsel %vm6593_vm13, %v3062_v27, %v3063_v63  ;;  %v2778_v15 = vor.u32 %v2777_v48, %v2774_v22  ;;  %v6082_v27 = vld [vmem:[%s7435_s3 + $0x1c8] sm:$0xff]   ;;  %v6092_v31 = vld [vmem:[%s7435_s3 + $0x1e0] sm:$0xff]   ;;  %v6096_v45 = vld [vmem:[%s7435_s3 + $0x1f0] sm:$0xff]  }
  0xf5   : > { %v7150_v12 = vcombine.low %v3061_v4, %v3064_v58  ;;  %v2788_v36 = vor.u32 %v2787_v34, %v2783_v39  ;;  %v7168_v4 = vcombine.low %v6134_v32, %v6135_v59  ;;  %v6136_v22 = vld [vmem:[#allocation2 + $0x8] sm:$0x1]  ;;  %v7253_v32 = vld [vmem:[#allocation2 + $0xd0] sm:$0xf]  ;;  %v6107_v59 = vld [vmem:[%s7435_s3 + $0xf8] sm:$0xff]  }
  0xf6   : > { %5417 = vmatpush3.bf16.msra.mxu1 %v6081_v2  ;;  %v2779_v25 = vrot.slane %v2778_v15, 4  ;;  %v2078_v48 = vrot.slane %v6136_v22, 5  ;;  %v6094_v58 = vld [vmem:[%s7435_s3 + $0x1e8] sm:$0xff]   ;;  %v6099_v15 = vld [vmem:[%s7435_s3 + $0x1f8] sm:$0xff]   ;;  %v6106_v22 = vld [vmem:[%s7435_s3 + $0x210] sm:$0xff]  }
  0xf7   : > { %5418 = vmatprep.subr.bf16.mxu1 %v6085_v26  ;;  %5595 = vmatmul.mubr.bf16.gmra.mrb[28].mxu0 %v7150_v12  ;;  %v2789_v63 = vrot.slane %v2788_v36, 4  ;;  %v6102_v36 = vld [vmem:[%s7435_s3 + $0x200] sm:$0xff]  }
  0xf8   : > { %5614 = vmatprep.mubr.bf16.mxu0 %v7085_v56  ;;  %v2784_v2 = vsel %vm6263_vm2, %v2779_v25, %v2783_v39  ;;  %v4612_v39 = vrot.slane %v7018_v53, 9  ;;  %v6097_v25 = vld [vmem:[%s7435_s3 + $0xd8] sm:$0xff]  }
  0xf9   : > { %5387 = vmatmul.mubr.bf16.gmra.mrb[12].mxu1 %v7142_v61  ;;  %v2794_v16 = vsel %vm6263_vm2, %v2789_v63, %v2793_v28  ;;  %v6093_v28 = vld [vmem:[%s7435_s3 + $0xc8] sm:$0xff]   ;;  %v7242_v63 = vcombine.low %v7128_v62, %v7130_v13  ;;  %v6105_v62 = vld [vmem:[%s7435_s3 + $0xf0] sm:$0xff]  }
  0xfa   : > { %5390 = vmatprep.mubr.bf16.mxu1 %v7148_v7  ;;  %5419 = vmatpush3.bf16.msra.mxu1 %v6085_v26  ;;  %v7166_v23 = vcombine.low %v2784_v2, %v2794_v16  ;;  %v7172_v26 = vcombine.low %v6760_v17, %v6767_v33  ;;  %v6086_v17 = vld [vmem:[%s7435_s3 + $0x1d0] sm:$0xff]   ;;  %v6090_v33 = vld [vmem:[%s7435_s3 + $0x1d8] sm:$0xff]   ;;  %v6103_v2 = vld [vmem:[%s7435_s3 + $0xe8] sm:$0xff]  }
  0xfb   : > { %5420 = vmatprep.subr.bf16.mxu1 %v6089_v54  ;;  %v7477_v16 = vld [vmem:[#allocation13_spill] sm:$0xff] }
  0xfe   : > { %5421 = vmatpush3.bf16.msra.mxu1 %v6089_v54  ;;  %v6095_v54 = vld [vmem:[%s7435_s3 + $0xd0] sm:$0xff]  }
  0xff   : > { %5454 = vmatprep.subr.bf16.mxu1 %v6091_v20  ;;  %5615 = vmatmul.mubr.bf16.vlgmr.msra.gmra.mrb[0].mxu0 %v7102_v49 }
 0x100   : > { %5647 = vmatpush3.bf16.msra.mxu0 %v6863_v0  ;;  %5618 = vmatprep.mubr.bf16.mxu0 %v7104_v29  ;;  %v2075_v0 = vrot.slane %v7020_v46, 5 }
 0x101   : > { %5391 = vmatmul.mubr.bf16.gmra.mrb[16].mxu1 %v7168_v4  ;;  %5648 = vmatprep.subr.bf16.mxu0 %v6082_v27 }
 0x102   : > { %5394 = vmatprep.mubr.bf16.mxu1 %v7172_v26  ;;  %v2077_v34 = vrot.slane %v2075_v0, 4  ;;  %v2076_v46 = vsel %vm6593_vm13, %v4612_v39, %v2075_v0  ;;  %v7479_v0 = vld [vmem:[#allocation4_spill] sm:$0xff]  ;;  %v7481_v39 = vld [vmem:[#allocation6_spill] sm:$0xff] }
 0x104   : > { %5649 = vmatpush3.bf16.msra.mxu0 %v6082_v27  ;;  %v2079_v53 = vsel %vm6593_vm13, %v2077_v34, %v2078_v48  ;;  %v7478_v27 = vld [vmem:[#allocation3_spill] sm:$0xff] }
 0x105   : > { %5650 = vmatprep.subr.bf16.mxu0 %v6086_v17  ;;  %v4644_v42 = vcombine.low %v2076_v46, %v2079_v53  ;;  %v6108_v48 = vld [vmem:[%s7435_s3 + $0x218] sm:$0xff]   ;;  %v6110_v46 = vld [vmem:[%s7435_s3 + $0x228] sm:$0xff]   ;;  %v7483_v53 = vld [vmem:[#allocation8_spill] sm:$0xff] }
 0x106   : > { %v7482_v34 = vld [vmem:[#allocation7_spill] sm:$0xff] }
 0x107   : > { %5619 = vmatmul.mubr.bf16.gmra.mrb[4].mxu0 %v7120_v47 }
 0x108   : > { %5622 = vmatprep.mubr.bf16.mxu0 %v7122_v6  ;;  %5651 = vmatpush3.bf16.msra.mxu0 %v6086_v17  ;;  %v6104_v17 = vld [vmem:[%s7435_s3 + $0x208] sm:$0xff]  }
 0x109   : > { %5395 = vmatmul.mubr.bf16.gmra.mrb[20].mxu1 %v7059_v38  ;;  %5652 = vmatprep.subr.bf16.mxu0 %v6090_v33 }
 0x10a   : > { %5398 = vmatprep.mubr.bf16.mxu1 %v7063_v5 }
 0x10c   : > { %5653 = vmatpush3.bf16.msra.mxu0 %v6090_v33  ;;  %v6137_v33 = vld [vmem:[%s7435_s3 + $0x100] sm:$0xff]  }
 0x10d   : > { %5654 = vmatprep.subr.bf16.mxu0 %v6092_v31 }
 0x10f   : > { %5623 = vmatmul.mubr.bf16.gmra.mrb[8].mxu0 %v7142_v61 }
 0x110   : > { %5626 = vmatprep.mubr.bf16.mxu0 %v7148_v7  ;;  %5655 = vmatpush3.bf16.msra.mxu0 %v6092_v31  ;;  %v7480_v31 = vld [vmem:[#allocation5_spill] sm:$0xff] }
 0x111   : > { %5399 = vmatmul.mubr.bf16.gmra.mrb[24].mxu1 %v7069_v18  ;;  %5656 = vmatprep.subr.bf16.mxu0 %v6094_v58 }
 0x112   : > { %5402 = vmatprep.mubr.bf16.mxu1 %v7073_v51 }
 0x114   : > { %5657 = vmatpush3.bf16.msra.mxu0 %v6094_v58  ;;  %v6109_v58 = vld [vmem:[%s7435_s3 + $0x220] sm:$0xff]  }
 0x115   : > { %5658 = vmatprep.subr.bf16.mxu0 %v6096_v45 }
 0x117   : > { %5627 = vmatmul.mubr.bf16.gmra.mrb[12].mxu0 %v7168_v4 }
 0x118   : > { %5630 = vmatprep.mubr.bf16.mxu0 %v7172_v26  ;;  %5659 = vmatpush3.bf16.msra.mxu0 %v6096_v45  ;;  %v7484_v45 = vld [vmem:[#allocation9_spill] sm:$0xff] }
 0x119   : > { %5403 = vmatmul.mubr.bf16.gmra.mrb[28].mxu1 %v7077_v52  ;;  %5660 = vmatprep.subr.bf16.mxu0 %v6099_v15 }
 0x11a   : > { %5422 = vmatprep.mubr.bf16.mxu1 %v4644_v42  ;;  %v6111_v42 = vld [vmem:[%s7435_s3 + $0x230] sm:$0xff]  }
 0x11c   : > { %5661 = vmatpush3.bf16.msra.mxu0 %v6099_v15  ;;  %v6112_v15 = vld [vmem:[%s7435_s3 + $0x238] sm:$0xff]  }
 0x11d   : > { %5694 = vmatprep.subr.bf16.mxu0 %v6102_v36 }
 0x11f   : > { %5631 = vmatmul.mubr.bf16.gmra.mrb[16].mxu0 %v7059_v38 }
 0x120   : > { %5634 = vmatprep.mubr.bf16.mxu0 %v7063_v5 }
 0x121   : > { %5423 = vmatmul.mubr.bf16.vlgmr.msra.gmra.mrb[0].mxu1 %v6636_v11  ;;  %v6101_v11 = vld [vmem:[%s7435_s3 + $0xe0] sm:$0xff]  }
 0x122   : > { %5455 = vmatpush3.bf16.msra.mxu1 %v6091_v20  ;;  %5426 = vmatprep.mubr.bf16.mxu1 %v6678_v8  ;;  %v7251_v20 = vld [vmem:[#allocation2 + $0xcc] sm:$0xf] }
 0x123   : > { %5456 = vmatprep.subr.bf16.mxu1 %v6093_v28  ;;  %v4760_v13 = vcombine.low %v7251_v20, %v7253_v32 }
 0x126   : > { %5457 = vmatpush3.bf16.msra.mxu1 %v6093_v28  ;;  %v7486_v28 = vld [vmem:[#allocation11_spill] sm:$0xff] }
 0x127   : > { %5458 = vmatprep.subr.bf16.mxu1 %v6095_v54  ;;  %5635 = vmatmul.mubr.bf16.gmra.mrb[20].mxu0 %v7069_v18 }
 0x128   : > { %5638 = vmatprep.mubr.bf16.mxu0 %v7073_v51 }
 0x129   : > { %5427 = vmatmul.mubr.bf16.gmra.mrb[4].mxu1 %v6746_v55 }
 0x12a   : > { %5430 = vmatprep.mubr.bf16.mxu1 %v6773_v50  ;;  %5459 = vmatpush3.bf16.msra.mxu1 %v6095_v54  ;;  %v7487_v54 = vld [vmem:[#allocation12_spill] sm:$0xff] }
 0x12b   : > { %5460 = vmatprep.subr.bf16.mxu1 %v6097_v25 }
 0x12e   : > { %5461 = vmatpush3.bf16.msra.mxu1 %v6097_v25  ;;  %v3592_v25 = vshrl.u32 %v7251_v20, 16 }
 0x12f   : > { %5462 = vmatprep.subr.bf16.mxu1 %v6101_v11  ;;  %5639 = vmatmul.mubr.bf16.gmra.mrb[24].mxu0 %v7077_v52 }
 0x130   : > { %5642 = vmatprep.mubr.bf16.mxu0 %v7242_v63 }
 0x131   : > { %5431 = vmatmul.mubr.bf16.gmra.mrb[8].mxu1 %v6845_v14 }
 0x132   : > { %5434 = vmatprep.mubr.bf16.mxu1 %v7477_v16  ;;  %5463 = vmatpush3.bf16.msra.mxu1 %v6101_v11  ;;  %v3595_v11 = vshll.u32 %v7251_v20, 16 }
 0x133   : > { %5464 = vmatprep.subr.bf16.mxu1 %v6103_v2 }
 0x136   : > { %5465 = vmatpush3.bf16.msra.mxu1 %v6103_v2  ;;  %v3605_v2 = vshrl.u32 %v7253_v32, 16 }
 0x137   : > { %5466 = vmatprep.subr.bf16.mxu1 %v6105_v62  ;;  %5643 = vmatmul.mubr.bf16.gmra.mrb[28].mxu0 %v4760_v13  ;;  %v3597_v13 = vrot.slane %v3595_v11, 5 }
 0x138   : > { %5662 = vmatprep.mubr.bf16.mxu0 %v7478_v27  ;;  %v3607_v27 = vrot.slane %v3605_v2, 4 }
 0x139   : > { %5435 = vmatmul.mubr.bf16.gmra.mrb[12].mxu1 %v6944_v1 }
 0x13a   : > { %5438 = vmatprep.mubr.bf16.mxu1 %v6963_v19  ;;  %5467 = vmatpush3.bf16.msra.mxu1 %v6105_v62  ;;  %v6138_v62 = vld [vmem:[%s7435_s3 + $0x108] sm:$0xff]  }
 0x13b   : > { %5468 = vmatprep.subr.bf16.mxu1 %v6107_v59 }
 0x13e   : > { %5469 = vmatpush3.bf16.msra.mxu1 %v6107_v59 }
 0x13f   : > { %5742 = vmatprep.subr.bf16.mxu1 %v6137_v33  ;;  %5663 = vmatmul.mubr.bf16.vlgmr.msra.gmra.mrb[0].mxu0 %v7479_v0 }
 0x140   : > { %5695 = vmatpush3.bf16.msra.mxu0 %v6102_v36  ;;  %5666 = vmatprep.mubr.bf16.mxu0 %v7480_v31  ;;  %v7485_v36 = vld [vmem:[#allocation10_spill] sm:$0xff] }
 0x141   : > { %5439 = vmatmul.mubr.bf16.gmra.mrb[16].mxu1 %v6970_v3  ;;  %5696 = vmatprep.subr.bf16.mxu0 %v6104_v17 }
 0x142   : > { %5442 = vmatprep.mubr.bf16.mxu1 %v6993_v57 }
 0x144   : > { %5697 = vmatpush3.bf16.msra.mxu0 %v6104_v17  ;;  %v6139_v17 = vld [vmem:[%s7435_s3 + $0x110] sm:$0xff]  }
 0x145   : > { %5698 = vmatprep.subr.bf16.mxu0 %v6106_v22 }
 0x147   : > { %5667 = vmatmul.mubr.bf16.gmra.mrb[4].mxu0 %v7481_v39 }
 0x148   : > { %5670 = vmatprep.mubr.bf16.mxu0 %v7482_v34  ;;  %5699 = vmatpush3.bf16.msra.mxu0 %v6106_v22  ;;  %v6140_v22 = vld [vmem:[%s7435_s3 + $0x118] sm:$0xff]  }
 0x149   : > { %5443 = vmatmul.mubr.bf16.gmra.mrb[20].mxu1 %v7011_v24  ;;  %5700 = vmatprep.subr.bf16.mxu0 %v6108_v48 }
 0x14a   : > { %5446 = vmatprep.mubr.bf16.mxu1 %v7026_v43 }
 0x14c   : > { %5701 = vmatpush3.bf16.msra.mxu0 %v6108_v48 }
 0x14d   : > { %5702 = vmatprep.subr.bf16.mxu0 %v6109_v58 }
 0x14f   : > { %5671 = vmatmul.mubr.bf16.gmra.mrb[8].mxu0 %v7483_v53 }
 0x150   : > { %5674 = vmatprep.mubr.bf16.mxu0 %v7484_v45  ;;  %5703 = vmatpush3.bf16.msra.mxu0 %v6109_v58 }
 0x151   : > { %5447 = vmatmul.mubr.bf16.gmra.mrb[24].mxu1 %v7042_v44  ;;  %5704 = vmatprep.subr.bf16.mxu0 %v6110_v46 }
 0x152   : > { %5450 = vmatprep.mubr.bf16.mxu1 %v7081_v40 }
 0x154   : > { %5705 = vmatpush3.bf16.msra.mxu0 %v6110_v46  ;;  %v6142_v46 = vld [vmem:[%s7435_s3 + $0x128] sm:$0xff]  }
 0x155   : > { %5706 = vmatprep.subr.bf16.mxu0 %v6111_v42 }
 0x157   : > { %5675 = vmatmul.mubr.bf16.gmra.mrb[12].mxu0 %v7485_v36 }
 0x158   : > { %5678 = vmatprep.mubr.bf16.mxu0 %v7486_v28  ;;  %5707 = vmatpush3.bf16.msra.mxu0 %v6111_v42 }
 0x159   : > { %5451 = vmatmul.mubr.bf16.gmra.mrb[28].mxu1 %v7090_v21  ;;  %5708 = vmatprep.subr.bf16.mxu0 %v6112_v15 }
 0x15a   : > { %5470 = vmatprep.mubr.bf16.mxu1 %v7079_v10  ;;  %v3601_v10 = vshll.u32 %v7253_v32, 16 }
 0x15c   : > { %5709 = vmatpush3.bf16.msra.mxu0 %v6112_v15  ;;  %v3603_v59 = vrot.slane %v3601_v10, 5 }
 0x15e   : > { %v3608_v0 = vor.u32 %v3607_v27, %v3603_v59 }
 0x15f   : > { %5679 = vmatmul.mubr.bf16.gmra.mrb[16].mxu0 %v7487_v54 }
 0x160   : > { %5682 = vmatprep.mubr.bf16.mxu0 %v6908_v41  ;;  %v3609_v39 = vrot.slane %v3608_v0, 4 }
 0x161   : > { %5471 = vmatmul.mubr.bf16.vlgmr.msra.gmra.mrb[0].mxu1 %v7085_v56  ;;  %v3594_v56 = vrot.slane %v3592_v25, 4 }
 0x162   : > { %5750 = vmatpush3.bf16.msra.mxu1 %v6137_v33  ;;  %5474 = vmatprep.mubr.bf16.mxu1 %v7102_v49  ;;  %v7320_v49 = vld [vmem:[#allocation2 + $0xd4] sm:$0x1] }
 0x163   : > { %5743 = vmatprep.subr.bf16.mxu1 %v6138_v62  ;;  %v3598_v33 = vor.u32 %v3597_v13, %v3594_v56  ;;  %v3611_v31 = vshll.u32 %v7320_v49, 16 }
 0x165   : > { %v3599_v48 = vrot.slane %v3598_v33, 4  ;;  %v3613_v34 = vrot.slane %v3611_v31, 5 }
 0x166   : > { %5751 = vmatpush3.bf16.msra.mxu1 %v6138_v62 }
 0x167   : > { %5744 = vmatprep.subr.bf16.mxu1 %v6139_v17  ;;  %5683 = vmatmul.mubr.bf16.gmra.mrb[20].mxu0 %v6924_v9  ;;  %v3614_v58 = vsel %vm6263_vm2, %v3609_v39, %v3613_v34 }
 0x168   : > { %5686 = vmatprep.mubr.bf16.mxu0 %v7003_v37 }
 0x169   : > { %5475 = vmatmul.mubr.bf16.gmra.mrb[4].mxu1 %v7104_v29  ;;  %v6141_v29 = vld [vmem:[%s7435_s3 + $0x120] sm:$0xff]  }
 0x16a   : > { %5478 = vmatprep.mubr.bf16.mxu1 %v7120_v47  ;;  %5752 = vmatpush3.bf16.msra.mxu1 %v6139_v17  ;;  %v3604_v47 = vsel %vm6263_vm2, %v3599_v48, %v3603_v59 }
 0x16b   : > { %5745 = vmatprep.subr.bf16.mxu1 %v6140_v22  ;;  %v4785_v53 = vcombine.low %v3604_v47, %v3614_v58 }
 0x16e   : > { %5753 = vmatpush3.bf16.msra.mxu1 %v6140_v22 }
 0x16f   : > { %5746 = vmatprep.subr.bf16.mxu1 %v6141_v29  ;;  %5687 = vmatmul.mubr.bf16.gmra.mrb[24].mxu0 %v7037_v30 }
 0x170   : > { %5690 = vmatprep.mubr.bf16.mxu0 %v7166_v23 }
 0x171   : > { %5479 = vmatmul.mubr.bf16.gmra.mrb[8].mxu1 %v7122_v6  ;;  %v6143_v6 = vld [vmem:[%s7435_s3 + $0x130] sm:$0xff]  }
 0x172   : > { %5482 = vmatprep.mubr.bf16.mxu1 %v7142_v61  ;;  %5754 = vmatpush3.bf16.msra.mxu1 %v6141_v29 }
 0x173   : > { %5747 = vmatprep.subr.bf16.mxu1 %v6142_v46 }
 0x176   : > { %5755 = vmatpush3.bf16.msra.mxu1 %v6142_v46 }
 0x177   : > { %5748 = vmatprep.subr.bf16.mxu1 %v6143_v6  ;;  %5691 = vmatmul.mubr.bf16.gmra.mrb[28].mxu0 %v4785_v53 }
 0x178   : > { %5710 = vmatprep.mubr.bf16.mxu0 %v6678_v8  ;;  %v3880_v8 = vrot.slane %v7253_v32, 5 }
 0x179   : > { %5483 = vmatmul.mubr.bf16.gmra.mrb[12].mxu1 %v7148_v7 }
 0x17a   : > { %5486 = vmatprep.mubr.bf16.mxu1 %v7168_v4  ;;  %5756 = vmatpush3.bf16.msra.mxu1 %v6143_v6 }
 0x17b   : > { %5749 = vmatprep.subr.bf16.mxu1 %v6144_v35 }
 0x17e   : > { %5757 = vmatpush3.bf16.msra.mxu1 %v6144_v35 }
 0x17f   : > { %5711 = vmatmul.mubr.bf16.vlgmr.msra.gmra.mrb[0].mxu0 %v6746_v55  ;;  %v4794_v55 = vrot.slane %v7251_v20, 9 }
 0x180   : > { %5714 = vmatprep.mubr.bf16.mxu0 %v6773_v50  ;;  %v3882_v50 = vrot.slane %v3880_v8, 4 }
 0x181   : > { %5487 = vmatmul.mubr.bf16.gmra.mrb[16].mxu1 %v7172_v26 }
 0x182   : > { %5490 = vmatprep.mubr.bf16.mxu1 %v7059_v38 }
 0x187   : > { %5715 = vmatmul.mubr.bf16.gmra.mrb[4].mxu0 %v6845_v14  ;;  %v3883_v14 = vrot.slane %v7320_v49, 5 }
 0x188   : > { %5718 = vmatprep.mubr.bf16.mxu0 %v7477_v16 }
 0x189   : > { %5491 = vmatmul.mubr.bf16.gmra.mrb[20].mxu1 %v7063_v5 }
 0x18a   : > { %5494 = vmatprep.mubr.bf16.mxu1 %v7069_v18 }
 0x18f   : > { %5719 = vmatmul.mubr.bf16.gmra.mrb[8].mxu0 %v6944_v1 }
 0x190   : > { %5722 = vmatprep.mubr.bf16.mxu0 %v6963_v19 }
 0x191   : > { %5495 = vmatmul.mubr.bf16.gmra.mrb[24].mxu1 %v7073_v51 }
 0x192   : > { %5498 = vmatprep.mubr.bf16.mxu1 %v7077_v52 }
 0x197   : > { %5723 = vmatmul.mubr.bf16.gmra.mrb[12].mxu0 %v6970_v3 }
 0x198   : > { %5726 = vmatprep.mubr.bf16.mxu0 %v6993_v57 }
 0x199   : > { %5499 = vmatmul.mubr.bf16.gmra.mrb[28].mxu1 %v7242_v63 }
 0x19a   : > { %5534 = vmatprep.mubr.bf16.mxu1 %v7485_v36 }
 0x19f   : > { %5727 = vmatmul.mubr.bf16.gmra.mrb[16].mxu0 %v7011_v24 }
 0x1a0   : > { %5730 = vmatprep.mubr.bf16.mxu0 %v7026_v43 }
 0x1a1   : > { %5535 = vmatmul.mubr.bf16.vlgmr.msra.gmra.mrb[16].mxu1 %v7486_v28 }
 0x1a2   : > { %5538 = vmatprep.mubr.bf16.mxu1 %v7487_v54 }
 0x1a7   : > { %5731 = vmatmul.mubr.bf16.gmra.mrb[20].mxu0 %v7042_v44 }
 0x1a8   : > { %5734 = vmatprep.mubr.bf16.mxu0 %v7081_v40 }
 0x1a9   : > { %5539 = vmatmul.mubr.bf16.gmra.mrb[20].mxu1 %v6908_v41  ;;  %v3881_v41 = vsel %vm6593_vm13, %v4794_v55, %v3880_v8 }
 0x1aa   : > { %5542 = vmatprep.mubr.bf16.mxu1 %v6924_v9  ;;  %v3884_v9 = vsel %vm6593_vm13, %v3882_v50, %v3883_v14 }
 0x1ab   : > { %v4811_v1 = vcombine.low %v3881_v41, %v3884_v9 }
 0x1af   : > { %5735 = vmatmul.mubr.bf16.gmra.mrb[24].mxu0 %v7090_v21 }
 0x1b0   : > { %5738 = vmatprep.mubr.bf16.mxu0 %v7150_v12 }
 0x1b1   : > { %5543 = vmatmul.mubr.bf16.gmra.mrb[24].mxu1 %v7003_v37 }
 0x1b2   : > { %5546 = vmatprep.mubr.bf16.mxu1 %v7037_v30 }
 0x1b7   : > { %5739 = vmatmul.mubr.bf16.gmra.mrb[28].mxu0 %v4811_v1 }
 0x1b9   : > { %5547 = vmatmul.mubr.bf16.gmra.mrb[28].mxu1 %v7166_v23 }
 0x234   : > { %v5472_v19 = vpop.f32.mrb[0].mxu1 }
 0x235   : > { %v2612_v3 = vpop.f32.mrb[1].mxu1 }
 0x236   : > { %v5473_v57 = vpop.f32.mrb[2].mxu1 }
 0x237   : > { %v2615_v37 = vpop.f32.mrb[3].mxu1 }
 0x23c   : > { %v5476_v24 = vpop.f32.mrb[4].mxu1 }
 0x23d   : > { %v2628_v43 = vpop.f32.mrb[5].mxu1 }
 0x23e   : > { %v5477_v44 = vpop.f32.mrb[6].mxu1 }
 0x23f   : > { %v2631_v30 = vpop.f32.mrb[7].mxu1 }
 0x244   : > { %v5480_v38 = vpop.f32.mrb[8].mxu1 }
 0x245   : > { %v2644_v5 = vpop.f32.mrb[9].mxu1 }
 0x246   : > { %v5481_v18 = vpop.f32.mrb[10].mxu1 }
 0x247   : > { %v2647_v51 = vpop.f32.mrb[11].mxu1 }
 0x24c   : > { %v7389_v52 = vpop.f32.mrb[12].mxu1 }
 0x24d   : > { %v7391_v60 = vpop.f32.mrb[13].mxu1 }
 0x24e   : > { %v7393_v40 = vpop.f32.mrb[14].mxu1 }
 0x24f   : > { %v7395_v21 = vpop.f32.mrb[15].mxu1 }
 0x252   : > { %v5712_v61 = vpop.f32.mrb[0].mxu0 }
 0x253   : > { %v5758_v7 = vadd.f32 %v5712_v61, %v5472_v19  ;;  %v3988_v12 = vpop.f32.mrb[1].mxu0 }
 0x254   : > { %v5759_v23 = vadd.f32 %v3988_v12, %v2612_v3  ;;  %v5713_v4 = vpop.f32.mrb[2].mxu0 }
 0x255   : > { %v5760_v26 = vadd.f32 %v5713_v4, %v5473_v57  ;;  %v3991_v63 = vpop.f32.mrb[3].mxu0  ;;  %v4346_v36 = vmul.f32 %v5758_v7, %v5758_v7 }
 0x256   : > { %v5761_v16 = vadd.f32 %v3991_v63, %v2615_v37  ;;  %v4344_v32 = vmul.f32 %v5759_v23, %v5759_v23 }
 0x257   : > { %v4992_v20 = vpack.c.bf16 %v5760_v26, %v5758_v7  ;;  %v4347_v10 = vmul.f32 %v5760_v26, %v5760_v26 }
 0x258   : > { %v4987_v45 = vpack.c.bf16 %v5761_v16, %v5759_v23  ;;  %v4307_v42 = vadd.f32 %v5761_v16, %v5759_v23  ;;  %v4345_v15 = vmul.f32 %v5761_v16, %v5761_v16 }
 0x259   : > { %5079 = vst [vmem:[%s7402_s21 + $0x8] sm:$0xff] %v4992_v20  }
 0x25a   : > { %4988 = vst [vmem:[%s7402_s21] sm:$0xff] %v4987_v45   ;;  %v4308_v28 = vadd.f32 %v5758_v7, %v4307_v42  ;;  %v4376_v54 = vadd.f32 %v4345_v15, %v4344_v32  ;;  %v5716_v25 = vpop.f32.mrb[4].mxu0 }
 0x25b   : > { %v5762_v11 = vadd.f32 %v5716_v25, %v5476_v24  ;;  %v4004_v2 = vpop.f32.mrb[5].mxu0 }
 0x25c   : > { %v4377_v62 = vadd.f32 %v4376_v54, %v4346_v36  ;;  %v5763_v56 = vadd.f32 %v4004_v2, %v2628_v43  ;;  %v4309_v13 = vadd.f32 %v5760_v26, %v4308_v28  ;;  %v5717_v59 = vpop.f32.mrb[6].mxu0 }
 0x25d   : > { %v5764_v27 = vadd.f32 %v5717_v59, %v5477_v44  ;;  %v4007_v17 = vpop.f32.mrb[7].mxu0  ;;  %v4350_v47 = vmul.f32 %v5762_v11, %v5762_v11 }
 0x25e   : > { %v4310_v49 = vadd.f32 %v5763_v56, %v4309_v13  ;;  %v4348_v33 = vmul.f32 %v5763_v56, %v5763_v56  ;;  %v4378_v0 = vadd.f32 %v4377_v62, %v4347_v10  ;;  %v5765_v31 = vadd.f32 %v4007_v17, %v2631_v30 }
 0x25f   : > { %v5002_v22 = vpack.c.bf16 %v5764_v27, %v5762_v11  ;;  %v4351_v8 = vmul.f32 %v5764_v27, %v5764_v27 }
 0x260   : > { %v4379_v48 = vadd.f32 %v4378_v0, %v4348_v33  ;;  %v4997_v39 = vpack.c.bf16 %v5765_v31, %v5763_v56  ;;  %v4311_v34 = vadd.f32 %v5765_v31, %v4310_v49  ;;  %v4349_v29 = vmul.f32 %v5765_v31, %v5765_v31 }
 0x261   : > { %5081 = vst [vmem:[%s7402_s21 + $0x18] sm:$0xff] %v5002_v22  }
 0x262   : > { %5080 = vst [vmem:[%s7402_s21 + $0x10] sm:$0xff] %v4997_v39   ;;  %v4312_v58 = vadd.f32 %v5762_v11, %v4311_v34  ;;  %v4380_v46 = vadd.f32 %v4379_v48, %v4349_v29  ;;  %v5720_v53 = vpop.f32.mrb[8].mxu0 }
 0x263   : > { %v5766_v6 = vadd.f32 %v5720_v53, %v5480_v38  ;;  %v4020_v35 = vpop.f32.mrb[9].mxu0 }
 0x264   : > { %v4381_v55 = vadd.f32 %v4380_v46, %v4350_v47  ;;  %v5767_v50 = vadd.f32 %v4020_v35, %v2644_v5  ;;  %v4313_v14 = vadd.f32 %v5764_v27, %v4312_v58  ;;  %v5721_v41 = vpop.f32.mrb[10].mxu0 }
 0x265   : > { %v5768_v9 = vadd.f32 %v5721_v41, %v5481_v18  ;;  %v4023_v1 = vpop.f32.mrb[11].mxu0  ;;  %v4354_v38 = vmul.f32 %v5766_v6, %v5766_v6 }
 0x266   : > { %v4314_v19 = vadd.f32 %v5767_v50, %v4313_v14  ;;  %v4352_v3 = vmul.f32 %v5767_v50, %v5767_v50  ;;  %v4382_v57 = vadd.f32 %v4381_v55, %v4351_v8  ;;  %v5769_v37 = vadd.f32 %v4023_v1, %v2647_v51 }
 0x267   : > { %v5012_v24 = vpack.c.bf16 %v5768_v9, %v5766_v6  ;;  %v4355_v18 = vmul.f32 %v5768_v9, %v5768_v9 }
 0x268   : > { %v4383_v43 = vadd.f32 %v4382_v57, %v4352_v3  ;;  %v5007_v44 = vpack.c.bf16 %v5769_v37, %v5767_v50  ;;  %v4315_v30 = vadd.f32 %v5769_v37, %v4314_v19  ;;  %v4353_v61 = vmul.f32 %v5769_v37, %v5769_v37 }
 0x269   : > { %5083 = vst [vmem:[%s7402_s21 + $0x28] sm:$0xff] %v5012_v24  }
 0x26a   : > { %5082 = vst [vmem:[%s7402_s21 + $0x20] sm:$0xff] %v5007_v44   ;;  %v4316_v7 = vadd.f32 %v5766_v6, %v4315_v30  ;;  %v4384_v12 = vadd.f32 %v4383_v43, %v4353_v61  ;;  %v5724_v5 = vpop.f32.mrb[12].mxu0 }
 0x26b   : > { %v5770_v23 = vadd.f32 %v5724_v5, %v7389_v52  ;;  %v4036_v4 = vpop.f32.mrb[13].mxu0 }
 0x26c   : > { %v4385_v26 = vadd.f32 %v4384_v12, %v4354_v38  ;;  %v5771_v63 = vadd.f32 %v4036_v4, %v7391_v60  ;;  %v4317_v51 = vadd.f32 %v5768_v9, %v4316_v7  ;;  %v5725_v16 = vpop.f32.mrb[14].mxu0 }
 0x26d   : > { %v5772_v20 = vadd.f32 %v5725_v16, %v7393_v40  ;;  %v4039_v32 = vpop.f32.mrb[15].mxu0  ;;  %v4358_v2 = vmul.f32 %v5770_v23, %v5770_v23 }
 0x26e   : > { %v4318_v45 = vadd.f32 %v5771_v63, %v4317_v51  ;;  %v4356_v42 = vmul.f32 %v5771_v63, %v5771_v63  ;;  %v4386_v15 = vadd.f32 %v4385_v26, %v4355_v18  ;;  %v5773_v36 = vadd.f32 %v4039_v32, %v7395_v21 }
 0x26f   : > { %v5022_v28 = vpack.c.bf16 %v5772_v20, %v5770_v23  ;;  %v4359_v27 = vmul.f32 %v5772_v20, %v5772_v20 }
 0x270   : > { %v4387_v54 = vadd.f32 %v4386_v15, %v4356_v42  ;;  %v5017_v52 = vpack.c.bf16 %v5773_v36, %v5771_v63  ;;  %v4319_v25 = vadd.f32 %v5773_v36, %v4318_v45  ;;  %v4357_v11 = vmul.f32 %v5773_v36, %v5773_v36 }
 0x271   : > { %5085 = vst [vmem:[%s7402_s21 + $0x38] sm:$0xff] %v5022_v28  }
 0x272   : > { %5084 = vst [vmem:[%s7402_s21 + $0x30] sm:$0xff] %v5017_v52   ;;  %v4320_v60 = vadd.f32 %v5770_v23, %v4319_v25  ;;  %v4388_v10 = vadd.f32 %v4387_v54, %v4357_v11  ;;  %v5728_v56 = vpop.f32.mrb[16].mxu0 }
 0x273   : > { %v4052_v59 = vpop.f32.mrb[17].mxu0 }
 0x274   : > { %v5536_v62 = vpop.f32.mrb[16].mxu1  ;;  %v4389_v17 = vadd.f32 %v4388_v10, %v4358_v2  ;;  %v4321_v33 = vadd.f32 %v5772_v20, %v4320_v60  ;;  %v5729_v0 = vpop.f32.mrb[18].mxu0 }
 0x275   : > { %v2962_v13 = vpop.f32.mrb[17].mxu1  ;;  %v5774_v40 = vadd.f32 %v5728_v56, %v5536_v62  ;;  %v4055_v48 = vpop.f32.mrb[19].mxu0 }
 0x276   : > { %v5537_v49 = vpop.f32.mrb[18].mxu1  ;;  %v5775_v21 = vadd.f32 %v4052_v59, %v2962_v13  ;;  %v4390_v29 = vadd.f32 %v4389_v17, %v4359_v27 }
 0x277   : > { %v2965_v31 = vpop.f32.mrb[19].mxu1  ;;  %v5776_v22 = vadd.f32 %v5729_v0, %v5537_v49  ;;  %v4362_v8 = vmul.f32 %v5774_v40, %v5774_v40 }
 0x278   : > { %v4322_v39 = vadd.f32 %v5775_v21, %v4321_v33  ;;  %v4360_v34 = vmul.f32 %v5775_v21, %v5775_v21  ;;  %v5777_v47 = vadd.f32 %v4055_v48, %v2965_v31 }
 0x279   : > { %v5032_v58 = vpack.c.bf16 %v5776_v22, %v5774_v40  ;;  %v4363_v3 = vmul.f32 %v5776_v22, %v5776_v22 }
 0x27a   : > { %v4391_v46 = vadd.f32 %v4390_v29, %v4360_v34  ;;  %v5027_v53 = vpack.c.bf16 %v5777_v47, %v5775_v21  ;;  %v4323_v6 = vadd.f32 %v5777_v47, %v4322_v39  ;;  %v4361_v35 = vmul.f32 %v5777_v47, %v5777_v47  ;;  %v5732_v41 = vpop.f32.mrb[20].mxu0 }
 0x27b   : > { %5087 = vst [vmem:[%s7402_s21 + $0x48] sm:$0xff] %v5032_v58   ;;  %v4068_v19 = vpop.f32.mrb[21].mxu0 }
 0x27c   : > { %5086 = vst [vmem:[%s7402_s21 + $0x40] sm:$0xff] %v5027_v53   ;;  %v4324_v55 = vadd.f32 %v5774_v40, %v4323_v6  ;;  %v4392_v50 = vadd.f32 %v4391_v46, %v4361_v35  ;;  %v5540_v14 = vpop.f32.mrb[20].mxu1  ;;  %v5733_v44 = vpop.f32.mrb[22].mxu0 }
 0x27d   : > { %v2978_v9 = vpop.f32.mrb[21].mxu1  ;;  %v5778_v1 = vadd.f32 %v5732_v41, %v5540_v14  ;;  %v4071_v38 = vpop.f32.mrb[23].mxu0 }
 0x27e   : > { %v4393_v57 = vadd.f32 %v4392_v50, %v4362_v8  ;;  %v5541_v37 = vpop.f32.mrb[22].mxu1  ;;  %v5779_v24 = vadd.f32 %v4068_v19, %v2978_v9  ;;  %v4325_v43 = vadd.f32 %v5776_v22, %v4324_v55 }
 0x27f   : > { %v2981_v30 = vpop.f32.mrb[23].mxu1  ;;  %v5780_v61 = vadd.f32 %v5733_v44, %v5541_v37  ;;  %v4366_v16 = vmul.f32 %v5778_v1, %v5778_v1 }
 0x280   : > { %v4326_v7 = vadd.f32 %v5779_v24, %v4325_v43  ;;  %v4364_v12 = vmul.f32 %v5779_v24, %v5779_v24  ;;  %v4394_v5 = vadd.f32 %v4393_v57, %v4363_v3  ;;  %v5781_v23 = vadd.f32 %v4071_v38, %v2981_v30 }
 0x281   : > { %v5042_v4 = vpack.c.bf16 %v5780_v61, %v5778_v1  ;;  %v4367_v54 = vmul.f32 %v5780_v61, %v5780_v61 }
 0x282   : > { %v4395_v18 = vadd.f32 %v4394_v5, %v4364_v12  ;;  %v5037_v26 = vpack.c.bf16 %v5781_v23, %v5779_v24  ;;  %v4327_v63 = vadd.f32 %v5781_v23, %v4326_v7  ;;  %v4365_v51 = vmul.f32 %v5781_v23, %v5781_v23  ;;  %v5736_v42 = vpop.f32.mrb[24].mxu0 }
 0x283   : > { %5089 = vst [vmem:[%s7402_s21 + $0x58] sm:$0xff] %v5042_v4   ;;  %v4084_v28 = vpop.f32.mrb[25].mxu0 }
 0x284   : > { %5088 = vst [vmem:[%s7402_s21 + $0x50] sm:$0xff] %v5037_v26   ;;  %v4328_v20 = vadd.f32 %v5778_v1, %v4327_v63  ;;  %v4396_v32 = vadd.f32 %v4395_v18, %v4365_v51  ;;  %v5544_v45 = vpop.f32.mrb[24].mxu1  ;;  %v5737_v60 = vpop.f32.mrb[26].mxu0 }
 0x285   : > { %v2994_v15 = vpop.f32.mrb[25].mxu1  ;;  %v5782_v36 = vadd.f32 %v5736_v42, %v5544_v45  ;;  %v4087_v56 = vpop.f32.mrb[27].mxu0 }
 0x286   : > { %v4397_v52 = vadd.f32 %v4396_v32, %v4366_v16  ;;  %v5545_v25 = vpop.f32.mrb[26].mxu1  ;;  %v5783_v11 = vadd.f32 %v4084_v28, %v2994_v15  ;;  %v4329_v2 = vadd.f32 %v5780_v61, %v4328_v20 }
 0x287   : > { %v2997_v10 = vpop.f32.mrb[27].mxu1  ;;  %v5784_v62 = vadd.f32 %v5737_v60, %v5545_v25  ;;  %v4370_v31 = vmul.f32 %v5782_v36, %v5782_v36 }
 0x288   : > { %v4330_v13 = vadd.f32 %v5783_v11, %v4329_v2  ;;  %v4368_v40 = vmul.f32 %v5783_v11, %v5783_v11  ;;  %v4398_v59 = vadd.f32 %v4397_v52, %v4367_v54  ;;  %v5785_v27 = vadd.f32 %v4087_v56, %v2997_v10 }
 0x289   : > { %v5052_v17 = vpack.c.bf16 %v5784_v62, %v5782_v36  ;;  %v4371_v46 = vmul.f32 %v5784_v62, %v5784_v62 }
 0x28a   : > { %v4399_v49 = vadd.f32 %v4398_v59, %v4368_v40  ;;  %v5047_v21 = vpack.c.bf16 %v5785_v27, %v5783_v11  ;;  %v4331_v33 = vadd.f32 %v5785_v27, %v4330_v13  ;;  %v4369_v0 = vmul.f32 %v5785_v27, %v5785_v27  ;;  %v5740_v34 = vpop.f32.mrb[28].mxu0 }
 0x28b   : > { %5091 = vst [vmem:[%s7402_s21 + $0x68] sm:$0xff] %v5052_v17   ;;  %v4100_v58 = vpop.f32.mrb[29].mxu0 }
 0x28c   : > { %5090 = vst [vmem:[%s7402_s21 + $0x60] sm:$0xff] %v5047_v21   ;;  %v4332_v22 = vadd.f32 %v5782_v36, %v4331_v33  ;;  %v4400_v48 = vadd.f32 %v4399_v49, %v4369_v0  ;;  %v5548_v39 = vpop.f32.mrb[28].mxu1  ;;  %v5741_v55 = vpop.f32.mrb[30].mxu0 }
 0x28d   : > { %v3010_v29 = vpop.f32.mrb[29].mxu1  ;;  %v5786_v47 = vadd.f32 %v5740_v34, %v5548_v39  ;;  %v4103_v41 = vpop.f32.mrb[31].mxu0 }
 0x28e   : > { %v4401_v53 = vadd.f32 %v4400_v48, %v4370_v31  ;;  %v5549_v6 = vpop.f32.mrb[30].mxu1  ;;  %v5787_v35 = vadd.f32 %v4100_v58, %v3010_v29  ;;  %v4333_v8 = vadd.f32 %v5784_v62, %v4332_v22 }
 0x28f   : > { %v3013_v50 = vpop.f32.mrb[31].mxu1  ;;  %v5788_v14 = vadd.f32 %v5741_v55, %v5549_v6  ;;  %v4374_v30 = vmul.f32 %v5786_v47, %v5786_v47 }
 0x290   : > { %v4334_v9 = vadd.f32 %v5787_v35, %v4333_v8  ;;  %v4372_v1 = vmul.f32 %v5787_v35, %v5787_v35  ;;  %v4402_v19 = vadd.f32 %v4401_v53, %v4371_v46  ;;  %v5789_v3 = vadd.f32 %v4103_v41, %v3013_v50 }
 0x291   : > { %v5062_v57 = vpack.c.bf16 %v5788_v14, %v5786_v47  ;;  %v4375_v7 = vmul.f32 %v5788_v14, %v5788_v14 }
 0x292   : > { %v4403_v37 = vadd.f32 %v4402_v19, %v4372_v1  ;;  %v5057_v24 = vpack.c.bf16 %v5789_v3, %v5787_v35  ;;  %v4335_v43 = vadd.f32 %v5789_v3, %v4334_v9  ;;  %v4373_v44 = vmul.f32 %v5789_v3, %v5789_v3 }
 0x293   : > { %5093 = vst [vmem:[%s7402_s21 + $0x78] sm:$0xff] %v5062_v57  }
 0x294   : > { %5092 = vst [vmem:[%s7402_s21 + $0x70] sm:$0xff] %v5057_v24   ;;  %v4336_v61 = vadd.f32 %v5786_v47, %v4335_v43  ;;  %v4404_v38 = vadd.f32 %v4403_v37, %v4373_v44 }
 0x296   : > { %v4337_v12 = vadd.f32 %v5788_v14, %v4336_v61  ;;  %v4405_v5 = vadd.f32 %v4404_v38, %v4374_v30 }
 0x298   : > { %v4338_v23 = vrot.slane %v4337_v12, 4  ;;  %v4406_v4 = vadd.f32 %v4405_v5, %v4375_v7 }
 0x29a   : > { %v4339_v18 = vadd.f32 %v4338_v23, %v4337_v12  ;;  %v4407_v26 = vrot.slane %v4406_v4, 4 }
 0x29c   : > { %v4340_v63 = vrot.slane %v4339_v18, 2  ;;  %v4408_v51 = vadd.f32 %v4407_v26, %v4406_v4 }
 0x29e   : > { %v4341_v16 = vadd.f32 %v4340_v63, %v4339_v18  ;;  %v4409_v20 = vrot.slane %v4408_v51, 2 }
 0x2a0   : > { %v4342_v32 = vrot.slane %v4341_v16, 1  ;;  %v4410_v45 = vadd.f32 %v4409_v20, %v4408_v51 }
 0x2a2   : > { %v4411_v42 = vrot.slane %v4410_v45, 1  ;;  %v4343_v15 = vadd.f32 %v4342_v32, %v4341_v16 }
 0x2a4   : > { %v4412_v36 = vadd.f32 %v4411_v42, %v4410_v45 }
 0x2a6   : > { %v4414_v28 = vsel %vm892_vm4, %v4343_v15, %v4412_v36 }
 0x2a7   : > { %v4416_v54 = vsel %vm4415_vm14, %v4414_v28, 0.0 }
 0x2a8   : > { %4417 = vst [vmem:[%s235_s25] sm:$0xff] %v4416_v54 }
 0x2a9 PF: > { %s16_s18 = sadd.s32 1, %s6151_s18  }
 0x2aa   : > { %p13_p4 = scmp.ge.s32.totalorder %s16_s18, 4  }
 0x2ac   :  { %15 = sbr.rel (!%p13_p4) target bundleno = 1 (0x1), region = 87 }

</bundles_post_ra>
